<compile_context>
chip_gen: v6e
topology: v6e:2x2x1
jax: 0.10.0
libtpu: 0.0.40
codegen_flags: <defaults>
</compile_context>

<pallas_src>
import functools

import jax
import jax.numpy as jnp
from jax import lax
from jax.experimental import pallas as pl
from jax.experimental.pallas import tpu as pltpu


# --------------------------------------------------------------------------- #
# Pallas kernel: (1x1 conv -> InstanceNorm2d -> ReLU) x 3                      #
#                -> max over the kNN neighbourhood -> Linear(128, 3)           #
# One batch instance per grid step.                                            #
# --------------------------------------------------------------------------- #
def _sa_fc_kernel(xyz_ref, pts_ref,
                  w0x_ref, w0p_ref, w12_ref, normp_ref, wfc_ref, bfc_ref,
                  out_ref, *, S, K):
    SK = S * K
    inv_n = 1.0 / float(SK)
    eps = 1e-5

    def inorm_relu_bf16(y, g, be):
        # InstanceNorm2d stats over the (nsample, npoint) spatial extent of this
        # batch instance == all SK rows; single pass, everything in f32.
        s1 = jnp.sum(y, axis=0, keepdims=True)                    # (1, C)
        s2 = jnp.sum(y * y, axis=0, keepdims=True)                # (1, C)
        mean = s1 * inv_n
        var = jnp.maximum(s2 * inv_n - mean * mean, 0.0)          # guard cancellation
        inv_std = lax.rsqrt(var + eps)                            # EUP rsqrt (free slot)
        scale = g * inv_std                                       # fold affine
        shift = be - mean * scale
        h = jnp.maximum(y * scale + shift, 0.0)                   # 1 FMA + ReLU per elem
        return h.astype(jnp.bfloat16)                             # bf16 back to the MXU

    xyz = xyz_ref[0]                                              # (SK, 3)   bf16
    pts = pts_ref[0]                                              # (SK, 128) bf16
    w0x = w0x_ref[...]                                            # (3, 128)  f32
    normp = normp_ref[...]                                        # (6, 128)  f32

    # ---- layer 0: 128-contraction on the MXU + 3-wide xyz term on the VPU ----
    y = jnp.dot(pts, w0p_ref[...], preferred_element_type=jnp.float32)
    for c in range(3):                                            # 3 broadcast FMAs
        y = y + xyz[:, c:c + 1].astype(jnp.float32) * w0x[c:c + 1, :]
    h = inorm_relu_bf16(y, normp[0:1], normp[1:2])

    # ---- layer 1 ----
    y = jnp.dot(h, w12_ref[0], preferred_element_type=jnp.float32)
    h = inorm_relu_bf16(y, normp[2:3], normp[3:4])

    # ---- layer 2 ----
    y = jnp.dot(h, w12_ref[1], preferred_element_type=jnp.float32)
    h = inorm_relu_bf16(y, normp[4:5], normp[5:6])

    # ---- max over the nsample (kNN) axis ----
    pooled = jnp.max(h.reshape(S, K, h.shape[-1]), axis=1)        # (S, 128) bf16

    # ---- fused fc: Linear(128, 3) ----
    flow = jnp.dot(pooled, wfc_ref[...],
                   preferred_element_type=jnp.float32) + bfc_ref[...]
    out_ref[0] = flow                                             # (S, 3) f32


def sa_fc_pallas(grouped_xyz, grouped_pts, params):
    """grouped_xyz: [B,S,K,3] (relative coords), grouped_pts: [B,S,K,128].
    Returns flow [B, S, 3]."""
    B, S, K, _ = grouped_xyz.shape
    C = grouped_pts.shape[-1]
    SK = S * K

    (w0, _b0, g0, be0), (w1, _b1, g1, be1), (w2, _b2, g2, be2) = params["sa1"]
    wfc, bfc = params["fc"]
    # b0/b1/b2 intentionally unused: conv bias directly before InstanceNorm is a no-op.

    # channels 0..2 of the concatenated grouped feature are the relative xyz
    # -> W rows 0..2 (standard sample_and_group cat order).
    w0x = w0[:3].astype(jnp.float32)                        # (3, 128)   stays on VPU
    w0p = w0[3:].astype(jnp.bfloat16)                       # (128, 128) MXU
    w12 = jnp.stack([w1, w2]).astype(jnp.bfloat16)          # (2, 128, 128)
    normp = jnp.stack([g0, be0, g1, be1, g2, be2]).astype(jnp.float32)   # (6, 128)
    wfc_b = wfc.astype(jnp.bfloat16)                        # (128, 3)
    bfc_b = bfc.reshape(1, 3).astype(jnp.float32)           # (1, 3)

    xyz3 = grouped_xyz.reshape(B, SK, 3).astype(jnp.bfloat16)
    pts3 = grouped_pts.reshape(B, SK, C).astype(jnp.bfloat16)

    kernel = functools.partial(_sa_fc_kernel, S=S, K=K)

    # Advisory cost estimate so XLA schedules this call against the gather/top-k glue.
    flops = 2 * B * SK * C * 128 * 3 + 2 * B * SK * 3 * 128 + 2 * B * S * 128 * 3
    bytes_accessed = (xyz3.size * 2 + pts3.size * 2
                      + w0x.size * 4 + w0p.size * 2 + w12.size * 2
                      + normp.size * 4 + wfc_b.size * 2 + bfc_b.size * 4
                      + B * S * 3 * 4)
    transcendentals = 3 * 128 * B                            # rsqrt per (layer, channel, batch)

    # VMEM budget: double-buffered per-step inputs + resident weights + f32 working slabs.
    step_in_bytes = SK * C * 2 + SK * 3 * 2
    weight_bytes = (w0x.size * 4 + w0p.size * 2 + w12.size * 2
                    + normp.size * 4 + wfc_b.size * 2 + bfc_b.size * 4)
    work_bytes = 2 * SK * C * 4
    vmem_limit = int(min(max(4 * step_in_bytes + 2 * weight_bytes + work_bytes + (1 << 20),
                             8 << 20), 32 << 20))

    return pl.pallas_call(
        kernel,
        out_shape=jax.ShapeDtypeStruct((B, S, 3), jnp.float32),
        grid_spec=pltpu.PrefetchScalarGridSpec(
            num_scalar_prefetch=0,
            grid=(B,),
            in_specs=[
                pl.BlockSpec((1, SK, 3), lambda b: (b, 0, 0)),      # grouped rel-xyz (bf16)
                pl.BlockSpec((1, SK, C), lambda b: (b, 0, 0)),      # grouped feats   (bf16)
                pl.BlockSpec((3, 128), lambda b: (0, 0)),           # w0 xyz rows (resident)
                pl.BlockSpec((C, 128), lambda b: (0, 0)),           # w0 feat rows (resident)
                pl.BlockSpec((2, 128, 128), lambda b: (0, 0, 0)),   # w1/w2 stacked (resident)
                pl.BlockSpec((6, 128), lambda b: (0, 0)),           # gamma/beta stacked
                pl.BlockSpec((128, 3), lambda b: (0, 0)),           # fc weight
                pl.BlockSpec((1, 3), lambda b: (0, 0)),             # fc bias
            ],
            out_specs=pl.BlockSpec((1, S, 3), lambda b: (b, 0, 0)),
        ),
        compiler_params=pltpu.CompilerParams(
            dimension_semantics=("parallel",),
            vmem_limit_bytes=vmem_limit,
        ),
        cost_estimate=pl.CostEstimate(flops=flops,
                                      transcendentals=transcendentals,
                                      bytes_accessed=bytes_accessed),
    )(xyz3, pts3, w0x, w0p, w12, normp, wfc_b, bfc_b)


# --------------------------------------------------------------------------- #
# Plain-JAX PointNet++ glue (data-dependent indexing)                          #
# --------------------------------------------------------------------------- #
def square_distance(src, dst):
    d = -2.0 * jnp.einsum("bnc,bmc->bnm", src, dst)
    d = d + jnp.sum(src ** 2, axis=-1)[:, :, None]
    d = d + jnp.sum(dst ** 2, axis=-1)[:, None, :]
    return d


def index_points(points, idx):
    return jax.vmap(lambda p, i: p[i])(points, idx)


# TODO(synk): farthest-point sampling, kNN top-k and the gathers are
# data-dependent indexing with no clean Pallas TPU equivalent; kept in JAX.
def farthest_point_sample(xyz, npoint):
    _, N, _ = xyz.shape

    def fps_one(pts):
        def body(i, state):
            centroids, distance, farthest = state
            centroids = centroids.at[i].set(farthest)
            centroid = pts[farthest]
            d = jnp.sum((pts - centroid) ** 2, axis=-1)
            distance = jnp.minimum(distance, d)
            return centroids, distance, jnp.argmax(distance).astype(jnp.int32)

        init = (jnp.zeros((npoint,), jnp.int32),
                jnp.full((N,), 1e10, jnp.float32),
                jnp.array(0, jnp.int32))   # deterministic start (CUDA FPS behaviour)
        centroids, _, _ = lax.fori_loop(0, npoint, body, init)
        return centroids

    return jax.vmap(fps_one)(xyz)


def knn_point(nsample, xyz, new_xyz):
    d = square_distance(new_xyz, xyz)          # [B, S, N]
    _, idx = lax.top_k(-d, nsample)
    return idx


# --------------------------------------------------------------------------- #
# Flow0Regressor forward                                                       #
# --------------------------------------------------------------------------- #
def flow0_regressor_forward(params, pc1_l_loc, corr_feats, npoint):
    xyz = pc1_l_loc[2]                                   # [B, 3, N]
    x = jnp.transpose(xyz, (0, 2, 1))                    # [B, N, 3]
    p = jnp.transpose(corr_feats, (0, 2, 1))             # [B, N, 128]

    S = npoint // 4                                      # sa1 npoint
    K = 32                                               # sa1 nsample

    fps_idx = farthest_point_sample(x, S)                # [B, S]
    new_xyz = index_points(x, fps_idx)                   # [B, S, 3]
    idx = knn_point(K, x, new_xyz)                       # [B, S, K]
    grouped_xyz = index_points(x, idx) - new_xyz[:, :, None, :]   # [B, S, K, 3]
    grouped_pts = index_points(p, idx)                   # [B, S, K, 128]

    flow = sa_fc_pallas(grouped_xyz, grouped_pts, params)  # [B, S, 3]  (Pallas)
    return jnp.transpose(flow, (0, 2, 1))                # [B, 3, S]


def init_params(key):
    """Deterministic synthetic parameters (shapes follow the module __init__)."""
    def mlp_layer(key, c_in, c_out):
        key, k1, k2 = jax.random.split(key, 3)
        w = jax.random.normal(k1, (c_in, c_out), jnp.float32) * (1.0 / (c_in ** 0.5))
        b = jax.random.normal(k2, (c_out,), jnp.float32) * 0.01
        gamma = jnp.ones((c_out,), jnp.float32)          # InstanceNorm affine init
        beta = jnp.zeros((c_out,), jnp.float32)
        return key, (w, b, gamma, beta)

    layers = []
    c_in = 128 + 3                                       # in_channel=128, +xyz
    for c_out in (128, 128, 128):                        # mlp=[128, 128, 128]
        key, layer = mlp_layer(key, c_in, c_out)
        layers.append(layer)
        c_in = c_out

    key, kw, kb = jax.random.split(key, 3)
    wfc = jax.random.normal(kw, (128, 3), jnp.float32) * (1.0 / (128 ** 0.5))
    bfc = jax.random.normal(kb, (3,), jnp.float32) * 0.01
    return {"sa1": tuple(layers), "fc": (wfc, bfc)}


if __name__ == "__main__":
    B = 2
    npoint = 64                                   # Flow0Regressor(npoint=64) -> S = 16
    N0, N1, N2 = 256, 128, 64                     # point-pyramid sizes; level 2 is used
    C_feat = 128                                  # corr_feats channels (in_channel=128)

    key = jax.random.PRNGKey(0)
    ks = jax.random.split(key, 4)
    pc1_l_loc = [jax.random.normal(ks[0], (B, 3, N0), jnp.float32) * 2.0,
                 jax.random.normal(ks[1], (B, 3, N1), jnp.float32) * 2.0,
                 jax.random.normal(ks[2], (B, 3, N2), jnp.float32) * 2.0]
    corr_feats = jax.random.normal(ks[3], (B, C_feat, N2), jnp.float32)

    params = init_params(jax.random.PRNGKey(42))

    fwd = jax.jit(functools.partial(flow0_regressor_forward, npoint=npoint))
    flow0 = fwd(params, pc1_l_loc, corr_feats)
    jax.block_until_ready(flow0)

    assert flow0.shape == (B, 3, npoint // 4), flow0.shape
    assert bool(jnp.all(jnp.isfinite(flow0)))
    print("KERNEL_OK")
</pallas_src>

<mosaic_0001>
module attributes {stable_mosaic.version = 11 : i64} {
  func.func @_sa_fc_kernel(%arg0: i32, %arg1: memref<1x512x3xbf16, #tpu.memory_space<vmem>>, %arg2: memref<1x512x128xbf16, #tpu.memory_space<vmem>>, %arg3: memref<3x128xf32, #tpu.memory_space<vmem>>, %arg4: memref<128x128xbf16, #tpu.memory_space<vmem>>, %arg5: memref<2x128x128xbf16, #tpu.memory_space<vmem>>, %arg6: memref<6x128xf32, #tpu.memory_space<vmem>>, %arg7: memref<128x3xbf16, #tpu.memory_space<vmem>>, %arg8: memref<1x3xf32, #tpu.memory_space<vmem>>, %arg9: memref<1x16x3xf32, #tpu.memory_space<vmem>>) attributes {dimension_semantics = [#tpu.dimension_semantics<parallel>], iteration_bounds = array<i64: 2>, scalar_prefetch = 0 : i64, scratch_operands = 0 : i64, tpu.core_type = #tpu.core_type<tc>, window_params = [{transform_indices = @transform_0, window_bounds = array<i64: 1, 512, 3>}, {transform_indices = @transform_1, window_bounds = array<i64: 1, 512, 128>}, {pipeline_mode = #tpu.pipeline_mode<synchronous>, transform_indices = @transform_2, window_bounds = array<i64: 3, 128>}, {pipeline_mode = #tpu.pipeline_mode<synchronous>, transform_indices = @transform_3, window_bounds = array<i64: 128, 128>}, {pipeline_mode = #tpu.pipeline_mode<synchronous>, transform_indices = @transform_4, window_bounds = array<i64: 2, 128, 128>}, {pipeline_mode = #tpu.pipeline_mode<synchronous>, transform_indices = @transform_5, window_bounds = array<i64: 6, 128>}, {pipeline_mode = #tpu.pipeline_mode<synchronous>, transform_indices = @transform_6, window_bounds = array<i64: 128, 3>}, {pipeline_mode = #tpu.pipeline_mode<synchronous>, transform_indices = @transform_7, window_bounds = array<i64: 1, 3>}, {transform_indices = @transform_8, window_bounds = array<i64: 1, 16, 3>}]} {
    %c0 = arith.constant 0 : index
    %c0_0 = arith.constant 0 : index
    %c0_1 = arith.constant 0 : index
    %0 = vector.load %arg1[%c0, %c0_0, %c0_1] : memref<1x512x3xbf16, #tpu.memory_space<vmem>>, vector<1x512x3xbf16>
    %1 = vector.shape_cast %0 : vector<1x512x3xbf16> to vector<512x3xbf16>
    %c0_2 = arith.constant 0 : index
    %c0_3 = arith.constant 0 : index
    %c0_4 = arith.constant 0 : index
    %2 = vector.load %arg2[%c0_2, %c0_3, %c0_4] : memref<1x512x128xbf16, #tpu.memory_space<vmem>>, vector<1x512x128xbf16>
    %3 = vector.shape_cast %2 : vector<1x512x128xbf16> to vector<512x128xbf16>
    %c0_5 = arith.constant 0 : index
    %c0_6 = arith.constant 0 : index
    %4 = vector.load %arg3[%c0_5, %c0_6] : memref<3x128xf32, #tpu.memory_space<vmem>>, vector<3x128xf32>
    %c0_7 = arith.constant 0 : index
    %c0_8 = arith.constant 0 : index
    %5 = vector.load %arg6[%c0_7, %c0_8] : memref<6x128xf32, #tpu.memory_space<vmem>>, vector<6x128xf32>
    %c0_9 = arith.constant 0 : index
    %c0_10 = arith.constant 0 : index
    %6 = vector.load %arg4[%c0_9, %c0_10] : memref<128x128xbf16, #tpu.memory_space<vmem>>, vector<128x128xbf16>
    %cst = arith.constant dense<0.000000e+00> : vector<512x128xf32>
    %7 = tpu.matmul %3, %6, %cst {dimension_numbers = #tpu.dot_dimension_numbers<[1], [0], [0], [1], [0, 0, 1, 1], [], []>} : vector<512x128xbf16>, vector<128x128xbf16>, vector<512x128xf32> -> vector<512x128xf32>
    %8 = vector.extract_strided_slice %1 {offsets = [0, 0], sizes = [512, 1], strides = [1, 1]} : vector<512x3xbf16> to vector<512x1xbf16>
    %9 = arith.extf %8 : vector<512x1xbf16> to vector<512x1xf32>
    %10 = vector.extract_strided_slice %4 {offsets = [0, 0], sizes = [1, 128], strides = [1, 1]} : vector<3x128xf32> to vector<1x128xf32>
    %11 = vector.broadcast %9 : vector<512x1xf32> to vector<512x128xf32>
    %12 = vector.broadcast %10 : vector<1x128xf32> to vector<512x128xf32>
    %13 = arith.mulf %11, %12 : vector<512x128xf32>
    %14 = arith.addf %7, %13 : vector<512x128xf32>
    %15 = vector.extract_strided_slice %1 {offsets = [0, 1], sizes = [512, 1], strides = [1, 1]} : vector<512x3xbf16> to vector<512x1xbf16>
    %16 = arith.extf %15 : vector<512x1xbf16> to vector<512x1xf32>
    %17 = vector.extract_strided_slice %4 {offsets = [1, 0], sizes = [1, 128], strides = [1, 1]} : vector<3x128xf32> to vector<1x128xf32>
    %18 = vector.broadcast %16 : vector<512x1xf32> to vector<512x128xf32>
    %19 = vector.broadcast %17 : vector<1x128xf32> to vector<512x128xf32>
    %20 = arith.mulf %18, %19 : vector<512x128xf32>
    %21 = arith.addf %14, %20 : vector<512x128xf32>
    %22 = vector.extract_strided_slice %1 {offsets = [0, 2], sizes = [512, 1], strides = [1, 1]} : vector<512x3xbf16> to vector<512x1xbf16>
    %23 = arith.extf %22 : vector<512x1xbf16> to vector<512x1xf32>
    %24 = vector.extract_strided_slice %4 {offsets = [2, 0], sizes = [1, 128], strides = [1, 1]} : vector<3x128xf32> to vector<1x128xf32>
    %25 = vector.broadcast %23 : vector<512x1xf32> to vector<512x128xf32>
    %26 = vector.broadcast %24 : vector<1x128xf32> to vector<512x128xf32>
    %27 = arith.mulf %25, %26 : vector<512x128xf32>
    %28 = arith.addf %21, %27 : vector<512x128xf32>
    %29 = vector.extract_strided_slice %5 {offsets = [0, 0], sizes = [1, 128], strides = [1, 1]} : vector<6x128xf32> to vector<1x128xf32>
    %30 = vector.extract_strided_slice %5 {offsets = [1, 0], sizes = [1, 128], strides = [1, 1]} : vector<6x128xf32> to vector<1x128xf32>
    %cst_11 = arith.constant dense<0.000000e+00> : vector<128xf32>
    %31 = vector.multi_reduction <add>, %28, %cst_11 [0] : vector<512x128xf32> to vector<128xf32>
    %32 = vector.shape_cast %31 : vector<128xf32> to vector<1x128xf32>
    %33 = arith.mulf %28, %28 : vector<512x128xf32>
    %cst_12 = arith.constant dense<0.000000e+00> : vector<128xf32>
    %34 = vector.multi_reduction <add>, %33, %cst_12 [0] : vector<512x128xf32> to vector<128xf32>
    %35 = vector.shape_cast %34 : vector<128xf32> to vector<1x128xf32>
    %cst_13 = arith.constant 0.001953125 : f32
    %36 = vector.broadcast %cst_13 : f32 to vector<1x128xf32>
    %37 = arith.mulf %32, %36 : vector<1x128xf32>
    %cst_14 = arith.constant 0.001953125 : f32
    %38 = vector.broadcast %cst_14 : f32 to vector<1x128xf32>
    %39 = arith.mulf %35, %38 : vector<1x128xf32>
    %40 = arith.mulf %37, %37 : vector<1x128xf32>
    %41 = arith.subf %39, %40 : vector<1x128xf32>
    %cst_15 = arith.constant 0.000000e+00 : f32
    %42 = vector.broadcast %cst_15 : f32 to vector<1x128xf32>
    %43 = arith.maximumf %41, %42 : vector<1x128xf32>
    %cst_16 = arith.constant 9.99999974E-6 : f32
    %44 = vector.broadcast %cst_16 : f32 to vector<1x128xf32>
    %45 = arith.addf %43, %44 : vector<1x128xf32>
    %46 = math.rsqrt %45 : vector<1x128xf32>
    %47 = arith.mulf %29, %46 : vector<1x128xf32>
    %48 = arith.mulf %37, %47 : vector<1x128xf32>
    %49 = arith.subf %30, %48 : vector<1x128xf32>
    %50 = vector.broadcast %47 : vector<1x128xf32> to vector<512x128xf32>
    %51 = arith.mulf %28, %50 : vector<512x128xf32>
    %52 = vector.broadcast %49 : vector<1x128xf32> to vector<512x128xf32>
    %53 = arith.addf %51, %52 : vector<512x128xf32>
    %cst_17 = arith.constant 0.000000e+00 : f32
    %54 = vector.broadcast %cst_17 : f32 to vector<512x128xf32>
    %55 = arith.maximumf %53, %54 : vector<512x128xf32>
    %56 = arith.truncf %55 : vector<512x128xf32> to vector<512x128xbf16>
    %c0_18 = arith.constant 0 : index
    %c0_19 = arith.constant 0 : index
    %c0_20 = arith.constant 0 : index
    %57 = vector.load %arg5[%c0_18, %c0_19, %c0_20] : memref<2x128x128xbf16, #tpu.memory_space<vmem>>, vector<1x128x128xbf16>
    %58 = vector.shape_cast %57 : vector<1x128x128xbf16> to vector<128x128xbf16>
    %cst_21 = arith.constant dense<0.000000e+00> : vector<512x128xf32>
    %59 = tpu.matmul %56, %58, %cst_21 {dimension_numbers = #tpu.dot_dimension_numbers<[1], [0], [0], [1], [0, 0, 1, 1], [], []>} : vector<512x128xbf16>, vector<128x128xbf16>, vector<512x128xf32> -> vector<512x128xf32>
    %60 = vector.extract_strided_slice %5 {offsets = [2, 0], sizes = [1, 128], strides = [1, 1]} : vector<6x128xf32> to vector<1x128xf32>
    %61 = vector.extract_strided_slice %5 {offsets = [3, 0], sizes = [1, 128], strides = [1, 1]} : vector<6x128xf32> to vector<1x128xf32>
    %cst_22 = arith.constant dense<0.000000e+00> : vector<128xf32>
    %62 = vector.multi_reduction <add>, %59, %cst_22 [0] : vector<512x128xf32> to vector<128xf32>
    %63 = vector.shape_cast %62 : vector<128xf32> to vector<1x128xf32>
    %64 = arith.mulf %59, %59 : vector<512x128xf32>
    %cst_23 = arith.constant dense<0.000000e+00> : vector<128xf32>
    %65 = vector.multi_reduction <add>, %64, %cst_23 [0] : vector<512x128xf32> to vector<128xf32>
    %66 = vector.shape_cast %65 : vector<128xf32> to vector<1x128xf32>
    %cst_24 = arith.constant 0.001953125 : f32
    %67 = vector.broadcast %cst_24 : f32 to vector<1x128xf32>
    %68 = arith.mulf %63, %67 : vector<1x128xf32>
    %cst_25 = arith.constant 0.001953125 : f32
    %69 = vector.broadcast %cst_25 : f32 to vector<1x128xf32>
    %70 = arith.mulf %66, %69 : vector<1x128xf32>
    %71 = arith.mulf %68, %68 : vector<1x128xf32>
    %72 = arith.subf %70, %71 : vector<1x128xf32>
    %cst_26 = arith.constant 0.000000e+00 : f32
    %73 = vector.broadcast %cst_26 : f32 to vector<1x128xf32>
    %74 = arith.maximumf %72, %73 : vector<1x128xf32>
    %cst_27 = arith.constant 9.99999974E-6 : f32
    %75 = vector.broadcast %cst_27 : f32 to vector<1x128xf32>
    %76 = arith.addf %74, %75 : vector<1x128xf32>
    %77 = math.rsqrt %76 : vector<1x128xf32>
    %78 = arith.mulf %60, %77 : vector<1x128xf32>
    %79 = arith.mulf %68, %78 : vector<1x128xf32>
    %80 = arith.subf %61, %79 : vector<1x128xf32>
    %81 = vector.broadcast %78 : vector<1x128xf32> to vector<512x128xf32>
    %82 = arith.mulf %59, %81 : vector<512x128xf32>
    %83 = vector.broadcast %80 : vector<1x128xf32> to vector<512x128xf32>
    %84 = arith.addf %82, %83 : vector<512x128xf32>
    %cst_28 = arith.constant 0.000000e+00 : f32
    %85 = vector.broadcast %cst_28 : f32 to vector<512x128xf32>
    %86 = arith.maximumf %84, %85 : vector<512x128xf32>
    %87 = arith.truncf %86 : vector<512x128xf32> to vector<512x128xbf16>
    %c1 = arith.constant 1 : index
    %c0_29 = arith.constant 0 : index
    %c0_30 = arith.constant 0 : index
    %88 = vector.load %arg5[%c1, %c0_29, %c0_30] : memref<2x128x128xbf16, #tpu.memory_space<vmem>>, vector<1x128x128xbf16>
    %89 = vector.shape_cast %88 : vector<1x128x128xbf16> to vector<128x128xbf16>
    %cst_31 = arith.constant dense<0.000000e+00> : vector<512x128xf32>
    %90 = tpu.matmul %87, %89, %cst_31 {dimension_numbers = #tpu.dot_dimension_numbers<[1], [0], [0], [1], [0, 0, 1, 1], [], []>} : vector<512x128xbf16>, vector<128x128xbf16>, vector<512x128xf32> -> vector<512x128xf32>
    %91 = vector.extract_strided_slice %5 {offsets = [4, 0], sizes = [1, 128], strides = [1, 1]} : vector<6x128xf32> to vector<1x128xf32>
    %92 = vector.extract_strided_slice %5 {offsets = [5, 0], sizes = [1, 128], strides = [1, 1]} : vector<6x128xf32> to vector<1x128xf32>
    %cst_32 = arith.constant dense<0.000000e+00> : vector<128xf32>
    %93 = vector.multi_reduction <add>, %90, %cst_32 [0] : vector<512x128xf32> to vector<128xf32>
    %94 = vector.shape_cast %93 : vector<128xf32> to vector<1x128xf32>
    %95 = arith.mulf %90, %90 : vector<512x128xf32>
    %cst_33 = arith.constant dense<0.000000e+00> : vector<128xf32>
    %96 = vector.multi_reduction <add>, %95, %cst_33 [0] : vector<512x128xf32> to vector<128xf32>
    %97 = vector.shape_cast %96 : vector<128xf32> to vector<1x128xf32>
    %cst_34 = arith.constant 0.001953125 : f32
    %98 = vector.broadcast %cst_34 : f32 to vector<1x128xf32>
    %99 = arith.mulf %94, %98 : vector<1x128xf32>
    %cst_35 = arith.constant 0.001953125 : f32
    %100 = vector.broadcast %cst_35 : f32 to vector<1x128xf32>
    %101 = arith.mulf %97, %100 : vector<1x128xf32>
    %102 = arith.mulf %99, %99 : vector<1x128xf32>
    %103 = arith.subf %101, %102 : vector<1x128xf32>
    %cst_36 = arith.constant 0.000000e+00 : f32
    %104 = vector.broadcast %cst_36 : f32 to vector<1x128xf32>
    %105 = arith.maximumf %103, %104 : vector<1x128xf32>
    %cst_37 = arith.constant 9.99999974E-6 : f32
    %106 = vector.broadcast %cst_37 : f32 to vector<1x128xf32>
    %107 = arith.addf %105, %106 : vector<1x128xf32>
    %108 = math.rsqrt %107 : vector<1x128xf32>
    %109 = arith.mulf %91, %108 : vector<1x128xf32>
    %110 = arith.mulf %99, %109 : vector<1x128xf32>
    %111 = arith.subf %92, %110 : vector<1x128xf32>
    %112 = vector.broadcast %109 : vector<1x128xf32> to vector<512x128xf32>
    %113 = arith.mulf %90, %112 : vector<512x128xf32>
    %114 = vector.broadcast %111 : vector<1x128xf32> to vector<512x128xf32>
    %115 = arith.addf %113, %114 : vector<512x128xf32>
    %cst_38 = arith.constant 0.000000e+00 : f32
    %116 = vector.broadcast %cst_38 : f32 to vector<512x128xf32>
    %117 = arith.maximumf %115, %116 : vector<512x128xf32>
    %118 = arith.truncf %117 : vector<512x128xf32> to vector<512x128xbf16>
    %119 = vector.shape_cast %118 : vector<512x128xbf16> to vector<16x32x128xbf16>
    %cst_39 = arith.constant dense<0xFF80> : vector<16x128xbf16>
    %120 = vector.multi_reduction <maximumf>, %119, %cst_39 [1] : vector<16x32x128xbf16> to vector<16x128xbf16>
    %c0_40 = arith.constant 0 : index
    %c0_41 = arith.constant 0 : index
    %121 = vector.load %arg7[%c0_40, %c0_41] : memref<128x3xbf16, #tpu.memory_space<vmem>>, vector<128x3xbf16>
    %cst_42 = arith.constant dense<0.000000e+00> : vector<16x3xf32>
    %122 = tpu.matmul %120, %121, %cst_42 {dimension_numbers = #tpu.dot_dimension_numbers<[1], [0], [0], [1], [0, 0, 1, 1], [], []>} : vector<16x128xbf16>, vector<128x3xbf16>, vector<16x3xf32> -> vector<16x3xf32>
    %c0_43 = arith.constant 0 : index
    %c0_44 = arith.constant 0 : index
    %123 = vector.load %arg8[%c0_43, %c0_44] : memref<1x3xf32, #tpu.memory_space<vmem>>, vector<1x3xf32>
    %124 = vector.broadcast %123 : vector<1x3xf32> to vector<16x3xf32>
    %125 = arith.addf %122, %124 : vector<16x3xf32>
    %c0_45 = arith.constant 0 : index
    %c0_46 = arith.constant 0 : index
    %c0_47 = arith.constant 0 : index
    %126 = vector.load %arg9[%c0_45, %c0_46, %c0_47] : memref<1x16x3xf32, #tpu.memory_space<vmem>>, vector<1x16x3xf32>
    %127 = vector.shape_cast %126 : vector<1x16x3xf32> to vector<16x3xf32>
    %128 = vector.shape_cast %125 : vector<16x3xf32> to vector<1x16x3xf32>
    tpu.vector_store %arg9[%c0_45, %c0_46, %c0_47], %128 {strides = array<i32>} : memref<1x16x3xf32, #tpu.memory_space<vmem>>, vector<1x16x3xf32>,
    return
  }
  func.func @transform_0(%arg0: i32) -> (i32, i32, i32) {
    %c0_i32 = arith.constant 0 : i32
    %c0_i32_0 = arith.constant 0 : i32
    %c0_i32_1 = arith.constant 0 : i32
    return %arg0, %c0_i32, %c0_i32_0 : i32, i32, i32
  }
  func.func @transform_1(%arg0: i32) -> (i32, i32, i32) {
    %c0_i32 = arith.constant 0 : i32
    %c0_i32_0 = arith.constant 0 : i32
    %c0_i32_1 = arith.constant 0 : i32
    return %arg0, %c0_i32, %c0_i32_0 : i32, i32, i32
  }
  func.func @transform_2(%arg0: i32) -> (i32, i32) {
    %c0_i32 = arith.constant 0 : i32
    %c0_i32_0 = arith.constant 0 : i32
    %c0_i32_1 = arith.constant 0 : i32
    return %c0_i32, %c0_i32_0 : i32, i32
  }
  func.func @transform_3(%arg0: i32) -> (i32, i32) {
    %c0_i32 = arith.constant 0 : i32
    %c0_i32_0 = arith.constant 0 : i32
    %c0_i32_1 = arith.constant 0 : i32
    return %c0_i32, %c0_i32_0 : i32, i32
  }
  func.func @transform_4(%arg0: i32) -> (i32, i32, i32) {
    %c0_i32 = arith.constant 0 : i32
    %c0_i32_0 = arith.constant 0 : i32
    %c0_i32_1 = arith.constant 0 : i32
    %c0_i32_2 = arith.constant 0 : i32
    return %c0_i32, %c0_i32_0, %c0_i32_1 : i32, i32, i32
  }
  func.func @transform_5(%arg0: i32) -> (i32, i32) {
    %c0_i32 = arith.constant 0 : i32
    %c0_i32_0 = arith.constant 0 : i32
    %c0_i32_1 = arith.constant 0 : i32
    return %c0_i32, %c0_i32_0 : i32, i32
  }
  func.func @transform_6(%arg0: i32) -> (i32, i32) {
    %c0_i32 = arith.constant 0 : i32
    %c0_i32_0 = arith.constant 0 : i32
    %c0_i32_1 = arith.constant 0 : i32
    return %c0_i32, %c0_i32_0 : i32, i32
  }
  func.func @transform_7(%arg0: i32) -> (i32, i32) {
    %c0_i32 = arith.constant 0 : i32
    %c0_i32_0 = arith.constant 0 : i32
    %c0_i32_1 = arith.constant 0 : i32
    return %c0_i32, %c0_i32_0 : i32, i32
  }
  func.func @transform_8(%arg0: i32) -> (i32, i32, i32) {
    %c0_i32 = arith.constant 0 : i32
    %c0_i32_0 = arith.constant 0 : i32
    %c0_i32_1 = arith.constant 0 : i32
    return %arg0, %c0_i32, %c0_i32_0 : i32, i32, i32
  }
}

</mosaic_0001>

<bundles_post_ra>
// kernel: custom-call.8
= control target key start
LH: loop header
LB: loop body
LE: loop exit
PB: predicated region body
PF: predicated region fallthrough
CT: control target
= control target key end

     0   :  { %s6_s0 = inlined_call_operand.vmem [shape: f32[2,64], index: 0, kind: output, shape index: {}]  }

// kernel: flow0_regressor_forward.1
= control target key start
LH: loop header
LB: loop body
LE: loop exit
PB: predicated region body
PF: predicated region fallthrough
CT: control target
= control target key end

     0   :  { %s6037_s27 = smov 0   ;;  %s9369_s0 = inlined_call_operand.vmem [shape: bf16[2,512,3], index: 0, kind: input, shape index: {}]   ;;  %s9370_s1 = inlined_call_operand.vmem [shape: bf16[2,512,128], index: 1, kind: input, shape index: {}]   ;;  %s9371_s2 = inlined_call_operand.vmem [shape: f32[3,128], index: 2, kind: input, shape index: {}]   ;;  %s9372_s3 = inlined_call_operand.vmem [shape: bf16[128,128], index: 3, kind: input, shape index: {}]   ;;  %s9373_s4 = inlined_call_operand.vmem [shape: bf16[2,128,128], index: 4, kind: input, shape index: {}]   ;;  %s9374_s5 = inlined_call_operand.vmem [shape: f32[6,128], index: 5, kind: input, shape index: {}]   ;;  %s9375_s6 = inlined_call_operand.vmem [shape: bf16[128,3], index: 6, kind: input, shape index: {}]   ;;  %s9376_s7 = inlined_call_operand.vmem [shape: f32[1,3], index: 7, kind: input, shape index: {}]   ;;  %s9377_s8 = inlined_call_operand.vmem [shape: f32[2,16,3], index: 8, kind: output, shape index: {}]  }
   0x1 LB: > { %s4691_s28 = sadd.s32 4294967295, %s5985_s27   ;;  %p4695_p0 = scmp.ge.s32.totalorder %s5985_s27, 1  ;;  %s5985_s27 = sphi %s6037_s27, %s18_s27  }
   0x2   : > { %p272_p1 = scmp.lt.s32.totalorder %s5985_s27, 3 }
   0x4   : > { %p273_p2 = pnand %p4695_p0, %p272_p1 }
   0x6   : > { %276 = sbr.rel (%p273_p2) target bundleno = 1558 (0x616), region = 52 }
   0xb   : > { %v5907_v0 = vld [vmem:[%s9372_s3 + $0x38] sm:$0xff]   ;;  %v5908_v1 = vld [vmem:[%s9372_s3 + $0x30] sm:$0xff]   ;;  %v9382_v2 = vmov 1   ;;  %p311_p3 = scmp.lt.s32.totalorder %s4691_s28, 1  ;;  %v9384_v3 = vmov 0   ;;  %v5909_v4 = vld [vmem:[%s9372_s3 + $0x28] sm:$0xff]  }
   0xc   : > { %5371 = vset.pattern.permute.xlu1 %v9382_v2  ;;  %5076 = vmatprep.subr.bf16.mxu0 %v5907_v0  ;;  %v5910_v9 = vld [vmem:[%s9372_s3 + $0x20] sm:$0xff]   ;;  %v5911_v16 = vld [vmem:[%s9372_s3 + $0x18] sm:$0xff]   ;;  %v5912_v19 = vld [vmem:[%s9372_s3 + $0x10] sm:$0xff]   ;;  %v9386_v21 = vmov 2   ;;  %vm5991_vm0 = vmmov 0   ;;  %vm4509_vm1 = vcmask 1041409  }
   0xd   : > { %5336 = vmatprep.subr.bf16.mxu1 %v5907_v0  ;;  %5077 = vmatpush3.bf16.msra.mxu0 %v5907_v0  ;;  %s9741_s28 = smov (!%p311_p3, %s4691_s28), 1  ;;  %v5913_v26 = vld [vmem:[%s9372_s3 + $0x8] sm:$0xff]   ;;  %v5914_v37 = vld [vmem:[%s9372_s3] sm:$0xff]   ;;  %vm4511_vm2 = vcmask 1042434   ;;  %vm4513_vm3 = vcmask 1043459   ;;  %vm4515_vm4 = vcmask 1044484  }
   0xe   : > { %5365 = vset.pattern.permute.xlu0 %v9384_v3  ;;  %5078 = vmatprep.subr.bf16.mxu0 %v5908_v1  ;;  %s4785_s13 = sshll.u32 %s9741_s28, 8  ;;  %vm4517_vm5 = vcmask 1045509   ;;  %vm4519_vm6 = vcmask 1046534   ;;  %vm4521_vm7 = vcmask 1047559   ;;  %s4787_s26 = sshll.u32 %s9741_s28, 4  ;;  %vm4621_vm8 = vcmask 23552  }
   0xf   : > { %5344 = vmatpush3.bf16.msra.mxu1 %v5907_v0  ;;  %s6062_s16 = scalar_lea.vmem %s9369_s0, %s4785_s13  ;;  %s6067_s19 = scalar_lea.vmem %s9370_s1, %s4785_s13 }
  0x10   : > { %5337 = vmatprep.subr.bf16.mxu1 %v5908_v1  ;;  %v4789_v5 = vld [vmem:[%s6062_s16] sm:$0xff]   ;;  %v4916_v6 = vld [vmem:[%s6062_s16 + $0x8] sm:$0xff]   ;;  %v4917_v12 = vld [vmem:[%s6062_s16 + $0x10] sm:$0xff]   ;;  %s325_s11 = scalar_lea.vmem %s9377_s8, %s4787_s26 }
  0x11   : > { %5079 = vmatpush3.bf16.msra.mxu0 %v5908_v1  ;;  %v4790_v7 = vunpack.c.l.bf16 %v4789_v5  ;;  %v4791_v8 = vunpack.c.h.bf16 %v4789_v5  ;;  %v4794_v10 = vunpack.c.l.bf16 %v4916_v6  ;;  %v4795_v11 = vunpack.c.h.bf16 %v4916_v6  ;;  %v5915_v14 = vld [vmem:[%s6067_s19] sm:$0xff]   ;;  %v4921_v22 = vld [vmem:[%s6062_s16 + $0x30] sm:$0xff]   ;;  %v4918_v23 = vld [vmem:[%s6062_s16 + $0x18] sm:$0xff]  }
  0x12   : > { %5080 = vmatprep.subr.bf16.mxu0 %v5909_v4  ;;  %v4798_v17 = vunpack.c.l.bf16 %v4917_v12  ;;  %v4799_v18 = vunpack.c.h.bf16 %v4917_v12  ;;  %5092 = vmatprep.mubr.bf16.mxu0 %v5915_v14  ;;  %v4814_v24 = vunpack.c.l.bf16 %v4921_v22  ;;  %v4815_v25 = vunpack.c.h.bf16 %v4921_v22  ;;  %v4926_v27 = vld [vmem:[%s6062_s16 + $0x58] sm:$0xff]   ;;  %v4927_v32 = vld [vmem:[%s6062_s16 + $0x60] sm:$0xff]   ;;  %v5916_v43 = vld [vmem:[%s6067_s19 + $0x8] sm:$0xff]  }
  0x13   : > { %5345 = vmatpush3.bf16.msra.mxu1 %v5908_v1  ;;  %v5372_v13 = vpack.i.bf16 %v4791_v8, %v4790_v7  ;;  %v5377_v15 = vpack.i.bf16 %v4795_v11, %v4794_v10  ;;  %v4922_v28 = vld [vmem:[%s6062_s16 + $0x38] sm:$0xff]   ;;  %v4802_v29 = vunpack.c.l.bf16 %v4918_v23  ;;  %v4834_v30 = vunpack.c.l.bf16 %v4926_v27  ;;  %v5931_v45 = vld [vmem:[%s6067_s19 + $0x90] sm:$0xff]   ;;  %v4919_v46 = vld [vmem:[%s6062_s16 + $0x20] sm:$0xff]  }
  0x14   : > { %5338 = vmatprep.subr.bf16.mxu1 %v5909_v4  ;;  %v6082_v20 = vpack.i.bf16 %v4799_v18, %v4798_v17  ;;  %v4835_v31 = vunpack.c.h.bf16 %v4926_v27  ;;  %v4803_v33 = vunpack.c.h.bf16 %v4918_v23  ;;  %v6096_v34 = vpack.i.bf16 %v4815_v25, %v4814_v24  ;;  %v5917_v47 = vld [vmem:[%s6067_s19 + $0x10] sm:$0xff]   ;;  %v5932_v48 = vld [vmem:[%s6067_s19 + $0x98] sm:$0xff]   ;;  %5128 = vmatprep.mubr.bf16.mxu1 %v5931_v45  ;;  %v5935_v52 = vld [vmem:[%s6067_s19 + $0xa0] sm:$0xff]  }
  0x15   : > { %5081 = vmatpush3.bf16.msra.mxu0 %v5909_v4  ;;  %5373 = vperm.xlu1 %5371, %v5372_v13   ;;  %v4838_v35 = vunpack.c.l.bf16 %v4927_v32  ;;  %v4839_v36 = vunpack.c.h.bf16 %v4927_v32  ;;  %v4818_v38 = vunpack.c.l.bf16 %v4922_v28  ;;  %v4819_v39 = vunpack.c.h.bf16 %v4922_v28  ;;  %v4933_v51 = vld [vmem:[%s6062_s16 + $0x90] sm:$0xff]   ;;  %v5918_v56 = vld [vmem:[%s6067_s19 + $0x18] sm:$0xff]   ;;  %v4932_v58 = vld [vmem:[%s6062_s16 + $0x88] sm:$0xff]  }
  0x16   : > { %5082 = vmatprep.subr.bf16.mxu0 %v5910_v9  ;;  %5367 = vperm.xlu0 %5365, %v5372_v13   ;;  %v6101_v40 = vpack.i.bf16 %v4835_v31, %v4834_v30  ;;  %v6106_v42 = vpack.i.bf16 %v4803_v33, %v4802_v29  ;;  %v4806_v49 = vunpack.c.l.bf16 %v4919_v46  ;;  %v4807_v50 = vunpack.c.h.bf16 %v4919_v46  ;;  %v5919_v59 = vld [vmem:[%s6067_s19 + $0x20] sm:$0xff]   ;;  %v4920_v60 = vld [vmem:[%s6062_s16 + $0x28] sm:$0xff]   ;;  %v4934_v63 = vld [vmem:[%s6062_s16 + $0x98] sm:$0xff]  }
  0x17   : > { %5346 = vmatpush3.bf16.msra.mxu1 %v5909_v4  ;;  %v6104_v41 = vpack.i.bf16 %v4839_v36, %v4838_v35  ;;  %v6110_v44 = vpack.i.bf16 %v4819_v39, %v4818_v38  ;;  %v4862_v53 = vunpack.c.l.bf16 %v4933_v51  ;;  %v4863_v54 = vunpack.c.h.bf16 %v4933_v51  ;;  %v5936_v0 = vld [vmem:[%s6067_s19 + $0xa8] sm:$0xff]   ;;  %v5937_v5 = vld [vmem:[%s6067_s19 + $0xb0] sm:$0xff]   ;;  %v4923_v11 = vld [vmem:[%s6062_s16 + $0x40] sm:$0xff]  }
  0x18   : > { %5339 = vmatprep.subr.bf16.mxu1 %v5910_v9  ;;  %v6124_v55 = vpack.i.bf16 %v4807_v50, %v4806_v49  ;;  %v4858_v61 = vunpack.c.l.bf16 %v4932_v58  ;;  %v4859_v62 = vunpack.c.h.bf16 %v4932_v58  ;;  %v4810_v1 = vunpack.c.l.bf16 %v4920_v60  ;;  %v5920_v7 = vld [vmem:[%s6067_s19 + $0x28] sm:$0xff]   ;;  %v5921_v10 = vld [vmem:[%s6067_s19 + $0x30] sm:$0xff]   ;;  %v5938_v14 = vld [vmem:[%s6067_s19 + $0xb8] sm:$0xff]  }
  0x19   : > { %5083 = vmatpush3.bf16.msra.mxu0 %v5910_v9  ;;  %5378 = vperm.xlu1 %5371, %v5377_v15   ;;  %v6127_v57 = vpack.i.bf16 %v4863_v54, %v4862_v53  ;;  %v4811_v4 = vunpack.c.h.bf16 %v4920_v60  ;;  %v4866_v8 = vunpack.c.l.bf16 %v4934_v63  ;;  %v4823_v17 = vunpack.c.h.bf16 %v4923_v11  ;;  %v5922_v18 = vld [vmem:[%s6067_s19 + $0x38] sm:$0xff]   ;;  %v5923_v22 = vld [vmem:[%s6067_s19 + $0x40] sm:$0xff]   ;;  %v5940_v23 = vld [vmem:[%s6067_s19 + $0xc8] sm:$0xff]  }
  0x1a   : > { %5084 = vmatprep.subr.bf16.mxu0 %v5911_v16  ;;  %5382 = vset.pattern.permute.xlu0 %v9386_v21  ;;  %v6138_v6 = vpack.i.bf16 %v4859_v62, %v4858_v61  ;;  %v5924_v27 = vld [vmem:[%s6067_s19 + $0x48] sm:$0xff]   ;;  %v5925_v29 = vld [vmem:[%s6067_s19 + $0x50] sm:$0xff]   ;;  %v5942_v30 = vld [vmem:[%s6067_s19 + $0xd8] sm:$0xff]  }
  0x1b   : > { %5384 = vperm.xlu0 %5382, %v5372_v13   ;;  %5347 = vmatpush3.bf16.msra.mxu1 %v5910_v9  ;;  %v4867_v9 = vunpack.c.h.bf16 %v4934_v63  ;;  %v5431_v13 = vpack.i.bf16 %v4811_v4, %v4810_v1  ;;  %v4936_v31 = vld [vmem:[%s6062_s16 + $0xa8] sm:$0xff]   ;;  %v5943_v32 = vld [vmem:[%s6067_s19 + $0xe0] sm:$0xff]   ;;  %v5926_v36 = vld [vmem:[%s6067_s19 + $0x58] sm:$0xff]  }
  0x1c   : > { %5340 = vmatprep.subr.bf16.mxu1 %v5911_v16  ;;  %v4874_v33 = vunpack.c.l.bf16 %v4936_v31  ;;  %v4875_v35 = vunpack.c.h.bf16 %v4936_v31  ;;  %v5944_v39 = vld [vmem:[%s6067_s19 + $0xe8] sm:$0xff]   ;;  %v5945_v45 = vld [vmem:[%s6067_s19 + $0xf0] sm:$0xff]   ;;  %v4938_v46 = vld [vmem:[%s6062_s16 + $0xb8] sm:$0xff]  }
  0x1d   : > { %5085 = vmatpush3.bf16.msra.mxu0 %v5911_v16  ;;  %5394 = vset.pattern.permute.xlu1 %v9384_v3  ;;  %v6147_v12 = vpack.i.bf16 %v4867_v9, %v4866_v8  ;;  %v5929_v49 = vld [vmem:[%s6067_s19 + $0x70] sm:$0xff]   ;;  %v4882_v50 = vunpack.c.l.bf16 %v4938_v46  ;;  %v4883_v51 = vunpack.c.h.bf16 %v4938_v46  ;;  %v5930_v60 = vld [vmem:[%s6067_s19 + $0x78] sm:$0xff]   ;;  %v5933_v62 = vld [vmem:[%s6067_s19 + $0x80] sm:$0xff]  }
  0x1e   : > { %5086 = vmatprep.subr.bf16.mxu0 %v5912_v19  ;;  %5396 = vperm.xlu1 %5394, %v6082_v20   ;;  %v6180_v38 = vpack.i.bf16 %v4875_v35, %v4874_v33  ;;  %v4929_v4 = vld [vmem:[%s6062_s16 + $0x70] sm:$0xff]   ;;  %v5934_v8 = vld [vmem:[%s6067_s19 + $0x88] sm:$0xff]  }
  0x1f   : > { %5388 = vset.pattern.permute.xlu0 %v9384_v3  ;;  %5348 = vmatpush3.bf16.msra.mxu1 %v5911_v16  ;;  %v4822_v16 = vunpack.c.l.bf16 %v4923_v11  ;;  %v6196_v53 = vpack.i.bf16 %v4883_v51, %v4882_v50  ;;  %v4846_v9 = vunpack.c.l.bf16 %v4929_v4  ;;  %v6282_v51 = vld [vmem:[%s6062_s16 + $0xf8] sm:$0xff]  }
  0x20   : > { %5390 = vperm.xlu0 %5388, %v5377_v15   ;;  %5341 = vmatprep.subr.bf16.mxu1 %v5912_v19  ;;  %9492 = vst [vmem:[#allocation5_spill] sm:$0xff] %v6282_v51 }
  0x21   : > { %5087 = vmatpush3.bf16.msra.mxu0 %v5912_v19 }
  0x22   : > { %5088 = vmatprep.subr.bf16.mxu0 %v5913_v26  ;;  %5400 = vset.pattern.permute.xlu1 %v9386_v21 }
  0x23   : > { %5402 = vperm.xlu1 %5400, %v5377_v15   ;;  %5349 = vmatpush3.bf16.msra.mxu1 %v5912_v19  ;;  %v5939_v15 = vld [vmem:[%s6067_s19 + $0xc0] sm:$0xff]   ;;  %v6155_v19 = vpack.i.bf16 %v4823_v17, %v4822_v16 }
  0x24   : > { %5443 = vperm.xlu0 %5388, %v6096_v34   ;;  %5342 = vmatprep.subr.bf16.mxu1 %v5913_v26 }
  0x25   : > { %5089 = vmatpush3.bf16.msra.mxu0 %v5913_v26 }
  0x26   : > { %5090 = vmatprep.subr.bf16.mxu0 %v5914_v37 }
  0x27   : > { %5406 = vset.pattern.permute.xlu1 %v9384_v3  ;;  %5350 = vmatpush3.bf16.msra.mxu1 %v5913_v26  ;;  %v5941_v26 = vld [vmem:[%s6067_s19 + $0xd0] sm:$0xff]  }
  0x28   : > { %5408 = vperm.xlu1 %5406, %v6106_v42   ;;  %5460 = vperm.xlu0 %5388, %v6110_v44  }
  0x29   : > { %5091 = vmatpush3.bf16.msra.mxu0 %v5914_v37  ;;  %5343 = vmatprep.subr.bf16.mxu1 %v5914_v37 }
  0x2b   : > { %5351 = vmatpush3.bf16.msra.mxu1 %v5914_v37  ;;  %v5927_v37 = vld [vmem:[%s6067_s19 + $0x60] sm:$0xff]  }
  0x2c   : > { %5093 = vmatmul.mubr.bf16.vlgmr.msra.gmra.mxu0 %v5916_v43  ;;  %5412 = vset.pattern.permute.xlu1 %v9386_v21  ;;  %v4924_v43 = vld [vmem:[%s6062_s16 + $0x48] sm:$0xff]  }
  0x2d   : > { %5096 = vmatprep.mubr.bf16.mxu0 %v5917_v47  ;;  %5414 = vperm.xlu1 %5412, %v6082_v20   ;;  %v4826_v47 = vunpack.c.l.bf16 %v4924_v43 }
  0x2e   : > { %5507 = vperm.xlu0 %5388, %v6101_v40   ;;  %5129 = vmatmul.mubr.bf16.vlgmr.msra.gmra.mxu1 %v5932_v48  ;;  %v4827_v48 = vunpack.c.h.bf16 %v4924_v43 }
  0x2f   : > { %5132 = vmatprep.mubr.bf16.mxu1 %v5935_v52  ;;  %v4937_v52 = vld [vmem:[%s6062_s16 + $0xb0] sm:$0xff]  }
  0x30   : > { %v5483_v54 = vpack.i.bf16 %v4827_v48, %v4826_v47  ;;  %v4879_v58 = vunpack.c.h.bf16 %v4937_v52 }
  0x31   : > { %5418 = vset.pattern.permute.xlu1 %v9384_v3 }
  0x32   : > { %5524 = vperm.xlu0 %5388, %v6104_v41   ;;  %5420 = vperm.xlu1 %5418, %v6124_v55  }
  0x34   : > { %5097 = vmatmul.mubr.bf16.gmra.mxu0 %v5918_v56  ;;  %v4878_v56 = vunpack.c.l.bf16 %v4937_v52 }
  0x35   : > { %5100 = vmatprep.mubr.bf16.mxu0 %v5919_v59  ;;  %v4925_v59 = vld [vmem:[%s6062_s16 + $0x50] sm:$0xff]  }
  0x36   : > { %5528 = vset.pattern.permute.xlu0 %v9382_v2  ;;  %5424 = vset.pattern.permute.xlu1 %v9382_v2  ;;  %v6205_v61 = vpack.i.bf16 %v4879_v58, %v4878_v56  ;;  %v4830_v63 = vunpack.c.l.bf16 %v4925_v59  ;;  %v9381_v56 = vunpack.c.h.bf16 %v6282_v51 }
  0x37   : > { %5530 = vperm.xlu0 %5528, %v6082_v20   ;;  %5426 = vperm.xlu1 %5424, %v6124_v55   ;;  %v4928_v20 = vld [vmem:[%s6062_s16 + $0x68] sm:$0xff]  }
  0x38   : > { %5133 = vmatmul.mubr.bf16.gmra.mxu1 %v5936_v0  ;;  %v4842_v24 = vunpack.c.l.bf16 %v4928_v20  ;;  %v4843_v25 = vunpack.c.h.bf16 %v4928_v20 }
  0x39   : > { %5136 = vmatprep.mubr.bf16.mxu1 %v5937_v5 }
  0x3a   : > { %v6166_v28 = vpack.i.bf16 %v4843_v25, %v4842_v24 }
  0x3b   : > { %5535 = vperm.xlu0 %5528, %v6106_v42   ;;  %5430 = vset.pattern.permute.xlu1 %v9384_v3 }
  0x3c   : > { %5101 = vmatmul.mubr.bf16.gmra.mxu0 %v5920_v7  ;;  %5432 = vperm.xlu1 %5430, %v5431_v13  }
  0x3d   : > { %5104 = vmatprep.mubr.bf16.mxu0 %v5921_v10  ;;  %v4847_v10 = vunpack.c.h.bf16 %v4929_v4 }
  0x3f   : > { %5540 = vperm.xlu0 %5528, %v6110_v44   ;;  %v5667_v11 = vpack.i.bf16 %v4847_v10, %v4846_v9  ;;  %v857_v9 = vlaneseq }
  0x40   : > { %5137 = vmatmul.mubr.bf16.gmra.mxu1 %v5938_v14  ;;  %5436 = vset.pattern.permute.xlu1 %v9382_v2  ;;  %v4941_v14 = vld [vmem:[%s6062_s16 + $0xd0] sm:$0xff]  }
  0x41   : > { %5140 = vmatprep.mubr.bf16.mxu1 %v5939_v15  ;;  %5438 = vperm.xlu1 %5436, %v5431_v13   ;;  %v4894_v17 = vunpack.c.l.bf16 %v4941_v14 }
  0x43   : > { %5545 = vperm.xlu0 %5528, %v6155_v19  }
  0x44   : > { %5105 = vmatmul.mubr.bf16.gmra.mxu0 %v5922_v18  ;;  %v4895_v18 = vunpack.c.h.bf16 %v4941_v14 }
  0x45   : > { %5108 = vmatprep.mubr.bf16.mxu0 %v5923_v22  ;;  %5447 = vset.pattern.permute.xlu1 %v9386_v21  ;;  %v4943_v22 = vld [vmem:[%s6062_s16 + $0xe0] sm:$0xff]  }
  0x46   : > { %5449 = vperm.xlu1 %5447, %v5431_v13   ;;  %v4931_v13 = vld [vmem:[%s6062_s16 + $0x80] sm:$0xff]   ;;  %v6227_v20 = vpack.i.bf16 %v4895_v18, %v4894_v17  ;;  %v4903_v24 = vunpack.c.h.bf16 %v4943_v22  ;;  %v4940_v17 = vld [vmem:[%s6062_s16 + $0xc8] sm:$0xff]  }
  0x47   : > { %5556 = vperm.xlu0 %5528, %v6104_v41   ;;  %v4854_v15 = vunpack.c.l.bf16 %v4931_v13  ;;  %v4855_v16 = vunpack.c.h.bf16 %v4931_v13  ;;  %v455_v18 = vld [vmem:[%s9371_s2] sm:$0x7] }
  0x48   : > { %5141 = vmatmul.mubr.bf16.gmra.mxu1 %v5940_v23  ;;  %v4902_v23 = vunpack.c.l.bf16 %v4943_v22 }
  0x49   : > { %5144 = vmatprep.mubr.bf16.mxu1 %v5941_v26  ;;  %v4930_v26 = vld [vmem:[%s6062_s16 + $0x78] sm:$0xff]  }
  0x4a   : > { %5453 = vset.pattern.permute.xlu1 %v9382_v2  ;;  %v6237_v25 = vpack.i.bf16 %v4903_v24, %v4902_v23  ;;  %v4851_v31 = vunpack.c.h.bf16 %v4930_v26  ;;  %v4890_v23 = vunpack.c.l.bf16 %v4940_v17  ;;  %v4891_v24 = vunpack.c.h.bf16 %v4940_v17 }
  0x4b   : > { %5573 = vperm.xlu0 %5528, %v6166_v28   ;;  %5455 = vperm.xlu1 %5453, %v6096_v34  }
  0x4c   : > { %5109 = vmatmul.mubr.bf16.gmra.mxu0 %v5924_v27  ;;  %9489 = vst [vmem:[#allocation2_spill] sm:$0xff] %v6237_v25 }
  0x4d   : > { %5112 = vmatprep.mubr.bf16.mxu0 %v5925_v29 }
  0x4f   : > { %5620 = vperm.xlu0 %5528, %v6138_v6   ;;  %5464 = vset.pattern.permute.xlu1 %v9386_v21 }
  0x50   : > { %5145 = vmatmul.mubr.bf16.gmra.mxu1 %v5942_v30  ;;  %5466 = vperm.xlu1 %5464, %v6096_v34   ;;  %v5928_v34 = vld [vmem:[%s6067_s19 + $0x68] sm:$0xff]   ;;  %v4850_v30 = vunpack.c.l.bf16 %v4930_v26 }
  0x51   : > { %5148 = vmatprep.mubr.bf16.mxu1 %v5943_v32  ;;  %v4944_v32 = vld [vmem:[%s6062_s16 + $0xe8] sm:$0xff]  }
  0x52   : > { %v4906_v33 = vunpack.c.l.bf16 %v4944_v32  ;;  %v4907_v35 = vunpack.c.h.bf16 %v4944_v32 }
  0x53   : > { %5637 = vperm.xlu0 %5528, %v6127_v57  }
  0x54   : > { %5113 = vmatmul.mubr.bf16.gmra.mxu0 %v5926_v36  ;;  %5470 = vset.pattern.permute.xlu1 %v9384_v3  ;;  %v5590_v36 = vpack.i.bf16 %v4851_v31, %v4850_v30 }
  0x55   : > { %5116 = vmatprep.mubr.bf16.mxu0 %v5927_v37  ;;  %5472 = vperm.xlu1 %5470, %v6155_v19   ;;  %v6250_v37 = vpack.i.bf16 %v4907_v35, %v4906_v33  ;;  %v4945_v35 = vld [vmem:[%s6062_s16 + $0xf0] sm:$0xff]  }
  0x57   : > { %5641 = vset.pattern.permute.xlu0 %v9386_v21  ;;  %9491 = vst [vmem:[#allocation4_spill] sm:$0xff] %v6250_v37 }
  0x58   : > { %5643 = vperm.xlu0 %5641, %v6106_v42   ;;  %5149 = vmatmul.mubr.bf16.gmra.mxu1 %v5944_v39  ;;  %v5946_v42 = vld [vmem:[%s6067_s19 + $0xf8] sm:$0xff]  }
  0x59   : > { %5152 = vmatprep.mubr.bf16.mxu1 %v5945_v45  ;;  %5476 = vset.pattern.permute.xlu1 %v9386_v21 }
  0x5a   : > { %5478 = vperm.xlu1 %5476, %v6110_v44   ;;  %v4939_v44 = vld [vmem:[%s6062_s16 + $0xc0] sm:$0xff]  }
  0x5b   : > { %v4886_v0 = vunpack.c.l.bf16 %v4939_v44  ;;  %v4887_v1 = vunpack.c.h.bf16 %v4939_v44 }
  0x5c   : > { %5117 = vmatmul.mubr.bf16.gmra.mxu0 %v5928_v34  ;;  %5648 = vperm.xlu0 %5641, %v6124_v55   ;;  %v4831_v55 = vunpack.c.h.bf16 %v4925_v59 }
  0x5d   : > { %5120 = vmatprep.mubr.bf16.mxu0 %v5929_v49  ;;  %v6210_v5 = vpack.i.bf16 %v4887_v1, %v4886_v0 }
  0x5e   : > { %5482 = vset.pattern.permute.xlu1 %v9384_v3  ;;  %v5495_v7 = vpack.i.bf16 %v4831_v55, %v4830_v63 }
  0x5f   : > { %5484 = vperm.xlu1 %5482, %v5483_v54  }
  0x60   : > { %5653 = vperm.xlu0 %5641, %v6155_v19   ;;  %5153 = vmatmul.mubr.bf16.gmra.mxu1 %v5946_v42  ;;  %v5765_v19 = vpack.i.bf16 %v4855_v16, %v4854_v15  ;;  %v4914_v42 = vunpack.c.l.bf16 %v6282_v51 }
  0x62   : > { %v6297_v58 = vpack.i.bf16 %v9381_v56, %v4914_v42 }
  0x63   : > { %5488 = vset.pattern.permute.xlu1 %v9382_v2 }
  0x64   : > { %5121 = vmatmul.mubr.bf16.gmra.mxu0 %v5930_v60  ;;  %5490 = vperm.xlu1 %5488, %v5483_v54   ;;  %9493 = vst [vmem:[#allocation6_spill] sm:$0xff] %v6297_v58 }
  0x65   : > { %5124 = vmatprep.mubr.bf16.mxu0 %v5933_v62  ;;  %5658 = vperm.xlu0 %5641, %v5483_v54  }
  0x68   : > { %5494 = vset.pattern.permute.xlu1 %v9384_v3 }
  0x69   : > { %5496 = vperm.xlu1 %5494, %v5495_v7   ;;  %5663 = vperm.xlu0 %5641, %v6166_v28  }
  0x6c   : > { %5125 = vmatmul.mubr.bf16.gmra.mxu0 %v5934_v8 }
  0x6d   : > { %5500 = vset.pattern.permute.xlu1 %v9382_v2  ;;  %5668 = vperm.xlu0 %5641, %v5667_v11  }
  0x6e   : > { %5502 = vperm.xlu1 %5500, %v5495_v7  }
  0x71   : > { %5679 = vperm.xlu0 %5641, %v6127_v57  }
  0x72   : > { %5511 = vset.pattern.permute.xlu1 %v9386_v21 }
  0x73   : > { %5513 = vperm.xlu1 %5511, %v5495_v7  }
  0x75   : > { %5696 = vperm.xlu0 %5641, %v6147_v12  }
  0x77   : > { %5517 = vset.pattern.permute.xlu1 %v9382_v2 }
  0x78   : > { %5519 = vperm.xlu1 %5517, %v6101_v40  }
  0x79   : > { %5743 = vperm.xlu0 %5641, %v6196_v53  }
  0x7c   : > { %5549 = vset.pattern.permute.xlu1 %v9386_v21 }
  0x7d   : > { %5551 = vperm.xlu1 %5549, %v6101_v40   ;;  %5760 = vperm.xlu0 %5641, %v6210_v5   ;;  %v4942_v40 = vld [vmem:[%s6062_s16 + $0xd8] sm:$0xff]  }
  0x7e   : > { %v4898_v27 = vunpack.c.l.bf16 %v4942_v40 }
  0x81   : > { %5560 = vset.pattern.permute.xlu1 %v9384_v3  ;;  %5764 = vset.pattern.permute.xlu0 %v9384_v3 }
  0x82   : > { %5562 = vperm.xlu1 %5560, %v6166_v28   ;;  %5766 = vperm.xlu0 %5764, %v5765_v19   ;;  %v4899_v28 = vunpack.c.h.bf16 %v4942_v40 }
  0x84   : > { %v6242_v29 = vpack.i.bf16 %v4899_v28, %v4898_v27 }
  0x86   : > { %5566 = vset.pattern.permute.xlu1 %v9386_v21  ;;  %5771 = vperm.xlu0 %5764, %v6138_v6   ;;  %9490 = vst [vmem:[#allocation3_spill] sm:$0xff] %v6242_v29 }
  0x87   : > { %5568 = vperm.xlu1 %5566, %v6104_v41  }
  0x8a   : > { %5776 = vperm.xlu0 %5764, %v6180_v38  }
  0x8b   : > { %5577 = vset.pattern.permute.xlu1 %v9384_v3 }
  0x8c   : > { %5579 = vperm.xlu1 %5577, %v5667_v11  }
  0x8e   : > { %5781 = vperm.xlu0 %5764, %v6205_v61  }
  0x90   : > { %5583 = vset.pattern.permute.xlu1 %v9382_v2  ;;  %v6247_v41 = vpop.permute.xlu1 %5373 }
  0x91   : > { %5585 = vperm.xlu1 %5583, %v5667_v11   ;;  %v6254_v43 = vpop.permute.xlu0 %5367  ;;  %v6334_v11 = vshrl.u32 %v857_v9, 7  ;;  %v5375_v40 = vunpack.i.l.bf16 %v6247_v41  ;;  %v5376_v30 = vunpack.i.h.bf16 %v6247_v41  ;;  %v4911_v9 = vunpack.c.h.bf16 %v4945_v35 }
  0x92   : > { %5792 = vperm.xlu0 %5764, %v6227_v20   ;;  %v5370_v32 = vunpack.i.h.bf16 %v6254_v43  ;;  %v5369_v33 = vunpack.i.l.bf16 %v6254_v43 }
  0x93   : > { %9495 = vst [vmem:[#allocation8_spill] sm:$0xff] %v6334_v11  ;;  %v9378_v15 = vsub.s32 2, %v6334_v11  ;;  %v9379_v16 = vsub.s32 1, %v6334_v11 }
  0x94   : > { %v6252_v39 = vpop.permute.xlu1 %5378 }
  0x95   : > { %5589 = vset.pattern.permute.xlu1 %v9384_v3  ;;  %v6354_v26 = vrot.slane %v455_v18, %v9378_v15  ;;  %v6358_v27 = vrot.slane %v455_v18, %v9379_v16  ;;  %v5380_v31 = vunpack.i.l.bf16 %v6252_v39 }
  0x96   : > { %5591 = vperm.xlu1 %5589, %v5590_v36   ;;  %5809 = vperm.xlu0 %5764, %v6242_v29   ;;  %v6261_v46 = vpop.permute.xlu0 %5384 }
  0x99   : > { %v6258_v45 = vpop.permute.xlu1 %5396 }
  0x9a   : > { %5595 = vset.pattern.permute.xlu1 %v9382_v2  ;;  %5813 = vset.pattern.permute.xlu0 %v9382_v2  ;;  %v5399_v41 = vunpack.i.h.bf16 %v6258_v45 }
  0x9b   : > { %5597 = vperm.xlu1 %5595, %v5590_v36   ;;  %5815 = vperm.xlu0 %5813, %v6205_v61   ;;  %v6269_v47 = vpop.permute.xlu0 %5390 }
  0x9e   : > { %v6265_v34 = vpop.permute.xlu1 %5402 }
  0x9f   : > { %5601 = vset.pattern.permute.xlu1 %v9386_v21  ;;  %5820 = vperm.xlu0 %5813, %v6196_v53   ;;  %v6275_v49 = vpop.permute.xlu0 %5443 }
  0xa0   : > { %5603 = vperm.xlu1 %5601, %v5590_v36   ;;  %v5381_v36 = vunpack.i.h.bf16 %v6252_v39  ;;  %v4910_v39 = vunpack.c.l.bf16 %v4945_v35  ;;  %v5446_v15 = vunpack.i.h.bf16 %v6275_v49 }
  0xa2   : > { %v6422_v16 = vpack.i.bf16 %v4911_v9, %v4910_v39 }
  0xa3   : > { %v6271_v48 = vpop.permute.xlu1 %5408  ;;  %5831 = vperm.xlu0 %5813, %v6242_v29   ;;  %v6285_v52 = vpop.permute.xlu0 %5460 }
  0xa4   : > { %5607 = vset.pattern.permute.xlu1 %v9382_v2  ;;  %9498 = vst [vmem:[#allocation11_spill] sm:$0xff] %v6422_v16 }
  0xa5   : > { %5609 = vperm.xlu1 %5607, %v5765_v19  }
  0xa7   : > { %5848 = vperm.xlu0 %5813, %v6237_v25  }
  0xa8   : > { %v6278_v50 = vpop.permute.xlu1 %5414 }
  0xa9   : > { %5613 = vset.pattern.permute.xlu1 %v9386_v21  ;;  %v6301_v60 = vpop.permute.xlu0 %5507 }
  0xaa   : > { %5615 = vperm.xlu1 %5613, %v5765_v19   ;;  %v9380_v19 = vsub.s32 0, %v6334_v11 }
  0xab   : > { %5858 = vset.pattern.permute.xlu0 %v9386_v21 }
  0xac   : > { %5860 = vperm.xlu0 %5858, %v6237_v25  }
  0xad   : > { %v6288_v54 = vpop.permute.xlu1 %5420  ;;  %v6311_v62 = vpop.permute.xlu0 %5524 }
  0xae   : > { %5624 = vset.pattern.permute.xlu1 %v9384_v3  ;;  %9494 = vst [vmem:[#allocation7_spill] sm:$0xff] %v6311_v62  ;;  %v5422_v11 = vunpack.i.l.bf16 %v6288_v54 }
  0xaf   : > { %5626 = vperm.xlu1 %5624, %v6127_v57   ;;  %v4935_v57 = vld [vmem:[%s6062_s16 + $0xa0] sm:$0xff]  }
  0xb0   : > { %5877 = vperm.xlu0 %5858, %v6250_v37   ;;  %v4870_v63 = vunpack.c.l.bf16 %v4935_v57  ;;  %v4871_v55 = vunpack.c.h.bf16 %v4935_v57  ;;  %v5386_v57 = vunpack.i.l.bf16 %v6261_v46 }
  0xb2   : > { %v6299_v59 = vpop.permute.xlu1 %5426  ;;  %v5690_v1 = vpack.i.bf16 %v4871_v55, %v4870_v63  ;;  %v6374_v63 = vrot.slane %v455_v18, %v9380_v19  ;;  %v5398_v55 = vunpack.i.l.bf16 %v6258_v45  ;;  %v6396_v45 = vmul.f32 %v5376_v30, %v6358_v27 }
  0xb3   : > { %5630 = vset.pattern.permute.xlu1 %v9386_v21  ;;  %v5392_v30 = vunpack.i.l.bf16 %v6269_v47  ;;  %v5410_v19 = vunpack.i.l.bf16 %v6271_v48  ;;  %v5428_v51 = vunpack.i.l.bf16 %v6299_v59 }
  0xb4   : > { %5632 = vperm.xlu1 %5630, %v6138_v6   ;;  %5887 = vset.pattern.permute.xlu0 %v9384_v3  ;;  %v6319_v6 = vpop.permute.xlu0 %5530  ;;  %v6390_v17 = vmul.f32 %v5369_v33, %v6374_v63  ;;  %v6393_v18 = vmul.f32 %v5370_v32, %v6374_v63  ;;  %v6409_v33 = vmul.f32 %v5381_v36, %v6358_v27  ;;  %v5405_v32 = vunpack.i.h.bf16 %v6265_v34 }
  0xb5   : > { %5889 = vperm.xlu0 %5887, %v6297_v58   ;;  %v6414_v35 = vmul.f32 %v5398_v55, %v6374_v63  ;;  %v5411_v36 = vunpack.i.h.bf16 %v6271_v48  ;;  %v5462_v55 = vunpack.i.l.bf16 %v6285_v52  ;;  %v5526_v48 = vunpack.i.l.bf16 %v6311_v62 }
  0xb6   : > { %v6436_v39 = vmul.f32 %v5405_v32, %v6354_v26  ;;  %v6453_v32 = vmul.f32 %v5446_v15, %v6374_v63 }
  0xb7   : > { %v6307_v44 = vpop.permute.xlu1 %5432 }
  0xb8   : > { %5672 = vset.pattern.permute.xlu1 %v9384_v3  ;;  %v6324_v7 = vpop.permute.xlu0 %5535  ;;  %9500 = vst [vmem:[#allocation13_spill] sm:$0xff] %v6453_v32  ;;  %v5435_v58 = vunpack.i.h.bf16 %v6307_v44 }
  0xb9   : > { %5674 = vperm.xlu1 %5672, %v6147_v12   ;;  %5905 = vset.pattern.permute.xlu0 %v9386_v21 }
  0xba   : > { %2091 = vperm.xlu0 %5905, %v4914_v42   ;;  %v5387_v42 = vunpack.i.h.bf16 %v6261_v46  ;;  %v6387_v46 = vmul.f32 %v5380_v31, %v6358_v27  ;;  %v6537_v29 = vmul.f32 %v5435_v58, %v6374_v63 }
  0xbc   : > { %v6315_v0 = vpop.permute.xlu1 %5438  ;;  %v6329_v10 = vpop.permute.xlu0 %5540 }
  0xbd   : > { %5683 = vset.pattern.permute.xlu1 %v9382_v2  ;;  %v5440_v62 = vunpack.i.l.bf16 %v6315_v0 }
  0xbe   : > { %5685 = vperm.xlu1 %5683, %v6147_v12  }
  0xc0   : > { %v6338_v14 = vpop.permute.xlu0 %5545 }
  0xc1   : > { %v6321_v4 = vpop.permute.xlu1 %5449 }
  0xc2   : > { %5689 = vset.pattern.permute.xlu1 %v9384_v3 }
  0xc3   : > { %5691 = vperm.xlu1 %5689, %v5690_v1  }
  0xc4   : > { %v6361_v28 = vpop.permute.xlu0 %5556 }
  0xc5   : > { %9496 = vst [vmem:[#allocation9_spill] sm:$0xff] %v6361_v28 }
  0xc6   : > { %v6326_v8 = vpop.permute.xlu1 %5455 }
  0xc7   : > { %5700 = vset.pattern.permute.xlu1 %v9382_v2  ;;  %v5457_v32 = vunpack.i.l.bf16 %v6326_v8 }
  0xc8   : > { %5702 = vperm.xlu1 %5700, %v5690_v1   ;;  %v6406_v31 = vpop.permute.xlu0 %5573 }
  0xc9   : > { %9497 = vst [vmem:[#allocation10_spill] sm:$0xff] %v6406_v31  ;;  %v5537_v31 = vunpack.i.l.bf16 %v6324_v7 }
  0xcb   : > { %v6331_v12 = vpop.permute.xlu1 %5466 }
  0xcc   : > { %5706 = vset.pattern.permute.xlu1 %v9386_v21  ;;  %v5469_v25 = vunpack.i.h.bf16 %v6331_v12 }
  0xcd   : > { %5708 = vperm.xlu1 %5706, %v5690_v1   ;;  %v6378_v1 = vpack.i.bf16 %v4891_v24, %v4890_v23  ;;  %v6399_v23 = vmul.f32 %v5387_v42, %v6354_v26  ;;  %v6402_v24 = vmul.f32 %v5386_v57, %v6354_v26  ;;  %v6417_v42 = vmul.f32 %v5399_v41, %v6374_v63 }
  0xce   : > { %v5404_v57 = vunpack.i.l.bf16 %v6265_v34  ;;  %v5417_v41 = vunpack.i.h.bf16 %v6278_v50  ;;  %v5416_v34 = vunpack.i.l.bf16 %v6278_v50 }
  0xd0   : > { %v6336_v13 = vpop.permute.xlu1 %5472  ;;  %v6445_v50 = vmul.f32 %v5404_v57, %v6354_v26  ;;  %v6468_v57 = vmul.f32 %v5417_v41, %v6354_v26  ;;  %v6486_v41 = vmul.f32 %v5526_v48, %v6374_v63  ;;  %v5441_v48 = vunpack.i.h.bf16 %v6315_v0 }
  0xd1   : > { %5712 = vset.pattern.permute.xlu1 %v9382_v2  ;;  %v5510_v2 = vunpack.i.h.bf16 %v6301_v60 }
  0xd2   : > { %5714 = vperm.xlu1 %5712, %v6180_v38   ;;  %9504 = vst [vmem:[#allocation16_spill] sm:$0xff] %v6486_v41  ;;  %v5542_v41 = vunpack.i.l.bf16 %v6329_v10 }
  0xd5   : > { %v6349_v22 = vpop.permute.xlu1 %5478 }
  0xd6   : > { %5718 = vset.pattern.permute.xlu1 %v9386_v21 }
  0xd7   : > { %5720 = vperm.xlu1 %5718, %v6180_v38   ;;  %v6383_v38 = vmul.f32 %v5375_v40, %v6358_v27  ;;  %v5393_v40 = vunpack.i.h.bf16 %v6269_v47  ;;  %v5463_v47 = vunpack.i.h.bf16 %v6285_v52  ;;  %v863_v52 = vmul.f32 %v5392_v30, %v6374_v63 }
  0xd9   : > { %v6442_v9 = vmul.f32 %v5393_v40, %v6374_v63  ;;  %v6462_v40 = vmul.f32 %v5462_v55, %v6374_v63  ;;  %v6465_v30 = vmul.f32 %v5463_v47, %v6374_v63  ;;  %v5423_v55 = vunpack.i.h.bf16 %v6288_v54 }
  0xda   : > { %v6380_v43 = vpop.permute.xlu1 %5484  ;;  %v5434_v54 = vunpack.i.l.bf16 %v6307_v44  ;;  %v5538_v47 = vunpack.i.h.bf16 %v6324_v7  ;;  %v6508_v44 = vmul.f32 %v5422_v11, %v6374_v63 }
  0xdb   : > { %5724 = vset.pattern.permute.xlu1 %v9384_v3  ;;  %v6447_v3 = vpop.permute.xlu0 %5620  ;;  %v6511_v7 = vmul.f32 %v5423_v55, %v6374_v63  ;;  %v6530_v55 = vmul.f32 %v5537_v31, %v6358_v27  ;;  %v6549_v31 = vmul.f32 %v5542_v41, %v6358_v27 }
  0xdc   : > { %5726 = vperm.xlu1 %5724, %v6196_v53   ;;  %v5445_v53 = vunpack.i.l.bf16 %v6275_v49  ;;  %v5509_v49 = vunpack.i.l.bf16 %v6301_v60  ;;  %9499 = vst [vmem:[#allocation12_spill] sm:$0xff] %v6447_v3  ;;  %v9503_v3 = vmov 0   ;;  %v6527_v11 = vmul.f32 %v5538_v47, %v6358_v27 }
  0xdd   : > { %9509 = vst [vmem:[#allocation20_spill] sm:$0xff] %v6549_v31 }
  0xde   : > { %v6450_v60 = vmul.f32 %v5445_v53, %v6374_v63  ;;  %v6471_v53 = vmul.f32 %v5416_v34, %v6354_v26  ;;  %v5429_v34 = vunpack.i.h.bf16 %v6299_v59  ;;  %v5543_v59 = vunpack.i.h.bf16 %v6329_v10 }
  0xdf   : > { %v6428_v56 = vpop.permute.xlu1 %5490  ;;  %v6501_v16 = vpop.permute.xlu0 %5637  ;;  %v9507_v10 = vmov 1  }
  0xe0   : > { %5730 = vset.pattern.permute.xlu1 %v9386_v21  ;;  %v6456_v21 = vmul.f32 %v5410_v19, %v6374_v63  ;;  %v6476_v19 = vmul.f32 %v5509_v49, %v6374_v63  ;;  %v5533_v49 = vunpack.i.h.bf16 %v6319_v6  ;;  %9505 = vst [vmem:[#allocation17_spill] sm:$0xff] %v6501_v16  ;;  %v6521_v16 = vmul.f32 %v5428_v51, %v6358_v27 }
  0xe1   : > { %5732 = vperm.xlu1 %5730, %v6205_v61   ;;  %v6459_v61 = vmul.f32 %v5411_v36, %v6374_v63  ;;  %v6479_v36 = vmul.f32 %v5510_v2, %v6374_v63  ;;  %v5532_v2 = vunpack.i.l.bf16 %v6319_v6  ;;  %v5548_v6 = vunpack.i.h.bf16 %v6338_v14 }
  0xe2   : > { %9501 = vst [vmem:[#allocation14_spill] sm:$0xff] %v6476_v19  ;;  %v6514_v0 = vmul.f32 %v5533_v49, %v6358_v27  ;;  %v6540_v51 = vmul.f32 %v5441_v48, %v6358_v27  ;;  %v6546_v47 = vmul.f32 %v5543_v59, %v6358_v27 }
  0xe3   : > { %9502 = vst [vmem:[#allocation15_spill] sm:$0xff] %v6479_v36  ;;  %v5547_v36 = vunpack.i.l.bf16 %v6338_v14  ;;  %v6517_v37 = vmul.f32 %v5532_v2, %v6358_v27  ;;  %v6524_v14 = vmul.f32 %v5429_v34, %v6358_v27  ;;  %v6534_v2 = vmul.f32 %v5434_v54, %v6374_v63  ;;  %v5644_v31 = vpop.permute.xlu0 %5643 }
  0xe4   : > { %v6473_v15 = vpop.permute.xlu1 %5496  ;;  %v6543_v34 = vmul.f32 %v5440_v62, %v6358_v27  ;;  %9508 = vst [vmem:[#allocation19_spill] sm:$0xff] %v6546_v47  ;;  %v5451_v54 = vunpack.i.l.bf16 %v6321_v4  ;;  %v5458_v62 = vunpack.i.h.bf16 %v6326_v8  ;;  %v5474_v8 = vunpack.i.l.bf16 %v6336_v13 }
  0xe5   : > { %5736 = vset.pattern.permute.xlu1 %v9503_v3  ;;  %v6557_v58 = vmul.f32 %v5547_v36, %v6358_v27  ;;  %v5645_v36 = vunpack.i.l.bf16 %v5644_v31 }
  0xe6   : > { %5738 = vperm.xlu1 %5736, %v6210_v5   ;;  %v6581_v28 = vmul.f32 %v5458_v62, %v6358_v27 }
  0xe7   : > { %9511 = vst [vmem:[#allocation22_spill] sm:$0xff] %v6557_v58  ;;  %v5475_v58 = vunpack.i.h.bf16 %v6336_v13  ;;  %v6584_v13 = vmul.f32 %v5457_v32, %v6358_v27 }
  0xe9   : > { %v6505_v19 = vpop.permute.xlu1 %5502 }
  0xea   : > { %9506 = vst [vmem:[#allocation18_spill] sm:$0xff] %v6505_v19  ;;  %5747 = vset.pattern.permute.xlu1 %v9507_v10  ;;  %v6554_v19 = vmul.f32 %v5548_v6, %v6358_v27  ;;  %v5646_v6 = vunpack.i.h.bf16 %v5644_v31 }
  0xeb   : > { %5749 = vperm.xlu1 %5747, %v6210_v5   ;;  %v5452_v5 = vunpack.i.h.bf16 %v6321_v4  ;;  %v5468_v4 = vunpack.i.l.bf16 %v6331_v12  ;;  %v6578_v12 = vmul.f32 %v5451_v54, %v6354_v26 }
  0xec   : > { %v5094_v49 = vpop.f32.mrf.mxu0  ;;  %9510 = vst [vmem:[#allocation21_spill] sm:$0xff] %v6554_v19 }
  0xed   : > { %v1208_v59 = vadd.f32 %v5094_v49, %v863_v52  ;;  %v6575_v49 = vmul.f32 %v5452_v5, %v6354_v26  ;;  %v5481_v5 = vunpack.i.h.bf16 %v6349_v22  ;;  %v6599_v32 = vmul.f32 %v5468_v4, %v6354_v26 }
  0xee   : > { %v1199_v48 = vpop.f32.mrf.mxu0  ;;  %v6561_v47 = vpop.permute.xlu1 %5513 }
  0xef   : > { %9512 = vst [vmem:[#allocation23_spill] sm:$0xff] %v6561_v47  ;;  %v1200_v41 = vadd.f32 %v1199_v48, %v6390_v17  ;;  %5753 = vset.pattern.permute.xlu1 %v9503_v3 }
  0xf0   : > { %v5095_v19 = vpop.f32.mrf.mxu0  ;;  %5755 = vperm.xlu1 %5753, %v6378_v1  }
  0xf1   : > { %v1778_v52 = vadd.f32 %v6383_v38, %v1200_v41  ;;  %v1211_v17 = vadd.f32 %v5095_v19, %v6442_v9  ;;  %v1780_v38 = vadd.f32 %v6387_v46, %v1208_v59  ;;  %v5649_v9 = vpop.permute.xlu0 %5648  ;;  %v6589_v19 = vmul.f32 %v5469_v25, %v6354_v26 }
  0xf2   : > { %v1202_v48 = vpop.f32.mrf.mxu0  ;;  %v6604_v25 = vmul.f32 %v5474_v8, %v6374_v63  ;;  %v2108_v59 = vmul.f32 %v5645_v36, %v6354_v26 }
  0xf3   : > { %v1203_v41 = vadd.f32 %v1202_v48, %v6393_v18  ;;  %v6593_v54 = vadd.f32 %v6402_v24, %v1778_v52  ;;  %v1781_v31 = vadd.f32 %v6409_v33, %v1211_v17  ;;  %v6596_v62 = vpop.permute.xlu1 %5519  ;;  %v6607_v18 = vmul.f32 %v5475_v58, %v6374_v63 }
  0xf4   : > { %v5098_v47 = vpop.f32.mrf.mxu0  ;;  %5785 = vset.pattern.permute.xlu1 %v9507_v10  ;;  %v5480_v24 = vunpack.i.l.bf16 %v6349_v22  ;;  %v2109_v33 = vmul.f32 %v5646_v6, %v6354_v26  ;;  %v5651_v52 = vunpack.i.h.bf16 %v5649_v9  ;;  %v5650_v58 = vunpack.i.l.bf16 %v5649_v9 }
  0xf5   : > { %9513 = vst [vmem:[#allocation24_spill] sm:$0xff] %v6593_v54  ;;  %v1779_v46 = vadd.f32 %v6396_v45, %v1203_v41  ;;  %9514 = vst [vmem:[#allocation25_spill] sm:$0xff] %v6607_v18  ;;  %5787 = vperm.xlu1 %5785, %v6378_v1   ;;  %v6614_v45 = vadd.f32 %v6445_v50, %v1780_v38  ;;  %v6621_v48 = vmul.f32 %v5481_v5, %v6354_v26  ;;  %v5654_v5 = vpop.permute.xlu0 %5653 }
  0xf6   : > { %v1215_v4 = vpop.f32.mrf.mxu0  ;;  %v2299_v22 = vmul.f32 %v6593_v54, %v6593_v54  ;;  %v6626_v6 = vadd.f32 %v6436_v39, %v1781_v31  ;;  %v1224_v36 = vadd.f32 %v5098_v47, %v6456_v21  ;;  %v9517_v39 = vmov 2  }
  0xf7   : > { %v6617_v17 = vadd.f32 %v6399_v23, %v1779_v46  ;;  %v1216_v8 = vadd.f32 %v1215_v4, %v6414_v35  ;;  %v6638_v46 = vmul.f32 %v5480_v24, %v6354_v26  ;;  %v6642_v47 = vmul.f32 %v5651_v52, %v6354_v26 }
  0xf8   : > { %v5099_v41 = vpop.f32.mrf.mxu0  ;;  %v6634_v38 = vpop.permute.xlu1 %5551  ;;  %v5656_v31 = vunpack.i.h.bf16 %v5654_v5  ;;  %v5655_v4 = vunpack.i.l.bf16 %v5654_v5  ;;  %v5486_v24 = vunpack.i.l.bf16 %v6380_v43  ;;  %v2110_v5 = vmul.f32 %v5650_v58, %v6354_v26 }
  0xf9   : > { %9515 = vst [vmem:[#allocation26_spill] sm:$0xff] %v6617_v17  ;;  %v2230_v50 = vadd.f32 %v6617_v17, %v6593_v54  ;;  %v2300_v23 = vmul.f32 %v6617_v17, %v6617_v17  ;;  %v1782_v35 = vadd.f32 %v6517_v37, %v1216_v8  ;;  %9516 = vst [vmem:[#allocation27_spill] sm:$0xff] %v6634_v38  ;;  %5796 = vset.pattern.permute.xlu1 %v9517_v39 }
  0xfa   : > { %v1227_v9 = vadd.f32 %v5099_v41, %v6459_v61  ;;  %v1218_v21 = vpop.f32.mrf.mxu0  ;;  %v2301_v17 = vmul.f32 %v6614_v45, %v6614_v45  ;;  %5798 = vperm.xlu1 %5796, %v6378_v1   ;;  %v1784_v41 = vadd.f32 %v6530_v55, %v1224_v36  ;;  %v2302_v38 = vmul.f32 %v6626_v6, %v6626_v6 }
  0xfb   : > { %v2231_v37 = vadd.f32 %v2230_v50, %v6614_v45  ;;  %v2363_v8 = vadd.f32 %v2300_v23, %v2299_v22  ;;  %v6648_v61 = vadd.f32 %v6471_v53, %v1782_v35  ;;  %v1219_v52 = vadd.f32 %v1218_v21, %v6417_v42 }
  0xfc   : > { %v5102_v54 = vpop.f32.mrf.mxu0  ;;  %v1785_v53 = vadd.f32 %v6527_v11, %v1227_v9  ;;  %v5487_v50 = vunpack.i.h.bf16 %v6380_v43  ;;  %v6665_v36 = vmul.f32 %v5656_v31, %v6354_v26  ;;  %v6672_v43 = vmul.f32 %v5655_v4, %v6354_v26 }
  0xfd   : > { %v2364_v18 = vadd.f32 %v2363_v8, %v2301_v17  ;;  %v2232_v22 = vadd.f32 %v2231_v37, %v6626_v6  ;;  %v1783_v1 = vadd.f32 %v6514_v0, %v1219_v52  ;;  %v1240_v23 = vadd.f32 %v5102_v54, %v6534_v2  ;;  %v6662_v55 = vpop.permute.xlu1 %5562 }
  0xfe   : > { %v1231_v42 = vpop.f32.mrf.mxu0  ;;  %v2303_v17 = vmul.f32 %v6648_v61, %v6648_v61  ;;  %5802 = vset.pattern.permute.xlu1 %v9507_v10  ;;  %v6674_v0 = vadd.f32 %v2108_v59, %v1784_v41  ;;  %v6682_v31 = vadd.f32 %v2109_v33, %v1785_v53  ;;  %v5493_v37 = vunpack.i.h.bf16 %v6428_v56  ;;  %v5659_v53 = vpop.permute.xlu0 %5658 }
  0xff   : > { %v2233_v58 = vadd.f32 %v2232_v22, %v6648_v61  ;;  %v2365_v35 = vadd.f32 %v2364_v18, %v2302_v38  ;;  %v6677_v11 = vadd.f32 %v6468_v57, %v1783_v1  ;;  %v1788_v2 = vadd.f32 %v6543_v34, %v1240_v23  ;;  %5804 = vperm.xlu1 %5802, %v6227_v20  }
 0x100   : > { %v1232_v54 = vadd.f32 %v1231_v42, %v6508_v44  ;;  %v5103_v9 = vpop.f32.mrf.mxu0  ;;  %v879_v38 = vmul.f32 %v5486_v24, %v6374_v63  ;;  %v6699_v24 = vmul.f32 %v5487_v50, %v6374_v63  ;;  %v2305_v41 = vmul.f32 %v6674_v0, %v6674_v0 }
 0x101   : > { %v2366_v21 = vadd.f32 %v2365_v35, %v2303_v17  ;;  %v1243_v18 = vadd.f32 %v5103_v9, %v6537_v29  ;;  %v2234_v59 = vadd.f32 %v2233_v58, %v6677_v11  ;;  %v2304_v57 = vmul.f32 %v6677_v11, %v6677_v11 }
 0x102   : > { %v6690_v4 = vadd.f32 %v6578_v12, %v1788_v2  ;;  %v1786_v44 = vadd.f32 %v6521_v16, %v1232_v54  ;;  %v1234_v34 = vpop.f32.mrf.mxu0  ;;  %v6695_v8 = vpop.permute.xlu1 %5568  ;;  %v5661_v50 = vunpack.i.h.bf16 %v5659_v53  ;;  %v2306_v23 = vmul.f32 %v6682_v31, %v6682_v31 }
 0x103   : > { %v1789_v33 = vadd.f32 %v6540_v51, %v1243_v18  ;;  %v1235_v29 = vadd.f32 %v1234_v34, %v6511_v7  ;;  %v2235_v12 = vadd.f32 %v2234_v59, %v6674_v0  ;;  %v2367_v52 = vadd.f32 %v2366_v21, %v2304_v57  ;;  %5824 = vset.pattern.permute.xlu1 %v9517_v39 }
 0x104   : > { %v6704_v22 = vadd.f32 %v2110_v5, %v1786_v44  ;;  %v5106_v16 = vpop.f32.mrf.mxu0  ;;  %v5492_v51 = vunpack.i.l.bf16 %v6428_v56  ;;  %5826 = vperm.xlu1 %5824, %v6227_v20   ;;  %v5660_v17 = vunpack.i.l.bf16 %v5659_v53  ;;  %v6717_v35 = vmul.f32 %v5493_v37, %v6358_v27 }
 0x105   : > { %v6709_v1 = vadd.f32 %v6575_v49, %v1789_v33  ;;  %v1787_v7 = vadd.f32 %v6524_v14, %v1235_v29  ;;  %v2368_v42 = vadd.f32 %v2367_v52, %v2305_v41  ;;  %v2236_v5 = vadd.f32 %v2235_v12, %v6682_v31  ;;  %v9518_v33 = vld [vmem:[#allocation2_spill] sm:$0xff]  ;;  %v9519_v41 = vld [vmem:[#allocation20_spill] sm:$0xff]  ;;  %v9520_v52 = vld [vmem:[#allocation13_spill] sm:$0xff] }
 0x106   : > { %v1247_v58 = vpop.f32.mrf.mxu0  ;;  %v5498_v56 = vunpack.i.l.bf16 %v6473_v15  ;;  %v1256_v14 = vadd.f32 %v5106_v16, %v6462_v40  ;;  %v2307_v2 = vmul.f32 %v6704_v22, %v6704_v22  ;;  %v1732_v59 = vmul.f32 %v5492_v51, %v6358_v27 }
 0x107   : > { %v6721_v49 = vadd.f32 %v6642_v47, %v1787_v7  ;;  %v2237_v20 = vadd.f32 %v2236_v5, %v6704_v22  ;;  %v2369_v54 = vadd.f32 %v2368_v42, %v2306_v23  ;;  %v1248_v9 = vadd.f32 %v1247_v58, %v6450_v60  ;;  %v6728_v21 = vpop.permute.xlu1 %5579  ;;  %v9521_v23 = vld [vmem:[#allocation18_spill] sm:$0xff] }
 0x108   : > { %v5107_v18 = vpop.f32.mrf.mxu0  ;;  %v5499_v57 = vunpack.i.h.bf16 %v6473_v15  ;;  %5835 = vset.pattern.permute.xlu1 %v9503_v3  ;;  %v6736_v40 = vmul.f32 %v5661_v50, %v6354_v26  ;;  %v1792_v15 = vadd.f32 %v9519_v41, %v1256_v14  ;;  %v2120_v12 = vmul.f32 %v5660_v17, %v6354_v26  ;;  %v9524_v41 = vld [vmem:[#allocation23_spill] sm:$0xff] }
 0x109   : > { %v2308_v47 = vmul.f32 %v6721_v49, %v6721_v49  ;;  %v2370_v44 = vadd.f32 %v2369_v54, %v2307_v2  ;;  %v2238_v34 = vadd.f32 %v2237_v20, %v6721_v49  ;;  %v1790_v60 = vadd.f32 %v6584_v13, %v1248_v9  ;;  %5837 = vperm.xlu1 %5835, %v9518_v33   ;;  %v9522_v54 = vld [vmem:[#allocation19_spill] sm:$0xff] }
 0x10a   : > { %v1259_v37 = vadd.f32 %v5107_v18, %v6465_v30  ;;  %v1250_v29 = vpop.f32.mrf.mxu0  ;;  %v6746_v53 = vmul.f32 %v5498_v56, %v6374_v63  ;;  %v2309_v51 = vmul.f32 %v6690_v4, %v6690_v4  ;;  %v5505_v42 = vunpack.i.h.bf16 %v9521_v23 }
 0x10b   : > { %v1251_v16 = vadd.f32 %v1250_v29, %v9520_v52  ;;  %v2239_v7 = vadd.f32 %v2238_v34, %v6690_v4  ;;  %v2371_v13 = vadd.f32 %v2370_v44, %v2308_v47  ;;  %v6752_v30 = vadd.f32 %v6599_v32, %v1790_v60  ;;  %v6773_v47 = vpop.permute.xlu0 %5663  ;;  %v9523_v44 = vld [vmem:[#allocation3_spill] sm:$0xff] }
 0x10c   : > { %v5110_v50 = vpop.f32.mrf.mxu0  ;;  %v6756_v58 = vpop.permute.xlu1 %5585  ;;  %v6759_v56 = vmul.f32 %v5499_v57, %v6374_v63  ;;  %v2310_v14 = vmul.f32 %v6709_v1, %v6709_v1  ;;  %v1793_v32 = vadd.f32 %v9522_v54, %v1259_v37  ;;  %v5504_v18 = vunpack.i.l.bf16 %v9521_v23  ;;  %v9526_v54 = vld [vmem:[#allocation25_spill] sm:$0xff] }
 0x10d   : > { %v1791_v5 = vadd.f32 %v6581_v28, %v1251_v16  ;;  %v1272_v17 = vadd.f32 %v5110_v50, %v879_v38  ;;  %v2372_v20 = vadd.f32 %v2371_v13, %v2309_v51  ;;  %v2240_v2 = vadd.f32 %v2239_v7, %v6709_v1  ;;  %5841 = vset.pattern.permute.xlu1 %v9517_v39  ;;  %v9525_v7 = vld [vmem:[#allocation22_spill] sm:$0xff]  ;;  %v9534_v23 = vld [vmem:[#allocation9_spill] sm:$0xff] }
 0x10e   : > { %v1263_v9 = vpop.f32.mrf.mxu0  ;;  %v6768_v28 = vadd.f32 %v6638_v46, %v1792_v15  ;;  %5843 = vperm.xlu1 %5841, %v9523_v44   ;;  %v2311_v60 = vmul.f32 %v6752_v30, %v6752_v30  ;;  %v5515_v46 = vunpack.i.l.bf16 %v9524_v41  ;;  %v5521_v15 = vunpack.i.l.bf16 %v6596_v62 }
 0x10f   : > { %v6771_v38 = vadd.f32 %v6589_v19, %v1791_v5  ;;  %v1796_v57 = vadd.f32 %v1732_v59, %v1272_v17  ;;  %v2241_v34 = vadd.f32 %v2240_v2, %v6752_v30  ;;  %v2373_v37 = vadd.f32 %v2372_v20, %v2310_v14 }
 0x110   : > { %v1264_v33 = vadd.f32 %v1263_v9, %v6604_v25  ;;  %v5111_v29 = vpop.f32.mrf.mxu0  ;;  %v6786_v16 = vadd.f32 %v6621_v48, %v1793_v32  ;;  %v1734_v5 = vmul.f32 %v5504_v18, %v6358_v27  ;;  %v5516_v17 = vunpack.i.h.bf16 %v9524_v41  ;;  %v9527_v9 = vld [vmem:[#allocation4_spill] sm:$0xff] }
 0x111   : > { %v2312_v19 = vmul.f32 %v6771_v38, %v6771_v38  ;;  %v1275_v59 = vadd.f32 %v5111_v29, %v6699_v24  ;;  %v2374_v52 = vadd.f32 %v2373_v37, %v2311_v60  ;;  %v2242_v51 = vadd.f32 %v2241_v34, %v6771_v38  ;;  %v6790_v50 = vpop.permute.xlu1 %5591  ;;  %v9528_v37 = vld [vmem:[#allocation14_spill] sm:$0xff] }
 0x112   : > { %v1794_v13 = vadd.f32 %v9525_v7, %v1264_v33  ;;  %v1266_v25 = vpop.f32.mrf.mxu0  ;;  %v2313_v14 = vmul.f32 %v6768_v28, %v6768_v28  ;;  %5852 = vset.pattern.permute.xlu1 %v9503_v3  ;;  %v2122_v44 = vmul.f32 %v5515_v46, %v6354_v26  ;;  %v5522_v34 = vunpack.i.h.bf16 %v6596_v62 }
 0x113   : > { %v1797_v24 = vadd.f32 %v6717_v35, %v1275_v59  ;;  %v2243_v48 = vadd.f32 %v2242_v51, %v6768_v28  ;;  %v2375_v20 = vadd.f32 %v2374_v52, %v2312_v19  ;;  %v1267_v32 = vadd.f32 %v1266_v25, %v9526_v54  ;;  %5854 = vperm.xlu1 %5852, %v9527_v9   ;;  %v6807_v35 = vpop.permute.xlu0 %5668  ;;  %v9529_v19 = vld [vmem:[#allocation21_spill] sm:$0xff]  ;;  %v9530_v51 = vld [vmem:[#allocation27_spill] sm:$0xff] }
 0x114   : > { %v6800_v2 = vadd.f32 %v6672_v43, %v1794_v13  ;;  %v5114_v18 = vpop.f32.mrf.mxu0  ;;  %v1736_v60 = vmul.f32 %v5521_v15, %v6358_v27  ;;  %v2314_v29 = vmul.f32 %v6786_v16, %v6786_v16  ;;  %v5554_v7 = vunpack.i.h.bf16 %v9530_v51 }
 0x115   : > { %v1288_v33 = vadd.f32 %v5114_v18, %v9528_v37  ;;  %v2376_v43 = vadd.f32 %v2375_v20, %v2313_v14  ;;  %v2244_v41 = vadd.f32 %v2243_v48, %v6786_v16  ;;  %v1795_v59 = vadd.f32 %v9529_v19, %v1267_v32 }
 0x116   : > { %v1279_v52 = vpop.f32.mrf.mxu0  ;;  %v6815_v46 = vadd.f32 %v2120_v12, %v1796_v57  ;;  %v6817_v13 = vpop.permute.xlu1 %5597  ;;  %v2315_v54 = vmul.f32 %v6800_v2, %v6800_v2  ;;  %v1737_v12 = vmul.f32 %v5522_v34, %v6358_v27  ;;  %v5553_v57 = vunpack.i.l.bf16 %v9530_v51 }
 0x117   : > { %v1800_v62 = vadd.f32 %v1736_v60, %v1288_v33  ;;  %v1280_v15 = vadd.f32 %v1279_v52, %v6746_v53  ;;  %v2245_v25 = vadd.f32 %v2244_v41, %v6800_v2  ;;  %v2377_v14 = vadd.f32 %v2376_v43, %v2314_v29  ;;  %5864 = vset.pattern.permute.xlu1 %v9507_v10  ;;  %v9531_v53 = vld [vmem:[#allocation15_spill] sm:$0xff]  ;;  %v6841_v43 = vpop.permute.xlu0 %5679 }
 0x118   : > { %v6824_v48 = vadd.f32 %v6665_v36, %v1795_v59  ;;  %v5115_v20 = vpop.f32.mrf.mxu0  ;;  %5866 = vperm.xlu1 %5864, %v9527_v9   ;;  %v6832_v37 = vadd.f32 %v6736_v40, %v1797_v24  ;;  %v1735_v34 = vmul.f32 %v5505_v42, %v6358_v27  ;;  %v2317_v40 = vmul.f32 %v6815_v46, %v6815_v46 }
 0x119   : > { %v1798_v32 = vadd.f32 %v1734_v5, %v1280_v15  ;;  %v1291_v18 = vadd.f32 %v5115_v20, %v9531_v53  ;;  %v2378_v60 = vadd.f32 %v2377_v14, %v2315_v54  ;;  %v2125_v5 = vmul.f32 %v5554_v7, %v6354_v26 }
 0x11a   : > { %9532 = vst [vmem:[#allocation2_spill] sm:$0xff] %v6832_v37  ;;  %v2246_v33 = vadd.f32 %v2245_v25, %v6824_v48  ;;  %v2316_v36 = vmul.f32 %v6824_v48, %v6824_v48  ;;  %v1282_v29 = vpop.f32.mrf.mxu0  ;;  %v9535_v42 = vunpack.i.l.bf16 %v9534_v23  ;;  %v2123_v15 = vmul.f32 %v5516_v17, %v6354_v26 }
 0x11b   : > { %v6843_v9 = vadd.f32 %v2122_v44, %v1798_v32  ;;  %v1801_v41 = vadd.f32 %v1737_v12, %v1291_v18  ;;  %v1283_v59 = vadd.f32 %v1282_v29, %v6759_v56  ;;  %v6849_v52 = vpop.permute.xlu1 %5603  ;;  %v2124_v44 = vmul.f32 %v5553_v57, %v6354_v26  ;;  %v9537_v12 = vld [vmem:[#allocation11_spill] sm:$0xff]  ;;  %v9538_v57 = vld [vmem:[#allocation16_spill] sm:$0xff] }
 0x11c   : > { %v2247_v24 = vadd.f32 %v2246_v33, %v6815_v46  ;;  %v2379_v19 = vadd.f32 %v2378_v60, %v2316_v36  ;;  %v5118_v51 = vpop.f32.mrf.mxu0  ;;  %v1738_v7 = vmul.f32 %v9535_v42, %v6358_v27  ;;  %5870 = vset.pattern.permute.xlu1 %v9503_v3  ;;  %v2318_v54 = vmul.f32 %v6832_v37, %v6832_v37 }
 0x11d   : > { %9533 = vst [vmem:[#allocation20_spill] sm:$0xff] %v6843_v9  ;;  %v6856_v25 = vadd.f32 %v2125_v5, %v1801_v41  ;;  %v1799_v20 = vadd.f32 %v1735_v34, %v1283_v59  ;;  %5872 = vperm.xlu1 %5870, %v9537_v12   ;;  %v5564_v53 = vunpack.i.l.bf16 %v6662_v55  ;;  %v5570_v17 = vunpack.i.l.bf16 %v6695_v8 }
 0x11e   : > { %v2380_v14 = vadd.f32 %v2379_v19, %v2317_v40  ;;  %v2248_v56 = vadd.f32 %v2247_v24, %v6832_v37  ;;  %v1295_v32 = vpop.f32.mrf.mxu0  ;;  %v6865_v18 = vadd.f32 %v2124_v44, %v1800_v62  ;;  %v2319_v33 = vmul.f32 %v6843_v9, %v6843_v9  ;;  %v9541_v62 = vld [vmem:[#allocation7_spill] sm:$0xff]  ;;  %v6882_v44 = vpop.permute.xlu0 %5696 }
 0x11f   : > { %9536 = vst [vmem:[#allocation13_spill] sm:$0xff] %v6856_v25  ;;  %v1296_v60 = vadd.f32 %v1295_v32, %v9538_v57  ;;  %v6871_v29 = vadd.f32 %v2123_v15, %v1799_v20  ;;  %v9540_v5 = vunpack.i.h.bf16 %v9534_v23  ;;  %v5571_v40 = vunpack.i.h.bf16 %v6695_v8 }
 0x120   : > { %v2249_v3 = vadd.f32 %v2248_v56, %v6843_v9  ;;  %v2381_v36 = vadd.f32 %v2380_v14, %v2318_v54  ;;  %v5119_v34 = vpop.f32.mrf.mxu0  ;;  %v6877_v24 = vpop.permute.xlu1 %5609  ;;  %v9542_v19 = vunpack.i.h.bf16 %v9541_v62  ;;  %v9543_v56 = vld [vmem:[#allocation10_spill] sm:$0xff]  ;;  %v5565_v20 = vunpack.i.h.bf16 %v6662_v55 }
 0x121   : > { %9539 = vst [vmem:[#allocation18_spill] sm:$0xff] %v6871_v29  ;;  %v1739_v41 = vmul.f32 %v9540_v5, %v6358_v27  ;;  %v2320_v15 = vmul.f32 %v6871_v29, %v6871_v29  ;;  %v1802_v14 = vadd.f32 %v1738_v7, %v1296_v60  ;;  %5881 = vset.pattern.permute.xlu1 %v9507_v10  ;;  %v5575_v8 = vunpack.i.l.bf16 %v9543_v56 }
 0x122   : > { %v886_v59 = vmul.f32 %v9542_v19, %v6374_v63  ;;  %v2382_v42 = vadd.f32 %v2381_v36, %v2319_v33  ;;  %v2250_v54 = vadd.f32 %v2249_v3, %v6871_v29  ;;  %v1298_v23 = vpop.f32.mrf.mxu0  ;;  %v2126_v32 = vmul.f32 %v5570_v17, %v6354_v26  ;;  %5883 = vperm.xlu1 %5881, %v9537_v12  }
 0x123   : > { %v887_v57 = vmul.f32 %v5564_v53, %v6374_v63  ;;  %v2321_v3 = vmul.f32 %v6865_v18, %v6865_v18  ;;  %v2127_v5 = vmul.f32 %v5571_v40, %v6354_v26  ;;  %v5665_v62 = vunpack.i.l.bf16 %v6773_v47  ;;  %v6911_v40 = vpop.permute.xlu0 %5743 }
 0x124   : > { %v2251_v33 = vadd.f32 %v2250_v54, %v6865_v18  ;;  %v2383_v36 = vadd.f32 %v2382_v42, %v2320_v15  ;;  %v1299_v7 = vadd.f32 %v1298_v23, %v886_v59  ;;  %v6896_v60 = vpop.f32.mrf.mxu0  ;;  %v2322_v17 = vmul.f32 %v6856_v25, %v6856_v25 }
 0x125   : > { %v1304_v55 = vadd.f32 %v5118_v51, %v887_v57  ;;  %v6902_v19 = vadd.f32 %v2126_v32, %v1802_v14  ;;  %v6904_v9 = vpop.permute.xlu1 %5615  ;;  %v5576_v42 = vunpack.i.h.bf16 %v9543_v56  ;;  %v1740_v59 = vmul.f32 %v5575_v8, %v6358_v27 }
 0x126   : > { %v2384_v53 = vadd.f32 %v2383_v36, %v2321_v3  ;;  %v1803_v29 = vadd.f32 %v1739_v41, %v1299_v7  ;;  %v1311_v37 = vpop.f32.mrf.mxu0  ;;  %v2252_v54 = vadd.f32 %v2251_v33, %v6856_v25  ;;  %5893 = vset.pattern.permute.xlu1 %v9517_v39  ;;  %v5581_v51 = vunpack.i.l.bf16 %v6728_v21  ;;  %v5949_v25 = vld [vmem:[%s9373_s4 + $0x28] sm:$0xff]  }
 0x127   : > { %9544 = vst [vmem:[#allocation19_spill] sm:$0xff] %v6902_v19  ;;  %v888_v14 = vmul.f32 %v5565_v20, %v6374_v63  ;;  %5895 = vperm.xlu1 %5893, %v9537_v12   ;;  %v5666_v41 = vunpack.i.h.bf16 %v6773_v47  ;;  %v2128_v56 = vmul.f32 %v5665_v62, %v6354_v26  ;;  %v5582_v32 = vunpack.i.h.bf16 %v6728_v21 }
 0x128   : > { %v2385_v15 = vadd.f32 %v2384_v53, %v2322_v17  ;;  %v6914_v23 = vadd.f32 %v2127_v5, %v1803_v29  ;;  %v6919_v8 = vpop.f32.mrf.mxu0  ;;  %v1804_v57 = vadd.f32 %v1740_v59, %v1304_v55  ;;  %v2323_v3 = vmul.f32 %v6902_v19, %v6902_v19  ;;  %v9546_v17 = vld [vmem:[#allocation6_spill] sm:$0xff]  ;;  %v6939_v59 = vpop.permute.xlu0 %5760 }
 0x129   : > { %v1307_v33 = vadd.f32 %v5119_v34, %v888_v14  ;;  %v1741_v36 = vmul.f32 %v5576_v42, %v6358_v27  ;;  %v2253_v29 = vadd.f32 %v2252_v54, %v6902_v19  ;;  %v5587_v12 = vunpack.i.l.bf16 %v6756_v58 }
 0x12a   : > { %9545 = vst [vmem:[#allocation3_spill] sm:$0xff] %v6914_v23  ;;  %v6926_v20 = vpop.permute.xlu1 %5626  ;;  %v2386_v47 = vadd.f32 %v2385_v15, %v2323_v3  ;;  %v2324_v7 = vmul.f32 %v6914_v23, %v6914_v23  ;;  %v889_v5 = vmul.f32 %v5581_v51, %v6374_v63  ;;  %v5588_v21 = vunpack.i.h.bf16 %v6756_v58  ;;  %v1314_v55 = vpop.f32.mrf.mxu0 }
 0x12b   : > { %5899 = vset.pattern.permute.xlu1 %v9507_v10  ;;  %v2129_v34 = vmul.f32 %v5666_v41, %v6354_v26  ;;  %v5670_v62 = vunpack.i.l.bf16 %v6807_v35  ;;  %v6937_v53 = vadd.f32 %v2128_v56, %v1804_v57  ;;  %v1805_v42 = vadd.f32 %v1741_v36, %v1307_v33  ;;  %v9549_v36 = vld [vmem:[#allocation5_spill] sm:$0xff] }
 0x12c   : > { %5901 = vperm.xlu1 %5899, %v9546_v17   ;;  %v1312_v54 = vadd.f32 %v1311_v37, %v889_v5  ;;  %v890_v15 = vmul.f32 %v5582_v32, %v6374_v63  ;;  %v5671_v51 = vunpack.i.h.bf16 %v6807_v35  ;;  %v2254_v10 = vadd.f32 %v2253_v29, %v6914_v23  ;;  %v6949_v57 = vpop.f32.mrf.mxu0 }
 0x12d   : > { %9547 = vst [vmem:[#allocation23_spill] sm:$0xff] %v6937_v53  ;;  %v1742_v58 = vmul.f32 %v5587_v12, %v6358_v27  ;;  %v5593_v14 = vunpack.i.l.bf16 %v6790_v50  ;;  %v2387_v41 = vadd.f32 %v2386_v47, %v2324_v7  ;;  %v2130_v56 = vmul.f32 %v5670_v62, %v6354_v26  ;;  %v5767_v62 = vpop.permute.xlu0 %5766 }
 0x12e   : > { %v1315_v3 = vadd.f32 %v1314_v55, %v890_v15  ;;  %v1743_v37 = vmul.f32 %v5588_v21, %v6358_v27  ;;  %v2325_v35 = vmul.f32 %v6937_v53, %v6937_v53  ;;  %v6955_v32 = vadd.f32 %v2129_v34, %v1805_v42  ;;  %v1327_v17 = vpop.f32.mrf.mxu0 }
 0x12f   : > { %v6946_v19 = vpop.permute.xlu1 %5632  ;;  %v1806_v33 = vadd.f32 %v1742_v58, %v1312_v54  ;;  %v9550_v29 = vunpack.c.h.bf16 %v9549_v36  ;;  %v5594_v12 = vunpack.i.h.bf16 %v6790_v50  ;;  %v2131_v47 = vmul.f32 %v5671_v51, %v6354_v26 }
 0x130   : > { %5906 = vset.pattern.permute.xlu1 %v9517_v39  ;;  %9548 = vst [vmem:[#allocation22_spill] sm:$0xff] %v6955_v32  ;;  %v2255_v7 = vadd.f32 %v2254_v10, %v6937_v53  ;;  %v5599_v5 = vunpack.i.l.bf16 %v6817_v13  ;;  %v2388_v39 = vadd.f32 %v2387_v41, %v2325_v35  ;;  %v891_v21 = vmul.f32 %v5593_v14, %v6374_v63  ;;  %v6978_v36 = vpop.f32.mrf.mxu0 }
 0x131   : > { %2095 = vperm.xlu1 %5906, %v9550_v29   ;;  %v1807_v55 = vadd.f32 %v1743_v37, %v1315_v3  ;;  %v2326_v42 = vmul.f32 %v6955_v32, %v6955_v32  ;;  %v5768_v50 = vunpack.i.l.bf16 %v5767_v62  ;;  %v6969_v15 = vadd.f32 %v2130_v56, %v1806_v33 }
 0x132   : > { %v1320_v54 = vadd.f32 %v6896_v60, %v891_v21  ;;  %v5600_v51 = vunpack.i.h.bf16 %v6817_v13  ;;  %v5605_v10 = vunpack.i.l.bf16 %v6849_v52  ;;  %v5769_v58 = vunpack.i.h.bf16 %v5767_v62 }
 0x133   : > { %9551 = vst [vmem:[#allocation25_spill] sm:$0xff] %v6969_v15  ;;  %v2256_v14 = vadd.f32 %v2255_v7, %v6955_v32  ;;  %v1744_v41 = vmul.f32 %v5599_v5, %v6358_v27  ;;  %v2389_v3 = vadd.f32 %v2388_v39, %v2326_v42  ;;  %v892_v37 = vmul.f32 %v5594_v12, %v6374_v63  ;;  %v6990_v39 = vpop.f32.mrf.mxu1 }
 0x134   : > { %v6964_v34 = vpop.permute.xlu1 %5674  ;;  %v6976_v35 = vadd.f32 %v2131_v47, %v1807_v55  ;;  %v2327_v56 = vmul.f32 %v6969_v15, %v6969_v15  ;;  %v893_v33 = vmul.f32 %v5768_v50, %v6374_v63  ;;  %v1745_v7 = vmul.f32 %v5600_v51, %v6358_v27  ;;  %v5772_v55 = vpop.permute.xlu0 %5771 }
 0x135   : > { %v1808_v60 = vadd.f32 %v1744_v41, %v1320_v54  ;;  %v1323_v13 = vadd.f32 %v6919_v8, %v892_v37  ;;  %v5606_v5 = vunpack.i.h.bf16 %v6849_v52  ;;  %v2132_v12 = vmul.f32 %v5605_v10, %v6354_v26  ;;  %v1330_v50 = vpop.f32.mrf.mxu0  ;;  %v1343_v37 = vpop.f32.mrf.mxu1 }
 0x136   : > { %9552 = vst [vmem:[#allocation4_spill] sm:$0xff] %v6976_v35  ;;  %v2257_v47 = vadd.f32 %v2256_v14, %v6969_v15  ;;  %v5611_v21 = vunpack.i.l.bf16 %v6877_v24  ;;  %v2390_v62 = vadd.f32 %v2389_v3, %v2327_v56  ;;  %v2328_v8 = vmul.f32 %v6976_v35, %v6976_v35 }
 0x137   : > { %v894_v42 = vmul.f32 %v5769_v58, %v6374_v63  ;;  %v5612_v54 = vunpack.i.h.bf16 %v6877_v24  ;;  %v6997_v51 = vadd.f32 %v2132_v12, %v1808_v60  ;;  %v1809_v52 = vadd.f32 %v1745_v7, %v1323_v13  ;;  %v7012_v12 = vpop.f32.mrf.mxu1 }
 0x138   : > { %v1328_v10 = vadd.f32 %v1327_v17, %v893_v33  ;;  %v2133_v14 = vmul.f32 %v5606_v5, %v6354_v26  ;;  %v5773_v41 = vunpack.i.l.bf16 %v5772_v55  ;;  %v2258_v15 = vadd.f32 %v2257_v47, %v6976_v35 }
 0x139   : > { %v6984_v29 = vpop.permute.xlu1 %5685  ;;  %9553 = vst [vmem:[#allocation14_spill] sm:$0xff] %v6997_v51  ;;  %v1746_v56 = vmul.f32 %v5611_v21, %v6358_v27  ;;  %v5617_v32 = vunpack.i.l.bf16 %v6904_v9  ;;  %v2391_v58 = vadd.f32 %v2390_v62, %v2328_v8  ;;  %v1331_v53 = vadd.f32 %v1330_v50, %v894_v42 }
 0x13a   : > { %v1747_v24 = vmul.f32 %v5612_v54, %v6358_v27  ;;  %v5774_v60 = vunpack.i.h.bf16 %v5772_v55  ;;  %v2329_v17 = vmul.f32 %v6997_v51, %v6997_v51  ;;  %v5618_v13 = vunpack.i.h.bf16 %v6904_v9  ;;  %v9555_v55 = vld [vmem:[#allocation12_spill] sm:$0xff] }
 0x13b   : > { %v7009_v33 = vadd.f32 %v2133_v14, %v1809_v52  ;;  %v1810_v7 = vadd.f32 %v1746_v56, %v1328_v10  ;;  %v2259_v5 = vadd.f32 %v2258_v15, %v6997_v51  ;;  %v2134_v47 = vmul.f32 %v5617_v32, %v6354_v26 }
 0x13c   : > { %v2392_v21 = vadd.f32 %v2391_v58, %v2329_v17  ;;  %v895_v62 = vmul.f32 %v5773_v41, %v6374_v63  ;;  %v1811_v8 = vadd.f32 %v1747_v24, %v1331_v53  ;;  %v5622_v54 = vunpack.i.l.bf16 %v9555_v55  ;;  %v1346_v53 = vpop.f32.mrf.mxu1 }
 0x13d   : > { %9554 = vst [vmem:[#allocation21_spill] sm:$0xff] %v7009_v33  ;;  %v5628_v50 = vunpack.i.l.bf16 %v6926_v20  ;;  %v896_v9 = vmul.f32 %v5774_v60, %v6374_v63  ;;  %v2135_v52 = vmul.f32 %v5618_v13, %v6354_v26  ;;  %v2330_v15 = vmul.f32 %v7009_v33, %v7009_v33  ;;  %v7032_v60 = vpop.permute.xlu0 %5776 }
 0x13e   : > { %v7001_v3 = vpop.permute.xlu1 %5691  ;;  %v7024_v10 = vadd.f32 %v2134_v47, %v1810_v7  ;;  %v5634_v32 = vunpack.i.l.bf16 %v6946_v19  ;;  %v5623_v14 = vunpack.i.h.bf16 %v9555_v55  ;;  %v2260_v41 = vadd.f32 %v2259_v5, %v7009_v33  ;;  %v7037_v47 = vpop.f32.mrf.mxu1 }
 0x13f   : > { %v1336_v56 = vadd.f32 %v6949_v57, %v895_v62  ;;  %v2393_v58 = vadd.f32 %v2392_v21, %v2330_v15  ;;  %v7030_v24 = vadd.f32 %v2135_v52, %v1811_v8  ;;  %v1748_v17 = vmul.f32 %v5622_v54, %v6358_v27 }
 0x140   : > { %9556 = vst [vmem:[#allocation27_spill] sm:$0xff] %v7024_v10  ;;  %v5629_v13 = vunpack.i.h.bf16 %v6926_v20  ;;  %v897_v7 = vmul.f32 %v5628_v50, %v6374_v63  ;;  %v2331_v5 = vmul.f32 %v7024_v10, %v7024_v10  ;;  %v5635_v57 = vunpack.i.h.bf16 %v6946_v19  ;;  %v9558_v20 = vld [vmem:[#allocation17_spill] sm:$0xff]  ;;  %v7053_v23 = vpop.f32.mrf.mxu1 }
 0x141   : > { %9557 = vst [vmem:[#allocation15_spill] sm:$0xff] %v7030_v24  ;;  %v2136_v21 = vmul.f32 %v5634_v32, %v6354_v26  ;;  %v1339_v62 = vadd.f32 %v6978_v36, %v896_v9  ;;  %v1749_v8 = vmul.f32 %v5623_v14, %v6358_v27  ;;  %v2261_v55 = vadd.f32 %v2260_v41, %v7024_v10  ;;  %v7059_v41 = vpop.permute.xlu0 %5781 }
 0x142   : > { %v5639_v54 = vunpack.i.l.bf16 %v9558_v20  ;;  %v1812_v50 = vadd.f32 %v1748_v17, %v1336_v56  ;;  %v2394_v52 = vadd.f32 %v2393_v58, %v2331_v5  ;;  %v2332_v15 = vmul.f32 %v7030_v24, %v7030_v24 }
 0x143   : > { %v7016_v42 = vpop.permute.xlu1 %5702  ;;  %v5681_v33 = vunpack.i.l.bf16 %v6841_v43  ;;  %v1344_v35 = vadd.f32 %v1343_v37, %v897_v7  ;;  %v898_v19 = vmul.f32 %v5629_v13, %v6374_v63  ;;  %v2137_v36 = vmul.f32 %v5635_v57, %v6354_v26 }
 0x144   : > { %v7056_v9 = vadd.f32 %v2136_v21, %v1812_v50  ;;  %v1813_v32 = vadd.f32 %v1749_v8, %v1339_v62  ;;  %v5676_v14 = vunpack.i.l.bf16 %v6964_v34  ;;  %v5640_v58 = vunpack.i.h.bf16 %v9558_v20  ;;  %v7069_v62 = vpop.f32.mrf.mxu1 }
 0x145   : > { %v2262_v17 = vadd.f32 %v2261_v55, %v7030_v24  ;;  %v1750_v37 = vmul.f32 %v5639_v54, %v6358_v27  ;;  %v2395_v13 = vadd.f32 %v2394_v52, %v2332_v15  ;;  %v5687_v7 = vunpack.i.l.bf16 %v6984_v29  ;;  %v7082_v15 = vpop.permute.xlu0 %5792 }
 0x146   : > { %9559 = vst [vmem:[#allocation9_spill] sm:$0xff] %v7056_v9  ;;  %v5682_v5 = vunpack.i.h.bf16 %v6841_v43  ;;  %v2138_v57 = vmul.f32 %v5681_v33, %v6354_v26  ;;  %v1347_v21 = vadd.f32 %v1346_v53, %v898_v19  ;;  %v2333_v50 = vmul.f32 %v7056_v9, %v7056_v9 }
 0x147   : > { %v1814_v8 = vadd.f32 %v1750_v37, %v1344_v35  ;;  %v7073_v10 = vadd.f32 %v2137_v36, %v1813_v32  ;;  %v899_v55 = vmul.f32 %v5676_v14, %v6374_v63  ;;  %v1751_v20 = vmul.f32 %v5640_v58, %v6358_v27  ;;  %v5947_v35 = vld [vmem:[%s9373_s4 + $0x38] sm:$0xff]   ;;  %v7090_v58 = vpop.f32.mrf.mxu1 }
 0x148   : > { %v7039_v51 = vpop.permute.xlu1 %5708  ;;  %v2263_v54 = vadd.f32 %v2262_v17, %v7056_v9  ;;  %v5677_v52 = vunpack.i.h.bf16 %v6964_v34  ;;  %v2396_v33 = vadd.f32 %v2395_v13, %v2333_v50  ;;  %v1752_v53 = vmul.f32 %v5687_v7, %v6358_v27  ;;  %5156 = vmatprep.subr.bf16.mxu1 %v5947_v35 }
 0x149   : > { %9560 = vst [vmem:[#allocation11_spill] sm:$0xff] %v7073_v10  ;;  %v2139_v19 = vmul.f32 %v5682_v5, %v6354_v26  ;;  %v5698_v36 = vunpack.i.l.bf16 %v6882_v44  ;;  %v1815_v32 = vadd.f32 %v1751_v20, %v1347_v21  ;;  %v5688_v14 = vunpack.i.h.bf16 %v6984_v29  ;;  %v7100_v50 = vpop.f32.mrf.mxu1  ;;  %5157 = vmatpush3.bf16.msra.mxu1 %v5947_v35 }
 0x14a   : > { %v7092_v34 = vadd.f32 %v2138_v57, %v1814_v8  ;;  %v2334_v17 = vmul.f32 %v7073_v10, %v7073_v10  ;;  %v1352_v37 = vadd.f32 %v6990_v39, %v899_v55  ;;  %v5693_v13 = vunpack.i.l.bf16 %v7001_v3  ;;  %v5948_v39 = vld [vmem:[%s9373_s4 + $0x30] sm:$0xff]  }
 0x14b   : > { %v2264_v7 = vadd.f32 %v2263_v54, %v7073_v10  ;;  %v900_v5 = vmul.f32 %v5677_v52, %v6374_v63  ;;  %v5699_v29 = vunpack.i.h.bf16 %v6882_v44  ;;  %v5704_v8 = vunpack.i.l.bf16 %v7016_v42  ;;  %5158 = vmatprep.subr.bf16.mxu1 %v5948_v39 }
 0x14c   : > { %9561 = vst [vmem:[#allocation16_spill] sm:$0xff] %v7092_v34  ;;  %v2397_v21 = vadd.f32 %v2396_v33, %v2334_v17  ;;  %v1816_v57 = vadd.f32 %v1752_v53, %v1352_v37  ;;  %v2140_v55 = vmul.f32 %v5698_v36, %v6354_v26  ;;  %v7110_v54 = vadd.f32 %v2139_v19, %v1815_v32  ;;  %v7118_v17 = vpop.permute.xlu0 %5809 }
 0x14d   : > { %v7061_v56 = vpop.permute.xlu1 %5714  ;;  %v1753_v52 = vmul.f32 %v5688_v14, %v6358_v27  ;;  %v2335_v35 = vmul.f32 %v7092_v34, %v7092_v34  ;;  %v901_v44 = vmul.f32 %v5693_v13, %v6374_v63  ;;  %v5778_v33 = vunpack.i.l.bf16 %v7032_v60  ;;  %v1375_v14 = vpop.f32.mrf.mxu1  ;;  %5159 = vmatpush3.bf16.msra.mxu1 %v5948_v39 }
 0x14e   : > { %9562 = vst [vmem:[#allocation7_spill] sm:$0xff] %v7110_v54  ;;  %v5710_v53 = vunpack.i.l.bf16 %v7039_v51  ;;  %v2265_v37 = vadd.f32 %v2264_v7, %v7092_v34  ;;  %v1355_v36 = vadd.f32 %v7012_v12, %v900_v5  ;;  %v5694_v19 = vunpack.i.h.bf16 %v7001_v3  ;;  %5160 = vmatprep.subr.bf16.mxu1 %v5949_v25 }
 0x14f   : > { %v5779_v32 = vunpack.i.h.bf16 %v7032_v60  ;;  %v2141_v24 = vmul.f32 %v5699_v29, %v6354_v26  ;;  %v2398_v13 = vadd.f32 %v2397_v21, %v2335_v35  ;;  %v7125_v10 = vadd.f32 %v2140_v55, %v1816_v57  ;;  %v7145_v35 = vpop.f32.mrf.mxu1 }
 0x150   : > { %v1754_v9 = vmul.f32 %v5704_v8, %v6358_v27  ;;  %v2336_v12 = vmul.f32 %v7110_v54, %v7110_v54  ;;  %v1817_v7 = vadd.f32 %v1753_v52, %v1355_v36  ;;  %v5705_v3 = vunpack.i.h.bf16 %v7016_v42  ;;  %v5816_v36 = vpop.permute.xlu0 %5815 }
 0x151   : > { %v5783_v60 = vunpack.i.l.bf16 %v7059_v41  ;;  %v1360_v29 = vadd.f32 %v7053_v23, %v901_v44  ;;  %v903_v21 = vmul.f32 %v5778_v33, %v6374_v63  ;;  %v2142_v57 = vmul.f32 %v5710_v53, %v6354_v26  ;;  %5161 = vmatpush3.bf16.msra.mxu1 %v5949_v25 }
 0x152   : > { %v7079_v43 = vpop.permute.xlu1 %5720  ;;  %v5716_v8 = vunpack.i.l.bf16 %v7061_v56  ;;  %v2266_v39 = vadd.f32 %v2265_v37, %v7110_v54  ;;  %v902_v55 = vmul.f32 %v5694_v19, %v6374_v63  ;;  %v904_v52 = vmul.f32 %v5779_v32, %v6374_v63  ;;  %v5950_v37 = vld [vmem:[%s9373_s4 + $0x20] sm:$0xff]  }
 0x153   : > { %v5711_v42 = vunpack.i.h.bf16 %v7039_v51  ;;  %v2337_v23 = vmul.f32 %v7125_v10, %v7125_v10  ;;  %v2399_v44 = vadd.f32 %v2398_v13, %v2336_v12  ;;  %v1818_v33 = vadd.f32 %v1754_v9, %v1360_v29  ;;  %5162 = vmatprep.subr.bf16.mxu1 %v5950_v37 }
 0x154   : > { %v5722_v53 = vunpack.i.l.bf16 %v7079_v43  ;;  %v7153_v19 = vadd.f32 %v2141_v24, %v1817_v7  ;;  %v1755_v32 = vmul.f32 %v5705_v3, %v6358_v27  ;;  %v5817_v51 = vunpack.i.l.bf16 %v5816_v36  ;;  %v1378_v3 = vpop.f32.mrf.mxu1 }
 0x155   : > { %v905_v54 = vmul.f32 %v5783_v60, %v6374_v63  ;;  %v1368_v25 = vadd.f32 %v7037_v47, %v903_v21  ;;  %v7158_v34 = vadd.f32 %v2142_v57, %v1818_v33  ;;  %v1756_v9 = vmul.f32 %v5716_v8, %v6358_v27  ;;  %5163 = vmatpush3.bf16.msra.mxu1 %v5950_v37  ;;  %v5951_v8 = vld [vmem:[%s9373_s4 + $0x18] sm:$0xff]  }
 0x156   : > { %v2267_v12 = vadd.f32 %v2266_v39, %v7125_v10  ;;  %v1363_v29 = vadd.f32 %v7090_v58, %v902_v55  ;;  %v2143_v24 = vmul.f32 %v5711_v42, %v6354_v26  ;;  %v5784_v7 = vunpack.i.h.bf16 %v7059_v41  ;;  %v5952_v42 = vld [vmem:[%s9373_s4 + $0x10] sm:$0xff]   ;;  %5164 = vmatprep.subr.bf16.mxu1 %v5951_v8 }
 0x157   : > { %v7104_v20 = vpop.permute.xlu1 %5726  ;;  %9563 = vst [vmem:[#allocation10_spill] sm:$0xff] %v7158_v34  ;;  %v2400_v60 = vadd.f32 %v2399_v44, %v2337_v23  ;;  %v1371_v47 = vadd.f32 %v7069_v62, %v904_v52  ;;  %v5717_v21 = vunpack.i.h.bf16 %v7061_v56  ;;  %v2144_v57 = vmul.f32 %v5722_v53, %v6354_v26 }
 0x158   : > { %v2338_v58 = vmul.f32 %v7153_v19, %v7153_v19  ;;  %v1819_v39 = vadd.f32 %v1755_v32, %v1363_v29  ;;  %v1758_v55 = vmul.f32 %v5817_v51, %v6358_v27  ;;  %v1376_v41 = vadd.f32 %v1375_v14, %v905_v54  ;;  %v7187_v14 = vpop.f32.mrf.mxu1 }
 0x159   : > { %v2339_v56 = vmul.f32 %v7158_v34, %v7158_v34  ;;  %v1820_v62 = vadd.f32 %v1756_v9, %v1368_v25  ;;  %v5723_v52 = vunpack.i.h.bf16 %v7079_v43  ;;  %v2268_v33 = vadd.f32 %v2267_v12, %v7153_v19  ;;  %5165 = vmatpush3.bf16.msra.mxu1 %v5951_v8  ;;  %v5821_v9 = vpop.permute.xlu0 %5820 }
 0x15a   : > { %v7183_v44 = vadd.f32 %v2143_v24, %v1819_v39  ;;  %v5818_v53 = vunpack.i.h.bf16 %v5816_v36  ;;  %v906_v54 = vmul.f32 %v5784_v7, %v6374_v63  ;;  %v2401_v32 = vadd.f32 %v2400_v60, %v2338_v58  ;;  %5166 = vmatprep.subr.bf16.mxu1 %v5952_v42  ;;  %v5953_v36 = vld [vmem:[%s9373_s4 + $0x8] sm:$0xff]   ;;  %v1391_v39 = vpop.f32.mrf.mxu1 }
 0x15b   : > { %v1757_v51 = vmul.f32 %v5717_v21, %v6358_v27  ;;  %v7192_v25 = vadd.f32 %v2144_v57, %v1820_v62  ;;  %v5728_v43 = vunpack.i.l.bf16 %v7104_v20  ;;  %v1822_v12 = vadd.f32 %v1758_v55, %v1376_v41 }
 0x15c   : > { %v7135_v5 = vpop.permute.xlu1 %5732  ;;  %v2269_v29 = vadd.f32 %v2268_v33, %v7158_v34  ;;  %v2402_v24 = vadd.f32 %v2401_v32, %v2339_v56  ;;  %v2145_v7 = vmul.f32 %v5723_v52, %v6354_v26  ;;  %v2340_v21 = vmul.f32 %v7183_v44, %v7183_v44 }
 0x15d   : > { %v5734_v23 = vunpack.i.l.bf16 %v7135_v5  ;;  %9564 = vst [vmem:[#allocation6_spill] sm:$0xff] %v7192_v25  ;;  %v1759_v57 = vmul.f32 %v5818_v53, %v6358_v27  ;;  %v5822_v8 = vunpack.i.l.bf16 %v5821_v9  ;;  %v1379_v58 = vadd.f32 %v1378_v3, %v906_v54  ;;  %5167 = vmatpush3.bf16.msra.mxu1 %v5952_v42 }
 0x15e   : > { %v1821_v62 = vadd.f32 %v1757_v51, %v1371_v47  ;;  %v2341_v55 = vmul.f32 %v7192_v25, %v7192_v25  ;;  %v907_v41 = vmul.f32 %v5728_v43, %v6374_v63  ;;  %v5735_v56 = vunpack.i.h.bf16 %v7135_v5  ;;  %5168 = vmatprep.subr.bf16.mxu1 %v5953_v36  ;;  %v7221_v51 = vpop.f32.mrf.mxu1 }
 0x15f   : > { %v2146_v60 = vmul.f32 %v5734_v23, %v6354_v26  ;;  %v5954_v23 = vld [vmem:[%s9373_s4] sm:$0xff]   ;;  %v5729_v33 = vunpack.i.h.bf16 %v7104_v20  ;;  %v2270_v3 = vadd.f32 %v2269_v29, %v7183_v44  ;;  %v2403_v42 = vadd.f32 %v2402_v24, %v2340_v21 }
 0x160   : > { %v7215_v47 = vadd.f32 %v2145_v7, %v1821_v62  ;;  %v1760_v54 = vmul.f32 %v5822_v8, %v6358_v27  ;;  %v1823_v32 = vadd.f32 %v1759_v57, %v1379_v58  ;;  %v1384_v20 = vadd.f32 %v7100_v50, %v907_v41  ;;  %v1394_v8 = vpop.f32.mrf.mxu1 }
 0x161   : > { %v7161_v13 = vpop.permute.xlu1 %5738  ;;  %v7217_v53 = vadd.f32 %v2146_v60, %v1822_v12  ;;  %5169 = vmatpush3.bf16.msra.mxu1 %v5953_v36  ;;  %v2271_v43 = vadd.f32 %v2270_v3, %v7192_v25  ;;  %v2404_v34 = vadd.f32 %v2403_v42, %v2341_v55  ;;  %v2147_v29 = vmul.f32 %v5735_v56, %v6354_v26 }
 0x162   : > { %v5740_v5 = vunpack.i.l.bf16 %v7161_v13  ;;  %5170 = vmatprep.subr.bf16.mxu1 %v5954_v23  ;;  %v5823_v24 = vunpack.i.h.bf16 %v5821_v9  ;;  %v908_v12 = vmul.f32 %v5729_v33, %v6374_v63  ;;  %v5745_v21 = vunpack.i.l.bf16 %v6911_v40 }
 0x163   : > { %9565 = vst [vmem:[#allocation5_spill] sm:$0xff] %v7217_v53  ;;  %v2342_v36 = vmul.f32 %v7215_v47, %v7215_v47  ;;  %v2343_v57 = vmul.f32 %v7217_v53, %v7217_v53  ;;  %v2272_v9 = vadd.f32 %v2271_v43, %v7215_v47  ;;  %v1824_v62 = vadd.f32 %v1760_v54, %v1384_v20  ;;  %v7248_v20 = vpop.f32.mrf.mxu1 }
 0x164   : > { %v909_v50 = vmul.f32 %v5740_v5, %v6374_v63  ;;  %v7237_v55 = vadd.f32 %v2147_v29, %v1823_v32  ;;  %v1761_v41 = vmul.f32 %v5823_v24, %v6358_v27  ;;  %v1387_v56 = vadd.f32 %v7145_v35, %v908_v12 }
 0x165   : > { %5171 = vmatpush3.bf16.msra.mxu1 %v5954_v23  ;;  %v2405_v58 = vadd.f32 %v2404_v34, %v2342_v36  ;;  %v5741_v33 = vunpack.i.h.bf16 %v7161_v13  ;;  %v5746_v42 = vunpack.i.h.bf16 %v6911_v40  ;;  %v2148_v5 = vmul.f32 %v5745_v21, %v6354_v26 }
 0x166   : > { %v7189_v37 = vpop.permute.xlu1 %5749  ;;  %9566 = vst [vmem:[#allocation12_spill] sm:$0xff] %v7237_v55  ;;  %v2273_v23 = vadd.f32 %v2272_v9, %v7217_v53  ;;  %v5762_v34 = vunpack.i.l.bf16 %v6939_v59  ;;  %v1392_v54 = vadd.f32 %v1391_v39, %v909_v50  ;;  %v5763_v13 = vunpack.i.h.bf16 %v6939_v59  ;;  %v1407_v50 = vpop.f32.mrf.mxu1 }
 0x167   : > { %v5751_v7 = vunpack.i.l.bf16 %v7189_v37  ;;  %v2406_v25 = vadd.f32 %v2405_v58, %v2343_v57  ;;  %v5752_v32 = vunpack.i.h.bf16 %v7189_v37  ;;  %v7252_v29 = vadd.f32 %v2148_v5, %v1824_v62 }
 0x168   : > { %v2344_v40 = vmul.f32 %v7237_v55, %v7237_v55  ;;  %v1825_v24 = vadd.f32 %v1761_v41, %v1387_v56  ;;  %v910_v12 = vmul.f32 %v5741_v33, %v6374_v63  ;;  %v2149_v39 = vmul.f32 %v5746_v42, %v6354_v26 }
 0x169   : > { %v1762_v3 = vmul.f32 %v5751_v7, %v6358_v27  ;;  %9567 = vst [vmem:[#allocation17_spill] sm:$0xff] %v7252_v29  ;;  %v2274_v37 = vadd.f32 %v2273_v23, %v7237_v55  ;;  %v2150_v57 = vmul.f32 %v5762_v34, %v6354_v26  ;;  %v1763_v59 = vmul.f32 %v5752_v32, %v6358_v27 }
 0x16a   : > { %v2407_v36 = vadd.f32 %v2406_v25, %v2344_v40  ;;  %v2151_v41 = vmul.f32 %v5763_v13, %v6354_v26  ;;  %v5794_v56 = vunpack.i.l.bf16 %v7082_v15  ;;  %v2345_v33 = vmul.f32 %v7252_v29, %v7252_v29  ;;  %v7276_v40 = vpop.f32.mrf.mxu1 }
 0x16b   : > { %v7208_v52 = vpop.permute.xlu1 %5755  ;;  %v1826_v7 = vadd.f32 %v1762_v3, %v1392_v54  ;;  %v7268_v42 = vadd.f32 %v2149_v39, %v1825_v24  ;;  %v1395_v25 = vadd.f32 %v1394_v8, %v910_v12  ;;  %v5811_v34 = vunpack.i.l.bf16 %v7118_v17 }
 0x16c   : > { %v5757_v35 = vunpack.i.l.bf16 %v7208_v52  ;;  %v5758_v3 = vunpack.i.h.bf16 %v7208_v52  ;;  %v2275_v54 = vadd.f32 %v2274_v37, %v7252_v29  ;;  %v2408_v32 = vadd.f32 %v2407_v36, %v2345_v33  ;;  %v7279_v52 = vpop.permute.xlu0 %5831  ;;  %v1410_v33 = vpop.f32.mrf.mxu1 }
 0x16d   : > { %9568 = vst [vmem:[#allocation28_spill] sm:$0xff] %v7268_v42  ;;  %v7270_v5 = vadd.f32 %v2150_v57, %v1826_v7  ;;  %v1827_v13 = vadd.f32 %v1763_v59, %v1395_v25  ;;  %v5795_v12 = vunpack.i.h.bf16 %v7082_v15  ;;  %v913_v7 = vmul.f32 %v5794_v56, %v6374_v63 }
 0x16e   : > { %v911_v9 = vmul.f32 %v5757_v35, %v6374_v63  ;;  %v2276_v59 = vadd.f32 %v2275_v54, %v7268_v42  ;;  %v5833_v15 = vunpack.i.l.bf16 %v7279_v52 }
 0x16f   : > { %v2347_v36 = vmul.f32 %v7270_v5, %v7270_v5  ;;  %v7293_v56 = vadd.f32 %v2151_v41, %v1827_v13 }
 0x170   : > { %v7228_v60 = vpop.permute.xlu1 %5787  ;;  %v1400_v55 = vadd.f32 %v7187_v14, %v911_v9  ;;  %v915_v9 = vmul.f32 %v5811_v34, %v6374_v63  ;;  %v2277_v29 = vadd.f32 %v2276_v59, %v7270_v5 }
 0x171   : > { %v5789_v21 = vunpack.i.l.bf16 %v7228_v60  ;;  %v5790_v35 = vunpack.i.h.bf16 %v7228_v60  ;;  %v2346_v60 = vmul.f32 %v7268_v42, %v7268_v42  ;;  %v1408_v42 = vadd.f32 %v1407_v50, %v913_v7  ;;  %v5849_v7 = vpop.permute.xlu0 %5848 }
 0x172   : > { %v1416_v13 = vadd.f32 %v7248_v20, %v915_v9  ;;  %v5834_v9 = vunpack.i.h.bf16 %v7279_v52 }
 0x173   : > { %v1764_v23 = vmul.f32 %v5789_v21, %v6358_v27  ;;  %v912_v21 = vmul.f32 %v5758_v3, %v6374_v63 }
 0x175   : > { %v5799_v43 = vpop.permute.xlu1 %5798  ;;  %v1828_v14 = vadd.f32 %v1764_v23, %v1400_v55  ;;  %v1403_v55 = vadd.f32 %v7221_v51, %v912_v21  ;;  %v2348_v51 = vmul.f32 %v7293_v56, %v7293_v56 }
 0x176   : > { %v5800_v58 = vunpack.i.l.bf16 %v5799_v43  ;;  %v5801_v39 = vunpack.i.h.bf16 %v5799_v43  ;;  %v2409_v43 = vadd.f32 %v2408_v32, %v2346_v60  ;;  %v5812_v32 = vunpack.i.h.bf16 %v7118_v17 }
 0x177   : > { %v2278_v17 = vadd.f32 %v2277_v29, %v7293_v56 }
 0x178   : > { %v2152_v8 = vmul.f32 %v5800_v58, %v6354_v26  ;;  %v1765_v58 = vmul.f32 %v5790_v35, %v6358_v27  ;;  %v2153_v23 = vmul.f32 %v5801_v39, %v6354_v26  ;;  %v2410_v34 = vadd.f32 %v2409_v43, %v2347_v36  ;;  %v7302_v35 = vpop.f32.mrf.mxu1 }
 0x179   : > { %v1768_v39 = vmul.f32 %v5833_v15, %v6358_v27  ;;  %v916_v59 = vmul.f32 %v5812_v32, %v6374_v63 }
 0x17a   : > { %v5805_v62 = vpop.permute.xlu1 %5804  ;;  %v7295_v3 = vadd.f32 %v2152_v8, %v1828_v14  ;;  %v914_v8 = vmul.f32 %v5795_v12, %v6374_v63  ;;  %v2411_v36 = vadd.f32 %v2410_v34, %v2348_v51  ;;  %v1423_v14 = vpop.f32.mrf.mxu1  ;;  %v1769_v51 = vmul.f32 %v5834_v9, %v6358_v27 }
 0x17b   : > { %v5806_v24 = vunpack.i.l.bf16 %v5805_v62  ;;  %v5807_v54 = vunpack.i.h.bf16 %v5805_v62  ;;  %v1832_v29 = vadd.f32 %v1768_v39, %v1416_v13 }
 0x17c   : > { %v2349_v62 = vmul.f32 %v7295_v3, %v7295_v3  ;;  %v5151_v52 = vpop.f32.mrf.mxu1 }
 0x17d   : > { %v1766_v25 = vmul.f32 %v5806_v24, %v6358_v27  ;;  %v1829_v24 = vadd.f32 %v1765_v58, %v1403_v55  ;;  %v1767_v20 = vmul.f32 %v5807_v54, %v6358_v27 }
 0x17e   : > { %v2412_v15 = vadd.f32 %v2411_v36, %v2349_v62 }
 0x17f   : > { %v5827_v37 = vpop.permute.xlu1 %5826  ;;  %v1830_v21 = vadd.f32 %v1766_v25, %v1408_v42  ;;  %v7312_v60 = vadd.f32 %v2153_v23, %v1829_v24  ;;  %v1411_v42 = vadd.f32 %v1410_v33, %v914_v8  ;;  %v5861_v33 = vpop.permute.xlu0 %5860  ;;  %v1419_v24 = vadd.f32 %v7276_v40, %v916_v59 }
 0x180   : > { %v5828_v57 = vunpack.i.l.bf16 %v5827_v37  ;;  %v5829_v50 = vunpack.i.h.bf16 %v5827_v37  ;;  %v2279_v37 = vadd.f32 %v2278_v17, %v7295_v3  ;;  %v5862_v36 = vunpack.i.l.bf16 %v5861_v33  ;;  %v1426_v40 = vpop.f32.mrf.mxu1 }
 0x181   : > { %v2350_v55 = vmul.f32 %v7312_v60, %v7312_v60  ;;  %v1833_v9 = vadd.f32 %v1769_v51, %v1419_v24 }
 0x182   : > { %v2154_v53 = vmul.f32 %v5828_v57, %v6354_v26  ;;  %v2155_v43 = vmul.f32 %v5829_v50, %v6354_v26  ;;  %v2280_v13 = vadd.f32 %v2279_v37, %v7312_v60  ;;  %v5851_v37 = vunpack.i.h.bf16 %v5849_v7 }
 0x183   : > { %v2413_v62 = vadd.f32 %v2412_v15, %v2350_v55  ;;  %v5878_v55 = vpop.permute.xlu0 %5877 }
 0x184   : > { %v5838_v41 = vpop.permute.xlu1 %5837  ;;  %v7316_v12 = vadd.f32 %v2154_v53, %v1830_v21  ;;  %v1831_v53 = vadd.f32 %v1767_v20, %v1411_v42 }
 0x185   : > { %v5839_v57 = vunpack.i.l.bf16 %v5838_v41  ;;  %v5840_v23 = vunpack.i.h.bf16 %v5838_v41  ;;  %v5850_v41 = vunpack.i.l.bf16 %v5849_v7 }
 0x186   : > { %v2351_v54 = vmul.f32 %v7316_v12, %v7316_v12  ;;  %v7331_v21 = vadd.f32 %v2155_v43, %v1831_v53  ;;  %v2281_v17 = vadd.f32 %v2280_v13, %v7316_v12  ;;  %v5879_v13 = vunpack.i.l.bf16 %v5878_v55 }
 0x187   : > { %v917_v34 = vmul.f32 %v5839_v57, %v6374_v63  ;;  %v918_v20 = vmul.f32 %v5840_v23, %v6374_v63  ;;  %v1770_v43 = vmul.f32 %v5850_v41, %v6358_v27 }
 0x188   : > { %v2414_v42 = vadd.f32 %v2413_v62, %v2351_v54  ;;  %v2352_v15 = vmul.f32 %v7331_v21, %v7331_v21  ;;  %v2282_v53 = vadd.f32 %v2281_v17, %v7331_v21 }
 0x189   : > { %v5844_v58 = vpop.permute.xlu1 %5843  ;;  %v1427_v23 = vadd.f32 %v1426_v40, %v918_v20  ;;  %v7352_v40 = vpop.f32.mrf.mxu1 }
 0x18a   : > { %v5845_v25 = vunpack.i.l.bf16 %v5844_v58  ;;  %v5846_v32 = vunpack.i.h.bf16 %v5844_v58  ;;  %v1424_v58 = vadd.f32 %v1423_v14, %v917_v34  ;;  %v2158_v14 = vmul.f32 %v5862_v36, %v6354_v26 }
 0x18c   : > { %v2156_v8 = vmul.f32 %v5845_v25, %v6354_v26  ;;  %v2157_v59 = vmul.f32 %v5846_v32, %v6354_v26  ;;  %v5863_v25 = vunpack.i.h.bf16 %v5861_v33  ;;  %v2415_v32 = vadd.f32 %v2414_v42, %v2352_v15 }
 0x18d   : > { %v1834_v7 = vadd.f32 %v1770_v43, %v1424_v58  ;;  %v1771_v33 = vmul.f32 %v5851_v37, %v6358_v27  ;;  %v2160_v15 = vmul.f32 %v5879_v13, %v6354_v26 }
 0x18e   : > { %v7333_v50 = vadd.f32 %v2156_v8, %v1832_v29  ;;  %v5855_v39 = vpop.permute.xlu1 %5854  ;;  %v7346_v8 = vadd.f32 %v2157_v59, %v1833_v9  ;;  %v2159_v42 = vmul.f32 %v5863_v25, %v6354_v26 }
 0x18f   : > { %v5856_v57 = vunpack.i.l.bf16 %v5855_v39  ;;  %v5857_v51 = vunpack.i.h.bf16 %v5855_v39  ;;  %v7355_v58 = vadd.f32 %v2158_v14, %v1834_v7 }
 0x190   : > { %v2353_v29 = vmul.f32 %v7333_v50, %v7333_v50  ;;  %9569 = vst [vmem:[#allocation29_spill] sm:$0xff] %v7346_v8  ;;  %v2283_v62 = vadd.f32 %v2282_v53, %v7333_v50  ;;  %v2354_v39 = vmul.f32 %v7346_v8, %v7346_v8  ;;  %v5880_v53 = vunpack.i.h.bf16 %v5878_v55 }
 0x191   : > { %v919_v54 = vmul.f32 %v5856_v57, %v6374_v63  ;;  %v1835_v57 = vadd.f32 %v1771_v33, %v1427_v23  ;;  %9570 = vst [vmem:[#allocation30_spill] sm:$0xff] %v7355_v58  ;;  %v920_v9 = vmul.f32 %v5857_v51, %v6374_v63  ;;  %v1439_v23 = vpop.f32.mrf.mxu1  ;;  %v2355_v14 = vmul.f32 %v7355_v58, %v7355_v58 }
 0x192   : > { %v2416_v41 = vadd.f32 %v2415_v32, %v2353_v29  ;;  %v2284_v43 = vadd.f32 %v2283_v62, %v7346_v8  ;;  %v2161_v55 = vmul.f32 %v5880_v53, %v6354_v26 }
 0x193   : > { %v5867_v34 = vpop.permute.xlu1 %5866  ;;  %v1432_v20 = vadd.f32 %v7302_v35, %v919_v54  ;;  %v7363_v25 = vadd.f32 %v2159_v42, %v1835_v57 }
 0x194   : > { %v5868_v24 = vunpack.i.l.bf16 %v5867_v34  ;;  %v5869_v36 = vunpack.i.h.bf16 %v5867_v34  ;;  %v2417_v35 = vadd.f32 %v2416_v41, %v2354_v39  ;;  %v1435_v34 = vadd.f32 %v5151_v52, %v920_v9 }
 0x195   : > { %v2285_v51 = vadd.f32 %v2284_v43, %v7355_v58 }
 0x196   : > { %v1772_v17 = vmul.f32 %v5868_v24, %v6358_v27  ;;  %v1773_v29 = vmul.f32 %v5869_v36, %v6358_v27  ;;  %v5890_v24 = vpop.permute.xlu0 %5889  ;;  %v2418_v13 = vadd.f32 %v2417_v35, %v2355_v14  ;;  %v2356_v36 = vmul.f32 %v7363_v25, %v7363_v25 }
 0x197   : > { %v5892_v52 = vunpack.i.h.bf16 %v5890_v24  ;;  %v5891_v9 = vunpack.i.l.bf16 %v5890_v24 }
 0x198   : > { %v5873_v59 = vpop.permute.xlu1 %5872  ;;  %v1836_v37 = vadd.f32 %v1772_v17, %v1432_v20  ;;  %v1837_v41 = vadd.f32 %v1773_v29, %v1435_v34  ;;  %v5155_v20 = vpop.f32.mrf.mxu1 }
 0x199   : > { %v5874_v54 = vunpack.i.l.bf16 %v5873_v59  ;;  %v5875_v33 = vunpack.i.h.bf16 %v5873_v59  ;;  %v2286_v59 = vadd.f32 %v2285_v51, %v7363_v25  ;;  %v924_v58 = vmul.f32 %v5892_v52, %v6374_v63 }
 0x19a   : > { %v7367_v32 = vadd.f32 %v2160_v15, %v1836_v37  ;;  %v2419_v37 = vadd.f32 %v2418_v13, %v2356_v36  ;;  %v7379_v35 = vadd.f32 %v2161_v55, %v1837_v41  ;;  %v1442_v53 = vpop.f32.mrf.mxu1  ;;  %v923_v51 = vmul.f32 %v5891_v9, %v6374_v63 }
 0x19b   : > { %v921_v17 = vmul.f32 %v5874_v54, %v6374_v63  ;;  %v922_v15 = vmul.f32 %v5875_v33, %v6374_v63  ;;  %v1451_v63 = vadd.f32 %v5155_v20, %v924_v58 }
 0x19c   : > { %v2357_v42 = vmul.f32 %v7367_v32, %v7367_v32  ;;  %v2287_v34 = vadd.f32 %v2286_v59, %v7367_v32  ;;  %v1448_v9 = vadd.f32 %v7352_v40, %v923_v51 }
 0x19d   : > { %v5884_v7 = vpop.permute.xlu1 %5883  ;;  %v1440_v29 = vadd.f32 %v1439_v23, %v921_v17  ;;  %v1443_v33 = vadd.f32 %v1442_v53, %v922_v15  ;;  %v2358_v23 = vmul.f32 %v7379_v35, %v7379_v35 }
 0x19e   : > { %v5885_v62 = vunpack.i.l.bf16 %v5884_v7  ;;  %v5886_v57 = vunpack.i.h.bf16 %v5884_v7  ;;  %v2420_v24 = vadd.f32 %v2419_v37, %v2357_v42 }
 0x1a0   : > { %v1774_v39 = vmul.f32 %v5885_v62, %v6358_v27  ;;  %v1775_v7 = vmul.f32 %v5886_v57, %v6358_v27  ;;  %v2092_v62 = vpop.permute.xlu0 %2091  ;;  %v2288_v57 = vadd.f32 %v2287_v34, %v7379_v35  ;;  %v2421_v59 = vadd.f32 %v2420_v24, %v2358_v23 }
 0x1a1   : > { %v2164_v36 = vmul.f32 %v6354_v26, %v2092_v62 }
 0x1a2   : > { %v5896_v43 = vpop.permute.xlu1 %5895  ;;  %v1838_v8 = vadd.f32 %v1774_v39, %v1440_v29  ;;  %v1839_v52 = vadd.f32 %v1775_v7, %v1443_v33 }
 0x1a3   : > { %v5898_v54 = vunpack.i.h.bf16 %v5896_v43  ;;  %v5897_v14 = vunpack.i.l.bf16 %v5896_v43 }
 0x1a5   : > { %v2162_v13 = vmul.f32 %v5897_v14, %v6354_v26  ;;  %v2163_v41 = vmul.f32 %v5898_v54, %v6354_v26 }
 0x1a7   : > { %v7389_v55 = vadd.f32 %v2162_v13, %v1838_v8  ;;  %v5902_v17 = vpop.permute.xlu1 %5901  ;;  %v7396_v15 = vadd.f32 %v2163_v41, %v1839_v52 }
 0x1a8   : > { %v5904_v42 = vunpack.i.h.bf16 %v5902_v17  ;;  %v5903_v39 = vunpack.i.l.bf16 %v5902_v17 }
 0x1a9   : > { %v2359_v37 = vmul.f32 %v7389_v55, %v7389_v55  ;;  %v2289_v8 = vadd.f32 %v2288_v57, %v7389_v55  ;;  %v2360_v40 = vmul.f32 %v7396_v15, %v7396_v15 }
 0x1aa   : > { %v1777_v43 = vmul.f32 %v5904_v42, %v6358_v27  ;;  %v1776_v29 = vmul.f32 %v5903_v39, %v6358_v27 }
 0x1ab   : > { %v2422_v53 = vadd.f32 %v2421_v59, %v2359_v37  ;;  %v2290_v20 = vadd.f32 %v2289_v8, %v7396_v15 }
 0x1ac   : > { %v1840_v54 = vadd.f32 %v1776_v29, %v1448_v9  ;;  %v2096_v14 = vpop.permute.xlu1 %2095  ;;  %v1841_v34 = vadd.f32 %v1777_v43, %v1451_v63 }
 0x1ad   : > { %v2165_v7 = vmul.f32 %v6354_v26, %v2096_v14  ;;  %v2423_v13 = vadd.f32 %v2422_v53, %v2360_v40 }
 0x1ae   : > { %v2228_v58 = vadd.f32 %v2164_v36, %v1840_v54 }
 0x1af   : > { %v2229_v62 = vadd.f32 %v2165_v7, %v1841_v34  ;;  %v456_v7 = vld [vmem:[%s9374_s5] sm:$0x3f] }
 0x1b0   : > { %v2291_v24 = vadd.f32 %v2290_v20, %v2228_v58  ;;  %v2361_v51 = vmul.f32 %v2228_v58, %v2228_v58 }
 0x1b1   : > { %v2362_v33 = vmul.f32 %v2229_v62, %v2229_v62 }
 0x1b2   : > { %v2424_v41 = vadd.f32 %v2423_v13, %v2361_v51  ;;  %v2292_v23 = vadd.f32 %v2291_v24, %v2229_v62  ;;  %v9571_v51 = vld [vmem:[#allocation8_spill] sm:$0xff] }
 0x1b3   : > { %v9572_v13 = vsub.s32 0, %v9571_v51 }
 0x1b4   : > { %v2293_v27 = vrot.slane %v2292_v23, 4  ;;  %v2425_v17 = vadd.f32 %v2424_v41, %v2362_v33 }
 0x1b6   : > { %v2294_v57 = vadd.f32 %v2293_v27, %v2292_v23  ;;  %v2426_v52 = vrot.slane %v2425_v17, 4 }
 0x1b8   : > { %v2295_v42 = vrot.slane %v2294_v57, 2  ;;  %v2427_v39 = vadd.f32 %v2426_v52, %v2425_v17 }
 0x1ba   : > { %v2296_v26 = vadd.f32 %v2295_v42, %v2294_v57  ;;  %v2428_v59 = vrot.slane %v2427_v39, 2  ;;  %v9573_v42 = vld [vmem:[#allocation24_spill] sm:$0xff] }
 0x1bc   : > { %v2297_v63 = vrot.slane %v2296_v26, 1  ;;  %v2429_v9 = vadd.f32 %v2428_v59, %v2427_v39 }
 0x1be   : > { %v2298_v36 = vadd.f32 %v2297_v63, %v2296_v26  ;;  %v2430_v37 = vrot.slane %v2429_v9, 1  ;;  %v9574_v26 = vsub.s32 1, %v9571_v51  ;;  %v9575_v63 = vld [vmem:[#allocation26_spill] sm:$0xff] }
 0x1c0   : > { %v2431_v8 = vadd.f32 %v2430_v37, %v2429_v9  ;;  %v2432_v43 = vmul.f32 0.001953125, %v2298_v36 }
 0x1c2   : > { %v2433_v29 = vmul.f32 0.001953125, %v2431_v8  ;;  %v2434_v54 = vmul.f32 %v2432_v43, %v2432_v43 }
 0x1c4   : > { %v2435_v53 = vsub.f32 %v2433_v29, %v2434_v54 }
 0x1c6   : > { %v2436_v14 = vmax.f32 %v2435_v53, 0.0 }
 0x1c8   : > { %v2437_v34 = vadd.f32 1e-05, %v2436_v14 }
 0x1ca   : > { %5971 = vrsqrt.f32 %v2437_v34 }
 0x1d7   : > { %v5972_v40 = vpop.eup %5971 }
 0x1d8   : > { %v2439_v20 = vmul.f32 %v5972_v40, %v456_v7 }
 0x1da   : > { %v2440_v24 = vmul.f32 %v2439_v20, %v2432_v43  ;;  %v7410_v33 = vrot.slane %v2439_v20, %v9572_v13 }
 0x1dc   : > { %v2442_v41 = vrot.slane %v2440_v24, 7  ;;  %v7413_v23 = vmul.f32 %v7410_v33, %v2229_v62  ;;  %v7416_v27 = vmul.f32 %v7410_v33, %v2228_v58  ;;  %v2451_v57 = vmul.f32 %v7410_v33, %v6614_v45 }
 0x1dd   : > { %v2452_v52 = vmul.f32 %v7410_v33, %v6626_v6  ;;  %v2449_v39 = vmul.f32 %v7410_v33, %v9573_v42  ;;  %v2450_v62 = vmul.f32 %v7410_v33, %v9575_v63  ;;  %v2453_v58 = vmul.f32 %v7410_v33, %v6648_v61 }
 0x1de   : > { %v2444_v17 = vsub.f32 %v456_v7, %v2442_v41  ;;  %v2454_v9 = vmul.f32 %v7410_v33, %v6677_v11  ;;  %v2455_v45 = vmul.f32 %v7410_v33, %v6674_v0  ;;  %v2456_v6 = vmul.f32 %v7410_v33, %v6682_v31 }
 0x1df   : > { %v2457_v36 = vmul.f32 %v7410_v33, %v6704_v22  ;;  %v2458_v37 = vmul.f32 %v7410_v33, %v6721_v49  ;;  %v2460_v42 = vmul.f32 %v7410_v33, %v6709_v1  ;;  %v2461_v63 = vmul.f32 %v7410_v33, %v6752_v30 }
 0x1e0   : > { %v7426_v59 = vrot.slane %v2444_v17, %v9574_v26  ;;  %v2466_v1 = vmul.f32 %v7410_v33, %v6824_v48 }
 0x1e2   : > { %v2519_v8 = vadd.f32 %v7426_v59, %v2451_v57  ;;  %v2520_v43 = vadd.f32 %v7426_v59, %v2452_v52  ;;  %v2517_v61 = vadd.f32 %v7426_v59, %v2449_v39  ;;  %v2518_v11 = vadd.f32 %v7426_v59, %v2450_v62 }
 0x1e3   : > { %v2521_v29 = vadd.f32 %v7426_v59, %v2453_v58  ;;  %v2522_v0 = vadd.f32 %v7426_v59, %v2454_v9  ;;  %v2523_v31 = vadd.f32 %v7426_v59, %v2455_v45  ;;  %v2524_v54 = vadd.f32 %v7426_v59, %v2456_v6 }
 0x1e4   : > { %v2583_v22 = vmax.f32 %v2519_v8, 0.0  ;;  %v2584_v53 = vmax.f32 %v2520_v43, 0.0  ;;  %v2581_v14 = vmax.f32 %v2517_v61, 0.0  ;;  %v2582_v49 = vmax.f32 %v2518_v11, 0.0  ;;  %v9576_v8 = vld [vmem:[#allocation2_spill] sm:$0xff]  ;;  %v9577_v43 = vld [vmem:[#allocation20_spill] sm:$0xff] }
 0x1e5   : > { %v2585_v34 = vmax.f32 %v2521_v29, 0.0  ;;  %v2586_v7 = vmax.f32 %v2522_v0, 0.0  ;;  %v2525_v24 = vadd.f32 %v7426_v59, %v2457_v36  ;;  %v2526_v13 = vadd.f32 %v7426_v59, %v2458_v37  ;;  %v9578_v11 = vld [vmem:[#allocation18_spill] sm:$0xff] }
 0x1e6   : > { %v2645_v40 = vpack.c.bf16 %v2582_v49, %v2581_v14  ;;  %v2646_v20 = vpack.c.bf16 %v2584_v53, %v2583_v22  ;;  %v2587_v17 = vmax.f32 %v2523_v31, 0.0  ;;  %v2588_v57 = vmax.f32 %v2524_v54, 0.0  ;;  %v9579_v54 = vld [vmem:[#allocation13_spill] sm:$0xff] }
 0x1e7   : > { %v2647_v41 = vpack.c.bf16 %v2586_v7, %v2585_v34  ;;  %v2459_v52 = vmul.f32 %v7410_v33, %v6690_v4  ;;  %v2589_v39 = vmax.f32 %v2525_v24, 0.0  ;;  %v2590_v26 = vmax.f32 %v2526_v13, 0.0 }
 0x1e8   : > { %5172 = vmatprep.mubr.bf16.mxu1 %v2645_v40  ;;  %v2462_v62 = vmul.f32 %v7410_v33, %v6771_v38  ;;  %v2463_v58 = vmul.f32 %v7410_v33, %v6768_v28  ;;  %v2464_v9 = vmul.f32 %v7410_v33, %v6786_v16  ;;  %v2465_v4 = vmul.f32 %v7410_v33, %v6800_v2 }
 0x1e9   : > { %5173 = vmatmul.mubr.bf16.vlgmr.msra.gmra.mxu1 %v2646_v20  ;;  %v2648_v45 = vpack.c.bf16 %v2588_v57, %v2587_v17  ;;  %v2527_v6 = vadd.f32 %v7426_v59, %v2459_v52  ;;  %v2528_v30 = vadd.f32 %v7426_v59, %v2460_v42  ;;  %v2467_v38 = vmul.f32 %v7410_v33, %v6815_v46  ;;  %v9580_v20 = vld [vmem:[#allocation19_spill] sm:$0xff] }
 0x1ea   : > { %5176 = vmatprep.mubr.bf16.mxu1 %v2647_v41  ;;  %v2529_v36 = vadd.f32 %v7426_v59, %v2461_v63  ;;  %v2530_v28 = vadd.f32 %v7426_v59, %v2462_v62  ;;  %v2531_v16 = vadd.f32 %v7426_v59, %v2463_v58  ;;  %v2532_v37 = vadd.f32 %v7426_v59, %v2464_v9 }
 0x1eb   : > { %v2649_v2 = vpack.c.bf16 %v2590_v26, %v2589_v39  ;;  %v2468_v48 = vmul.f32 %v7410_v33, %v9576_v8  ;;  %v2469_v61 = vmul.f32 %v7410_v33, %v9577_v43  ;;  %v2470_v29 = vmul.f32 %v7410_v33, %v9578_v11 }
 0x1ec   : > { %v2533_v46 = vadd.f32 %v7426_v59, %v2465_v4  ;;  %v2534_v0 = vadd.f32 %v7426_v59, %v2466_v1  ;;  %v2471_v31 = vmul.f32 %v7410_v33, %v6865_v18  ;;  %v2472_v22 = vmul.f32 %v7410_v33, %v9579_v54  ;;  %v9581_v18 = vld [vmem:[#allocation3_spill] sm:$0xff] }
 0x1ed   : > { %v2535_v53 = vadd.f32 %v7426_v59, %v2467_v38  ;;  %v2536_v14 = vadd.f32 %v7426_v59, %v2468_v48  ;;  %v2537_v49 = vadd.f32 %v7426_v59, %v2469_v61  ;;  %v2538_v34 = vadd.f32 %v7426_v59, %v2470_v29  ;;  %v9583_v61 = vld [vmem:[#allocation22_spill] sm:$0xff]  ;;  %v9584_v29 = vld [vmem:[#allocation9_spill] sm:$0xff] }
 0x1ee   : > { %v2539_v7 = vadd.f32 %v7426_v59, %v2471_v31  ;;  %v2540_v40 = vadd.f32 %v7426_v59, %v2472_v22  ;;  %v2473_v24 = vmul.f32 %v7410_v33, %v9580_v20  ;;  %v2474_v13 = vmul.f32 %v7410_v33, %v9581_v18  ;;  %v9585_v22 = vld [vmem:[#allocation25_spill] sm:$0xff] }
 0x1ef   : > { %v2591_v41 = vmax.f32 %v2527_v6, 0.0  ;;  %v2592_v17 = vmax.f32 %v2528_v30, 0.0  ;;  %v2593_v57 = vmax.f32 %v2529_v36, 0.0  ;;  %v2594_v52 = vmax.f32 %v2530_v28, 0.0  ;;  %v9582_v28 = vld [vmem:[#allocation23_spill] sm:$0xff] }
 0x1f0   : > { %v2595_v42 = vmax.f32 %v2531_v16, 0.0  ;;  %v2596_v39 = vmax.f32 %v2532_v37, 0.0  ;;  %v2541_v26 = vadd.f32 %v7426_v59, %v2473_v24  ;;  %v2542_v63 = vadd.f32 %v7426_v59, %v2474_v13  ;;  %v9588_v13 = vld [vmem:[#allocation16_spill] sm:$0xff] }
 0x1f1   : > { %5177 = vmatmul.mubr.bf16.gmra.mxu1 %v2648_v45  ;;  %v2597_v62 = vmax.f32 %v2533_v46, 0.0  ;;  %v2598_v58 = vmax.f32 %v2534_v0, 0.0  ;;  %v2599_v9 = vmax.f32 %v2535_v53, 0.0  ;;  %v2600_v4 = vmax.f32 %v2536_v14, 0.0 }
 0x1f2   : > { %5180 = vmatprep.mubr.bf16.mxu1 %v2649_v2  ;;  %v2601_v1 = vmax.f32 %v2537_v49, 0.0  ;;  %v2602_v45 = vmax.f32 %v2538_v34, 0.0  ;;  %v2603_v38 = vmax.f32 %v2539_v7, 0.0  ;;  %v2604_v8 = vmax.f32 %v2540_v40, 0.0  ;;  %v9586_v49 = vld [vmem:[#allocation4_spill] sm:$0xff]  ;;  %v9587_v7 = vld [vmem:[#allocation11_spill] sm:$0xff] }
 0x1f3   : > { %v2650_v48 = vpack.c.bf16 %v2592_v17, %v2591_v41  ;;  %v2651_v2 = vpack.c.bf16 %v2594_v52, %v2593_v57  ;;  %v2652_v6 = vpack.c.bf16 %v2596_v39, %v2595_v42  ;;  %v2605_v30 = vmax.f32 %v2541_v26, 0.0  ;;  %v9589_v17 = vld [vmem:[#allocation7_spill] sm:$0xff] }
 0x1f4   : > { %v2606_v36 = vmax.f32 %v2542_v63, 0.0  ;;  %v2475_v16 = vmul.f32 %v7410_v33, %v9582_v28  ;;  %v2653_v37 = vpack.c.bf16 %v2598_v58, %v2597_v62  ;;  %v7502_v43 = vpack.c.bf16 %v2600_v4, %v2599_v9  ;;  %v9590_v9 = vld [vmem:[#allocation10_spill] sm:$0xff] }
 0x1f5   : > { %v2476_v11 = vmul.f32 %v7410_v33, %v9583_v61  ;;  %v2483_v46 = vmul.f32 %v7410_v33, %v9584_v29  ;;  %v7508_v0 = vpack.c.bf16 %v2602_v45, %v2601_v1  ;;  %v7510_v31 = vpack.c.bf16 %v2604_v8, %v2603_v38 }
 0x1f6   : > { %v7513_v54 = vadd.f32 %v7426_v59, %v2475_v16  ;;  %v2477_v53 = vmul.f32 %v7410_v33, %v9585_v22  ;;  %v2478_v34 = vmul.f32 %v7410_v33, %v9586_v49  ;;  %v2484_v40 = vmul.f32 %v7410_v33, %v9587_v7  ;;  %v9592_v49 = vld [vmem:[#allocation5_spill] sm:$0xff]  ;;  %v9593_v7 = vld [vmem:[#allocation12_spill] sm:$0xff] }
 0x1f7   : > { %v7518_v14 = vadd.f32 %v7426_v59, %v2476_v11  ;;  %v2551_v20 = vadd.f32 %v7426_v59, %v2483_v46  ;;  %v7525_v24 = vpack.c.bf16 %v2606_v36, %v2605_v30  ;;  %v2485_v41 = vmul.f32 %v7410_v33, %v9588_v13  ;;  %v9594_v13 = vld [vmem:[#allocation17_spill] sm:$0xff] }
 0x1f8   : > { %v7528_v18 = vadd.f32 %v7426_v59, %v2477_v53  ;;  %v2486_v57 = vmul.f32 %v7410_v33, %v9589_v17  ;;  %v2552_v52 = vadd.f32 %v7426_v59, %v2484_v40  ;;  %v2487_v39 = vmul.f32 %v7410_v33, %v7125_v10  ;;  %v9595_v17 = vld [vmem:[#allocation28_spill] sm:$0xff] }
 0x1f9   : > { %5181 = vmatmul.mubr.bf16.gmra.mxu1 %v2650_v48  ;;  %v2615_v42 = vmax.f32 %v2551_v20, 0.0  ;;  %v2488_v26 = vmul.f32 %v7410_v33, %v7153_v19  ;;  %v7540_v63 = vadd.f32 %v7426_v59, %v2478_v34  ;;  %v2553_v62 = vadd.f32 %v7426_v59, %v2485_v41 }
 0x1fa   : > { %5184 = vmatprep.mubr.bf16.mxu1 %v2651_v2  ;;  %v2554_v58 = vadd.f32 %v7426_v59, %v2486_v57  ;;  %v2489_v4 = vmul.f32 %v7410_v33, %v9590_v9  ;;  %v2616_v1 = vmax.f32 %v2552_v52, 0.0  ;;  %v2555_v45 = vadd.f32 %v7426_v59, %v2487_v39  ;;  %v9591_v2 = vld [vmem:[#allocation6_spill] sm:$0xff] }
 0x1fb   : > { %v2556_v38 = vadd.f32 %v7426_v59, %v2488_v26  ;;  %v2490_v10 = vmul.f32 %v7410_v33, %v7183_v44  ;;  %v2617_v8 = vmax.f32 %v2553_v62, 0.0  ;;  %v2491_v30 = vmul.f32 %v7410_v33, %v9591_v2 }
 0x1fc   : > { %v2618_v19 = vmax.f32 %v2554_v58, 0.0  ;;  %v2557_v48 = vadd.f32 %v7426_v59, %v2489_v4  ;;  %v7553_v36 = vpack.c.bf16 %v2616_v1, %v2615_v42  ;;  %v2619_v28 = vmax.f32 %v2555_v45, 0.0 }
 0x1fd   : > { %v2620_v16 = vmax.f32 %v2556_v38, 0.0  ;;  %v2558_v61 = vadd.f32 %v7426_v59, %v2490_v10  ;;  %v2492_v44 = vmul.f32 %v7410_v33, %v7215_v47  ;;  %v2559_v46 = vadd.f32 %v7426_v59, %v2491_v30 }
 0x1fe   : > { %v7556_v11 = vpack.c.bf16 %v2618_v19, %v2617_v8  ;;  %v2621_v29 = vmax.f32 %v2557_v48, 0.0  ;;  %v2493_v34 = vmul.f32 %v7410_v33, %v9592_v49  ;;  %v2494_v40 = vmul.f32 %v7410_v33, %v9593_v7  ;;  %v9597_v49 = vld [vmem:[#allocation30_spill] sm:$0xff] }
 0x1ff   : > { %v7561_v22 = vpack.c.bf16 %v2620_v16, %v2619_v28  ;;  %v2622_v53 = vmax.f32 %v2558_v61, 0.0  ;;  %v2623_v20 = vmax.f32 %v2559_v46, 0.0  ;;  %v2495_v41 = vmul.f32 %v7410_v33, %v9594_v13 }
 0x200   : > { %v2496_v47 = vmul.f32 %v7410_v33, %v9595_v17  ;;  %v2562_v52 = vadd.f32 %v7426_v59, %v2494_v40  ;;  %v2497_v42 = vmul.f32 %v7410_v33, %v7270_v5  ;;  %v2498_v58 = vmul.f32 %v7410_v33, %v7293_v56 }
 0x201   : > { %5185 = vmatmul.mubr.bf16.gmra.mxu1 %v2652_v6  ;;  %v2560_v6 = vadd.f32 %v7426_v59, %v2492_v44  ;;  %v7572_v57 = vpack.c.bf16 %v2622_v53, %v2621_v29  ;;  %v2563_v26 = vadd.f32 %v7426_v59, %v2495_v41  ;;  %v2499_v45 = vmul.f32 %v7410_v33, %v7295_v3  ;;  %v9596_v44 = vld [vmem:[#allocation29_spill] sm:$0xff] }
 0x202   : > { %5188 = vmatprep.mubr.bf16.mxu1 %v2653_v37  ;;  %v2561_v37 = vadd.f32 %v7426_v59, %v2493_v34  ;;  %v2564_v62 = vadd.f32 %v7426_v59, %v2496_v47  ;;  %v2626_v4 = vmax.f32 %v2562_v52, 0.0  ;;  %v2565_v1 = vadd.f32 %v7426_v59, %v2497_v42 }
 0x203   : > { %v2624_v39 = vmax.f32 %v2560_v6, 0.0  ;;  %v2627_v10 = vmax.f32 %v2563_v26, 0.0  ;;  %v2566_v5 = vadd.f32 %v7426_v59, %v2498_v58  ;;  %v2500_v2 = vmul.f32 %v7410_v33, %v7312_v60 }
 0x204   : > { %v2625_v9 = vmax.f32 %v2561_v37, 0.0  ;;  %v2628_v8 = vmax.f32 %v2564_v62, 0.0  ;;  %v2629_v48 = vmax.f32 %v2565_v1, 0.0  ;;  %v2567_v56 = vadd.f32 %v7426_v59, %v2499_v45 }
 0x205   : > { %v7585_v38 = vpack.c.bf16 %v2624_v39, %v2623_v20  ;;  %v2630_v28 = vmax.f32 %v2566_v5, 0.0  ;;  %v2501_v3 = vmul.f32 %v7410_v33, %v7316_v12  ;;  %v2502_v16 = vmul.f32 %v7410_v33, %v7331_v21 }
 0x206   : > { %v7588_v19 = vpack.c.bf16 %v2626_v4, %v2625_v9  ;;  %v7594_v30 = vpack.c.bf16 %v2628_v8, %v2627_v10  ;;  %v2568_v61 = vadd.f32 %v7426_v59, %v2500_v2  ;;  %v2631_v29 = vmax.f32 %v2567_v56, 0.0 }
 0x207   : > { %v2503_v60 = vmul.f32 %v7410_v33, %v7333_v50  ;;  %v7606_v46 = vpack.c.bf16 %v2630_v28, %v2629_v48  ;;  %v2569_v53 = vadd.f32 %v7426_v59, %v2501_v3  ;;  %v2570_v12 = vadd.f32 %v7426_v59, %v2502_v16  ;;  %v9598_v28 = vld [vmem:[#allocation14_spill] sm:$0xff] }
 0x208   : > { %v2505_v21 = vmul.f32 %v7410_v33, %v9597_v49  ;;  %v2632_v34 = vmax.f32 %v2568_v61, 0.0  ;;  %v2506_v50 = vmul.f32 %v7410_v33, %v7363_v25  ;;  %v2507_v13 = vmul.f32 %v7410_v33, %v7367_v32 }
 0x209   : > { %5189 = vmatmul.mubr.bf16.gmra.mxu1 %v7502_v43  ;;  %v2504_v43 = vmul.f32 %v7410_v33, %v9596_v44  ;;  %v2633_v40 = vmax.f32 %v2569_v53, 0.0  ;;  %v2634_v6 = vmax.f32 %v2570_v12, 0.0  ;;  %v2508_v39 = vmul.f32 %v7410_v33, %v7379_v35 }
 0x20a   : > { %5192 = vmatprep.mubr.bf16.mxu1 %v7508_v0  ;;  %v2571_v0 = vadd.f32 %v7426_v59, %v2503_v60  ;;  %v2573_v20 = vadd.f32 %v7426_v59, %v2505_v21  ;;  %v2670_v41 = vpack.c.bf16 %v2632_v34, %v2631_v29  ;;  %v2574_v37 = vadd.f32 %v7426_v59, %v2506_v50  ;;  %v9600_v29 = vld [vmem:[#allocation27_spill] sm:$0xff] }
 0x20b   : > { %v2572_v7 = vadd.f32 %v7426_v59, %v2504_v43  ;;  %v2671_v52 = vpack.c.bf16 %v2634_v6, %v2633_v40  ;;  %v2575_v26 = vadd.f32 %v7426_v59, %v2507_v13  ;;  %v2509_v58 = vmul.f32 %v7410_v33, %v7389_v55  ;;  %v9601_v60 = vld [vmem:[#allocation15_spill] sm:$0xff] }
 0x20c   : > { %v2635_v17 = vmax.f32 %v2571_v0, 0.0  ;;  %v2637_v42 = vmax.f32 %v2573_v20, 0.0  ;;  %v2638_v62 = vmax.f32 %v2574_v37, 0.0  ;;  %v2510_v32 = vmul.f32 %v7410_v33, %v7396_v15 }
 0x20d   : > { %v2636_v47 = vmax.f32 %v2572_v7, 0.0  ;;  %v2576_v9 = vadd.f32 %v7426_v59, %v2508_v39  ;;  %v2639_v4 = vmax.f32 %v2575_v26, 0.0  ;;  %v2579_v1 = vadd.f32 %v7426_v59, %v7416_v27 }
 0x20e   : > { %v2580_v35 = vadd.f32 %v7426_v59, %v7413_v23  ;;  %v2607_v45 = vmax.f32 %v7513_v54, 0.0  ;;  %v2673_v10 = vpack.c.bf16 %v2638_v62, %v2637_v42  ;;  %v2577_v55 = vadd.f32 %v7426_v59, %v2509_v58  ;;  %v9599_v54 = vld [vmem:[#allocation21_spill] sm:$0xff] }
 0x20f   : > { %v2672_v25 = vpack.c.bf16 %v2636_v47, %v2635_v17  ;;  %v2578_v15 = vadd.f32 %v7426_v59, %v2510_v32  ;;  %v2640_v8 = vmax.f32 %v2576_v9, 0.0  ;;  %v2643_v5 = vmax.f32 %v2579_v1, 0.0 }
 0x210   : > { %v2644_v48 = vmax.f32 %v2580_v35, 0.0  ;;  %v2609_v2 = vmax.f32 %v7528_v18, 0.0  ;;  %v2610_v27 = vmax.f32 %v7540_v63, 0.0  ;;  %v2641_v56 = vmax.f32 %v2577_v55, 0.0 }
 0x211   : > { %5193 = vmatmul.mubr.bf16.gmra.mxu1 %v7510_v31  ;;  %v2608_v31 = vmax.f32 %v7518_v14, 0.0  ;;  %v2642_v23 = vmax.f32 %v2578_v15, 0.0  ;;  %v2480_v3 = vmul.f32 %v7410_v33, %v9599_v54  ;;  %v2674_v16 = vpack.c.bf16 %v2640_v8, %v2639_v4 }
 0x212   : > { %5196 = vmatprep.mubr.bf16.mxu1 %v7525_v24  ;;  %v2479_v24 = vmul.f32 %v7410_v33, %v9598_v28  ;;  %v2676_v61 = vpack.c.bf16 %v2644_v48, %v2643_v5  ;;  %v2481_v14 = vmul.f32 %v7410_v33, %v9600_v29  ;;  %v2482_v44 = vmul.f32 %v7410_v33, %v9601_v60  ;;  %v5955_v33 = vld [vmem:[%s9373_s4 + $0x78] sm:$0xff]  }
 0x213   : > { %v2675_v43 = vpack.c.bf16 %v2642_v23, %v2641_v56  ;;  %v2658_v18 = vpack.c.bf16 %v2608_v31, %v2607_v45  ;;  %v2548_v53 = vadd.f32 %v7426_v59, %v2480_v3  ;;  %v2659_v12 = vpack.c.bf16 %v2610_v27, %v2609_v2  ;;  %5236 = vmatprep.subr.bf16.mxu0 %v5955_v33 }
 0x214   : > { %v2547_v63 = vadd.f32 %v7426_v59, %v2479_v24  ;;  %v2549_v49 = vadd.f32 %v7426_v59, %v2481_v14  ;;  %v2550_v21 = vadd.f32 %v7426_v59, %v2482_v44  ;;  %5237 = vmatpush3.bf16.msra.mxu0 %v5955_v33  ;;  %v5956_v59 = vld [vmem:[%s9373_s4 + $0x70] sm:$0xff]  }
 0x215   : > { %v2612_v0 = vmax.f32 %v2548_v53, 0.0  ;;  %5238 = vmatprep.subr.bf16.mxu0 %v5956_v59 }
 0x216   : > { %v2611_v34 = vmax.f32 %v2547_v63, 0.0  ;;  %v2613_v7 = vmax.f32 %v2549_v49, 0.0  ;;  %v2614_v50 = vmax.f32 %v2550_v21, 0.0 }
 0x218   : > { %v2660_v40 = vpack.c.bf16 %v2612_v0, %v2611_v34  ;;  %v2661_v6 = vpack.c.bf16 %v2614_v50, %v2613_v7  ;;  %5239 = vmatpush3.bf16.msra.mxu0 %v5956_v59 }
 0x219   : > { %5197 = vmatmul.mubr.bf16.gmra.mxu1 %v2658_v18 }
 0x21a   : > { %5200 = vmatprep.mubr.bf16.mxu1 %v2659_v12 }
 0x221   : > { %5201 = vmatmul.mubr.bf16.gmra.mxu1 %v2660_v40 }
 0x222   : > { %5204 = vmatprep.mubr.bf16.mxu1 %v2661_v6 }
 0x229   : > { %5205 = vmatmul.mubr.bf16.gmra.mxu1 %v7553_v36 }
 0x22a   : > { %5208 = vmatprep.mubr.bf16.mxu1 %v7556_v11 }
 0x231   : > { %5209 = vmatmul.mubr.bf16.gmra.mxu1 %v7561_v22 }
 0x232   : > { %5212 = vmatprep.mubr.bf16.mxu1 %v7572_v57 }
 0x239   : > { %5213 = vmatmul.mubr.bf16.gmra.mxu1 %v7585_v38 }
 0x23a   : > { %5216 = vmatprep.mubr.bf16.mxu1 %v7588_v19 }
 0x241   : > { %5217 = vmatmul.mubr.bf16.gmra.mxu1 %v7594_v30 }
 0x242   : > { %5220 = vmatprep.mubr.bf16.mxu1 %v7606_v46 }
 0x249   : > { %5221 = vmatmul.mubr.bf16.gmra.mxu1 %v2670_v41 }
 0x24a   : > { %5224 = vmatprep.mubr.bf16.mxu1 %v2671_v52 }
 0x251   : > { %5225 = vmatmul.mubr.bf16.gmra.mxu1 %v2672_v25 }
 0x252   : > { %5228 = vmatprep.mubr.bf16.mxu1 %v2673_v10 }
 0x259   : > { %5229 = vmatmul.mubr.bf16.gmra.mxu1 %v2674_v16 }
 0x25a   : > { %5232 = vmatprep.mubr.bf16.mxu1 %v2675_v43 }
 0x261   : > { %5233 = vmatmul.mubr.bf16.gmra.mxu1 %v2676_v61 }
 0x2a9   : > { %v7666_v36 = vpop.f32.mrf.mxu1 }
 0x2aa   : > { %v3101_v20 = vmul.f32 %v7666_v36, %v7666_v36 }
 0x2ab   : > { %v7668_v11 = vpop.f32.mrf.mxu1 }
 0x2ac   : > { %v3099_v38 = vmul.f32 %v7668_v11, %v7668_v11 }
 0x2ad   : > { %v7670_v22 = vpop.f32.mrf.mxu1 }
 0x2ae   : > { %v3102_v47 = vmul.f32 %v7670_v22, %v7670_v22 }
 0x2af   : > { %v7672_v57 = vpop.f32.mrf.mxu1 }
 0x2b0   : > { %v3030_v19 = vadd.f32 %v7672_v57, %v7668_v11  ;;  %v3100_v30 = vmul.f32 %v7672_v57, %v7672_v57 }
 0x2b1   : > { %v7680_v46 = vpop.f32.mrf.mxu1 }
 0x2b2   : > { %v3031_v13 = vadd.f32 %v7666_v36, %v3030_v19  ;;  %v3163_v41 = vadd.f32 %v3100_v30, %v3099_v38  ;;  %v3105_v1 = vmul.f32 %v7680_v46, %v7680_v46 }
 0x2b3   : > { %v7685_v17 = vpop.f32.mrf.mxu1 }
 0x2b4   : > { %v3164_v37 = vadd.f32 %v3163_v41, %v3101_v20  ;;  %v3032_v52 = vadd.f32 %v7670_v22, %v3031_v13  ;;  %v3103_v26 = vmul.f32 %v7685_v17, %v7685_v17 }
 0x2b5   : > { %v7690_v42 = vpop.f32.mrf.mxu1 }
 0x2b6   : > { %v3033_v39 = vadd.f32 %v3032_v52, %v7685_v17  ;;  %v3165_v25 = vadd.f32 %v3164_v37, %v3102_v47  ;;  %v3106_v55 = vmul.f32 %v7690_v42, %v7690_v42 }
 0x2b7   : > { %v7695_v62 = vpop.f32.mrf.mxu1 }
 0x2b8   : > { %v3166_v58 = vadd.f32 %v3165_v25, %v3103_v26  ;;  %v3034_v32 = vadd.f32 %v3033_v39, %v7695_v62  ;;  %v3104_v9 = vmul.f32 %v7695_v62, %v7695_v62 }
 0x2b9   : > { %v7700_v4 = vpop.f32.mrf.mxu1 }
 0x2ba   : > { %9602 = vst [vmem:[#allocation8_spill] sm:$0xff] %v7700_v4  ;;  %v3035_v35 = vadd.f32 %v7680_v46, %v3034_v32  ;;  %v3167_v45 = vadd.f32 %v3166_v58, %v3104_v9  ;;  %v3109_v54 = vmul.f32 %v7700_v4, %v7700_v4 }
 0x2bb   : > { %v7705_v10 = vpop.f32.mrf.mxu1 }
 0x2bc   : > { %v3168_v15 = vadd.f32 %v3167_v45, %v3105_v1  ;;  %v3036_v31 = vadd.f32 %v7690_v42, %v3035_v35  ;;  %v3107_v48 = vmul.f32 %v7705_v10, %v7705_v10 }
 0x2bd   : > { %v7710_v8 = vpop.f32.mrf.mxu1 }
 0x2be   : > { %9603 = vst [vmem:[#allocation24_spill] sm:$0xff] %v7710_v8  ;;  %v3037_v5 = vadd.f32 %v3036_v31, %v7705_v10  ;;  %v3169_v2 = vadd.f32 %v3168_v15, %v3106_v55  ;;  %v3110_v29 = vmul.f32 %v7710_v8, %v7710_v8 }
 0x2bf   : > { %v7715_v27 = vpop.f32.mrf.mxu1 }
 0x2c0   : > { %9604 = vst [vmem:[#allocation26_spill] sm:$0xff] %v7715_v27  ;;  %v3170_v56 = vadd.f32 %v3169_v2, %v3107_v48  ;;  %v3038_v23 = vadd.f32 %v3037_v5, %v7715_v27  ;;  %v3108_v28 = vmul.f32 %v7715_v27, %v7715_v27 }
 0x2c1   : > { %v7720_v24 = vpop.f32.mrf.mxu1 }
 0x2c2   : > { %9605 = vst [vmem:[#allocation2_spill] sm:$0xff] %v7720_v24  ;;  %v3039_v3 = vadd.f32 %v7700_v4, %v3038_v23  ;;  %v3171_v16 = vadd.f32 %v3170_v56, %v3108_v28  ;;  %v3113_v0 = vmul.f32 %v7720_v24, %v7720_v24 }
 0x2c3   : > { %v7725_v61 = vpop.f32.mrf.mxu1 }
 0x2c4   : > { %9606 = vst [vmem:[#allocation20_spill] sm:$0xff] %v7725_v61  ;;  %v3172_v14 = vadd.f32 %v3171_v16, %v3109_v54  ;;  %v3040_v60 = vadd.f32 %v7710_v8, %v3039_v3  ;;  %v3111_v18 = vmul.f32 %v7725_v61, %v7725_v61 }
 0x2c5   : > { %v7730_v44 = vpop.f32.mrf.mxu1 }
 0x2c6   : > { %9607 = vst [vmem:[#allocation18_spill] sm:$0xff] %v7730_v44  ;;  %v3041_v43 = vadd.f32 %v3040_v60, %v7725_v61  ;;  %v3173_v63 = vadd.f32 %v3172_v14, %v3110_v29  ;;  %v3114_v6 = vmul.f32 %v7730_v44, %v7730_v44 }
 0x2c7   : > { %v7735_v53 = vpop.f32.mrf.mxu1 }
 0x2c8   : > { %9608 = vst [vmem:[#allocation13_spill] sm:$0xff] %v7735_v53  ;;  %v3174_v12 = vadd.f32 %v3173_v63, %v3111_v18  ;;  %v3042_v49 = vadd.f32 %v3041_v43, %v7735_v53  ;;  %v3112_v21 = vmul.f32 %v7735_v53, %v7735_v53 }
 0x2c9   : > { %v7740_v34 = vpop.f32.mrf.mxu1 }
 0x2ca   : > { %9609 = vst [vmem:[#allocation19_spill] sm:$0xff] %v7740_v34  ;;  %v3043_v7 = vadd.f32 %v7720_v24, %v3042_v49  ;;  %v3175_v50 = vadd.f32 %v3174_v12, %v3112_v21  ;;  %v3117_v39 = vmul.f32 %v7740_v34, %v7740_v34 }
 0x2cb   : > { %v7745_v40 = vpop.f32.mrf.mxu1 }
 0x2cc   : > { %9610 = vst [vmem:[#allocation3_spill] sm:$0xff] %v7745_v40  ;;  %v3176_v33 = vadd.f32 %v3175_v50, %v3113_v0  ;;  %v3044_v59 = vadd.f32 %v7730_v44, %v3043_v7  ;;  %v3115_v30 = vmul.f32 %v7745_v40, %v7745_v40 }
 0x2cd   : > { %v7750_v38 = vpop.f32.mrf.mxu1 }
 0x2ce   : > { %9611 = vst [vmem:[#allocation23_spill] sm:$0xff] %v7750_v38  ;;  %v3045_v19 = vadd.f32 %v3044_v59, %v7745_v40  ;;  %v3177_v20 = vadd.f32 %v3176_v33, %v3114_v6  ;;  %v3118_v32 = vmul.f32 %v7750_v38, %v7750_v38 }
 0x2cf   : > { %v7755_v13 = vpop.f32.mrf.mxu1 }
 0x2d0   : > { %9612 = vst [vmem:[#allocation22_spill] sm:$0xff] %v7755_v13  ;;  %v3178_v41 = vadd.f32 %v3177_v20, %v3115_v30  ;;  %v3046_v47 = vadd.f32 %v3045_v19, %v7755_v13  ;;  %v3116_v37 = vmul.f32 %v7755_v13, %v7755_v13 }
 0x2d1   : > { %v7760_v52 = vpop.f32.mrf.mxu1 }
 0x2d2   : > { %9613 = vst [vmem:[#allocation9_spill] sm:$0xff] %v7760_v52  ;;  %v3047_v26 = vadd.f32 %v7740_v34, %v3046_v47  ;;  %v3179_v25 = vadd.f32 %v3178_v41, %v3116_v37  ;;  %v3121_v23 = vmul.f32 %v7760_v52, %v7760_v52 }
 0x2d3   : > { %v7765_v58 = vpop.f32.mrf.mxu1 }
 0x2d4   : > { %9614 = vst [vmem:[#allocation25_spill] sm:$0xff] %v7765_v58  ;;  %v3180_v9 = vadd.f32 %v3179_v25, %v3117_v39  ;;  %v3048_v1 = vadd.f32 %v7750_v38, %v3047_v26  ;;  %v3119_v55 = vmul.f32 %v7765_v58, %v7765_v58 }
 0x2d5   : > { %v7770_v35 = vpop.f32.mrf.mxu1 }
 0x2d6   : > { %9615 = vst [vmem:[#allocation4_spill] sm:$0xff] %v7770_v35  ;;  %v3049_v45 = vadd.f32 %v3048_v1, %v7765_v58  ;;  %v3181_v15 = vadd.f32 %v3180_v9, %v3118_v32  ;;  %v3122_v16 = vmul.f32 %v7770_v35, %v7770_v35 }
 0x2d7   : > { %v7775_v31 = vpop.f32.mrf.mxu1 }
 0x2d8   : > { %9616 = vst [vmem:[#allocation11_spill] sm:$0xff] %v7775_v31  ;;  %v3182_v5 = vadd.f32 %v3181_v15, %v3119_v55  ;;  %v3050_v48 = vadd.f32 %v3049_v45, %v7775_v31  ;;  %v3120_v2 = vmul.f32 %v7775_v31, %v7775_v31 }
 0x2d9   : > { %v7780_v56 = vpop.f32.mrf.mxu1 }
 0x2da   : > { %9617 = vst [vmem:[#allocation16_spill] sm:$0xff] %v7780_v56  ;;  %v3051_v28 = vadd.f32 %v7760_v52, %v3050_v48  ;;  %v3183_v54 = vadd.f32 %v3182_v5, %v3120_v2  ;;  %v3125_v50 = vmul.f32 %v7780_v56, %v7780_v56 }
 0x2db   : > { %v7785_v3 = vpop.f32.mrf.mxu1 }
 0x2dc   : > { %9618 = vst [vmem:[#allocation7_spill] sm:$0xff] %v7785_v3  ;;  %v3184_v29 = vadd.f32 %v3183_v54, %v3121_v23  ;;  %v3052_v14 = vadd.f32 %v7770_v35, %v3051_v28  ;;  %v3123_v18 = vmul.f32 %v7785_v3, %v7785_v3 }
 0x2dd   : > { %v7790_v60 = vpop.f32.mrf.mxu1 }
 0x2de   : > { %9619 = vst [vmem:[#allocation10_spill] sm:$0xff] %v7790_v60  ;;  %v3053_v43 = vadd.f32 %v3052_v14, %v7785_v3  ;;  %v3185_v63 = vadd.f32 %v3184_v29, %v3122_v16  ;;  %v3126_v19 = vmul.f32 %v7790_v60, %v7790_v60 }
 0x2df   : > { %v7795_v12 = vpop.f32.mrf.mxu1 }
 0x2e0   : > { %9620 = vst [vmem:[#allocation6_spill] sm:$0xff] %v7795_v12  ;;  %v3186_v49 = vadd.f32 %v3185_v63, %v3123_v18  ;;  %v3054_v21 = vadd.f32 %v3053_v43, %v7795_v12  ;;  %v3124_v0 = vmul.f32 %v7795_v12, %v7795_v12 }
 0x2e1   : > { %v7800_v7 = vpop.f32.mrf.mxu1 }
 0x2e2   : > { %9621 = vst [vmem:[#allocation5_spill] sm:$0xff] %v7800_v7  ;;  %v3055_v6 = vadd.f32 %v7780_v56, %v3054_v21  ;;  %v3187_v33 = vadd.f32 %v3186_v49, %v3124_v0  ;;  %v3129_v45 = vmul.f32 %v7800_v7, %v7800_v7 }
 0x2e3   : > { %v7805_v59 = vpop.f32.mrf.mxu1 }
 0x2e4   : > { %9622 = vst [vmem:[#allocation12_spill] sm:$0xff] %v7805_v59  ;;  %v3188_v30 = vadd.f32 %v3187_v33, %v3125_v50  ;;  %v3056_v20 = vadd.f32 %v7790_v60, %v3055_v6  ;;  %v3127_v37 = vmul.f32 %v7805_v59, %v7805_v59 }
 0x2e5   : > { %v7810_v41 = vpop.f32.mrf.mxu1 }
 0x2e6   : > { %9623 = vst [vmem:[#allocation17_spill] sm:$0xff] %v7810_v41  ;;  %v3057_v47 = vadd.f32 %v3056_v20, %v7805_v59  ;;  %v3189_v39 = vadd.f32 %v3188_v30, %v3126_v19  ;;  %v3130_v48 = vmul.f32 %v7810_v41, %v7810_v41 }
 0x2e7   : > { %v7815_v26 = vpop.f32.mrf.mxu1 }
 0x2e8   : > { %9624 = vst [vmem:[#allocation28_spill] sm:$0xff] %v7815_v26  ;;  %v3190_v25 = vadd.f32 %v3189_v39, %v3127_v37  ;;  %v3058_v32 = vadd.f32 %v3057_v47, %v7815_v26  ;;  %v3128_v9 = vmul.f32 %v7815_v26, %v7815_v26 }
 0x2e9   : > { %v7820_v1 = vpop.f32.mrf.mxu1 }
 0x2ea   : > { %v3059_v55 = vadd.f32 %v7800_v7, %v3058_v32  ;;  %v3191_v15 = vadd.f32 %v3190_v25, %v3128_v9  ;;  %v3133_v21 = vmul.f32 %v7820_v1, %v7820_v1 }
 0x2eb   : > { %v7825_v5 = vpop.f32.mrf.mxu1 }
 0x2ec   : > { %9625 = vst [vmem:[#allocation29_spill] sm:$0xff] %v7825_v5  ;;  %v3192_v2 = vadd.f32 %v3191_v15, %v3129_v45  ;;  %v3060_v23 = vadd.f32 %v7810_v41, %v3059_v55  ;;  %v3131_v16 = vmul.f32 %v7825_v5, %v7825_v5  ;;  %v5957_v15 = vld [vmem:[%s9373_s4 + $0x68] sm:$0xff]  }
 0x2ed   : > { %v7830_v28 = vpop.f32.mrf.mxu1  ;;  %5240 = vmatprep.subr.bf16.mxu0 %v5957_v15 }
 0x2ee   : > { %v3061_v54 = vadd.f32 %v3060_v23, %v7825_v5  ;;  %v3193_v29 = vadd.f32 %v3192_v2, %v3130_v48  ;;  %v3134_v33 = vmul.f32 %v7830_v28, %v7830_v28  ;;  %v5958_v48 = vld [vmem:[%s9373_s4 + $0x60] sm:$0xff]   ;;  %5241 = vmatpush3.bf16.msra.mxu0 %v5957_v15 }
 0x2ef   : > { %v7835_v14 = vpop.f32.mrf.mxu1  ;;  %5242 = vmatprep.subr.bf16.mxu0 %v5958_v48 }
 0x2f0   : > { %9626 = vst [vmem:[#allocation30_spill] sm:$0xff] %v7835_v14  ;;  %v3194_v43 = vadd.f32 %v3193_v29, %v3131_v16  ;;  %v3062_v18 = vadd.f32 %v3061_v54, %v7835_v14  ;;  %v3132_v63 = vmul.f32 %v7835_v14, %v7835_v14 }
 0x2f1   : > { %v7840_v49 = vpop.f32.mrf.mxu1 }
 0x2f2   : > { %v3063_v0 = vadd.f32 %v7820_v1, %v3062_v18  ;;  %v3195_v50 = vadd.f32 %v3194_v43, %v3132_v63  ;;  %v3137_v2 = vmul.f32 %v7840_v49, %v7840_v49  ;;  %5243 = vmatpush3.bf16.msra.mxu0 %v5958_v48 }
 0x2f3   : > { %v7845_v6 = vpop.f32.mrf.mxu1 }
 0x2f4   : > { %v3196_v19 = vadd.f32 %v3195_v50, %v3133_v21  ;;  %v3064_v30 = vadd.f32 %v7830_v28, %v3063_v0  ;;  %v3135_v37 = vmul.f32 %v7845_v6, %v7845_v6  ;;  %v5959_v21 = vld [vmem:[%s9373_s4 + $0x58] sm:$0xff]  }
 0x2f5   : > { %v7850_v20 = vpop.f32.mrf.mxu1  ;;  %5244 = vmatprep.subr.bf16.mxu0 %v5959_v21 }
 0x2f6   : > { %v3065_v47 = vadd.f32 %v3064_v30, %v7845_v6  ;;  %v3197_v39 = vadd.f32 %v3196_v19, %v3134_v33  ;;  %v3138_v29 = vmul.f32 %v7850_v20, %v7850_v20  ;;  %5245 = vmatpush3.bf16.msra.mxu0 %v5959_v21 }
 0x2f7   : > { %v7855_v25 = vpop.f32.mrf.mxu1 }
 0x2f8   : > { %v3198_v32 = vadd.f32 %v3197_v39, %v3135_v37  ;;  %v3066_v9 = vadd.f32 %v3065_v47, %v7855_v25  ;;  %v3136_v45 = vmul.f32 %v7855_v25, %v7855_v25 }
 0x2f9   : > { %v7860_v55 = vpop.f32.mrf.mxu1 }
 0x2fa   : > { %v3067_v23 = vadd.f32 %v7840_v49, %v3066_v9  ;;  %v3199_v54 = vadd.f32 %v3198_v32, %v3136_v45  ;;  %v5960_v32 = vld [vmem:[%s9373_s4 + $0x50] sm:$0xff]   ;;  %v3141_v9 = vmul.f32 %v7860_v55, %v7860_v55 }
 0x2fb   : > { %v7871_v16 = vpop.f32.mrf.mxu1  ;;  %5246 = vmatprep.subr.bf16.mxu0 %v5960_v32 }
 0x2fc   : > { %v3200_v43 = vadd.f32 %v3199_v54, %v3137_v2  ;;  %v3068_v18 = vadd.f32 %v7850_v20, %v3067_v23  ;;  %v3139_v50 = vmul.f32 %v7871_v16, %v7871_v16  ;;  %5247 = vmatpush3.bf16.msra.mxu0 %v5960_v32 }
 0x2fd   : > { %v7876_v63 = vpop.f32.mrf.mxu1 }
 0x2fe   : > { %v3069_v0 = vadd.f32 %v3068_v18, %v7871_v16  ;;  %v3201_v33 = vadd.f32 %v3200_v43, %v3138_v29  ;;  %v3142_v23 = vmul.f32 %v7876_v63, %v7876_v63  ;;  %v5961_v43 = vld [vmem:[%s9373_s4 + $0x48] sm:$0xff]  }
 0x2ff   : > { %v7884_v19 = vpop.f32.mrf.mxu1  ;;  %5248 = vmatprep.subr.bf16.mxu0 %v5961_v43 }
 0x300   : > { %v3202_v30 = vadd.f32 %v3201_v33, %v3139_v50  ;;  %v3070_v47 = vadd.f32 %v3069_v0, %v7884_v19  ;;  %v3140_v37 = vmul.f32 %v7884_v19, %v7884_v19  ;;  %5249 = vmatpush3.bf16.msra.mxu0 %v5961_v43 }
 0x301   : > { %v7889_v39 = vpop.f32.mrf.mxu1 }
 0x302   : > { %v3071_v45 = vadd.f32 %v7860_v55, %v3070_v47  ;;  %v3203_v15 = vadd.f32 %v3202_v30, %v3140_v37 }
 0x303   : > { %v7897_v2 = vpop.f32.mrf.mxu1 }
 0x304   : > { %v3204_v54 = vadd.f32 %v3203_v15, %v3141_v9  ;;  %v3072_v48 = vadd.f32 %v7876_v63, %v3071_v45  ;;  %v3143_v0 = vmul.f32 %v7897_v2, %v7897_v2  ;;  %v5962_v9 = vld [vmem:[%s9373_s4 + $0x40] sm:$0xff]   ;;  %v3145_v45 = vmul.f32 %v7889_v39, %v7889_v39 }
 0x305   : > { %v7902_v29 = vpop.f32.mrf.mxu1  ;;  %5250 = vmatprep.subr.bf16.mxu0 %v5962_v9 }
 0x306   : > { %v3073_v18 = vadd.f32 %v3072_v48, %v7897_v2  ;;  %v3205_v50 = vadd.f32 %v3204_v54, %v3142_v23  ;;  %v3146_v48 = vmul.f32 %v7902_v29, %v7902_v29  ;;  %5251 = vmatpush3.bf16.msra.mxu0 %v5962_v9 }
 0x307   : > { %v7910_v33 = vpop.f32.mrf.mxu1 }
 0x308   : > { %v3206_v30 = vadd.f32 %v3205_v50, %v3143_v0  ;;  %v3074_v47 = vadd.f32 %v3073_v18, %v7910_v33  ;;  %v3144_v21 = vmul.f32 %v7910_v33, %v7910_v33 }
 0x309   : > { %v7915_v37 = vpop.f32.mrf.mxu1 }
 0x30a   : > { %v3075_v15 = vadd.f32 %v7889_v39, %v3074_v47  ;;  %v3207_v23 = vadd.f32 %v3206_v30, %v3144_v21  ;;  %v3149_v43 = vmul.f32 %v7915_v37, %v7915_v37 }
 0x30b   : > { %v7923_v54 = vpop.f32.mrf.mxu1 }
 0x30c   : > { %v3208_v18 = vadd.f32 %v3207_v23, %v3145_v45  ;;  %v3076_v32 = vadd.f32 %v7902_v29, %v3075_v15  ;;  %v3147_v14 = vmul.f32 %v7923_v54, %v7923_v54 }
 0x30d   : > { %v7928_v0 = vpop.f32.mrf.mxu1 }
 0x30e   : > { %v3077_v50 = vadd.f32 %v3076_v32, %v7923_v54  ;;  %v3209_v5 = vadd.f32 %v3208_v18, %v3146_v48  ;;  %v3150_v48 = vmul.f32 %v7928_v0, %v7928_v0 }
 0x30f   : > { %v7933_v47 = vpop.f32.mrf.mxu1 }
 0x310   : > { %v3210_v30 = vadd.f32 %v3209_v5, %v3147_v14  ;;  %v3078_v21 = vadd.f32 %v3077_v50, %v7933_v47  ;;  %v3148_v45 = vmul.f32 %v7933_v47, %v7933_v47 }
 0x311   : > { %v7938_v15 = vpop.f32.mrf.mxu1 }
 0x312   : > { %v3079_v23 = vadd.f32 %v7915_v37, %v3078_v21  ;;  %v3211_v32 = vadd.f32 %v3210_v30, %v3148_v45 }
 0x313   : > { %v7943_v41 = vpop.f32.mrf.mxu1 }
 0x314   : > { %v3212_v5 = vadd.f32 %v3211_v32, %v3149_v43  ;;  %v3080_v14 = vadd.f32 %v7928_v0, %v3079_v23  ;;  %v3151_v50 = vmul.f32 %v7943_v41, %v7943_v41  ;;  %v3153_v43 = vmul.f32 %v7938_v15, %v7938_v15 }
 0x315   : > { %v7948_v18 = vpop.f32.mrf.mxu1 }
 0x316   : > { %v3081_v9 = vadd.f32 %v3080_v14, %v7943_v41  ;;  %v3213_v7 = vadd.f32 %v3212_v5, %v3150_v48  ;;  %v3154_v48 = vmul.f32 %v7948_v18, %v7948_v18 }
 0x317   : > { %v7953_v26 = vpop.f32.mrf.mxu1 }
 0x318   : > { %v3214_v21 = vadd.f32 %v3213_v7, %v3151_v50  ;;  %v3082_v30 = vadd.f32 %v3081_v9, %v7953_v26  ;;  %v3152_v45 = vmul.f32 %v7953_v26, %v7953_v26 }
 0x319   : > { %v7958_v59 = vpop.f32.mrf.mxu1 }
 0x31a   : > { %v3083_v23 = vadd.f32 %v7938_v15, %v3082_v30  ;;  %v3215_v32 = vadd.f32 %v3214_v21, %v3152_v45 }
 0x31b   : > { %v7963_v14 = vpop.f32.mrf.mxu1 }
 0x31c   : > { %v3216_v5 = vadd.f32 %v3215_v32, %v3153_v43  ;;  %v3084_v7 = vadd.f32 %v7948_v18, %v3083_v23  ;;  %v3155_v60 = vmul.f32 %v7963_v14, %v7963_v14  ;;  %v3157_v43 = vmul.f32 %v7958_v59, %v7958_v59 }
 0x31d   : > { %v7968_v9 = vpop.f32.mrf.mxu1 }
 0x31e   : > { %v3085_v50 = vadd.f32 %v3084_v7, %v7963_v14  ;;  %v3217_v56 = vadd.f32 %v3216_v5, %v3154_v48  ;;  %v3158_v48 = vmul.f32 %v7968_v9, %v7968_v9 }
 0x31f   : > { %v7973_v12 = vpop.f32.mrf.mxu1 }
 0x320   : > { %v3218_v30 = vadd.f32 %v3217_v56, %v3155_v60  ;;  %v3086_v21 = vadd.f32 %v3085_v50, %v7973_v12  ;;  %v3156_v45 = vmul.f32 %v7973_v12, %v7973_v12 }
 0x321   : > { %v7978_v3 = vpop.f32.mrf.mxu1 }
 0x322   : > { %v3087_v23 = vadd.f32 %v7958_v59, %v3086_v21  ;;  %v3219_v32 = vadd.f32 %v3218_v30, %v3156_v45  ;;  %v3161_v30 = vmul.f32 %v7978_v3, %v7978_v3 }
 0x323   : > { %v7983_v7 = vpop.f32.mrf.mxu1 }
 0x324   : > { %v3220_v5 = vadd.f32 %v3219_v32, %v3157_v43  ;;  %v3088_v56 = vadd.f32 %v7968_v9, %v3087_v23  ;;  %v3159_v35 = vmul.f32 %v7983_v7, %v7983_v7 }
 0x325   : > { %v5235_v60 = vpop.f32.mrf.mxu1 }
 0x326   : > { %v3089_v50 = vadd.f32 %v3088_v56, %v7983_v7  ;;  %v3221_v52 = vadd.f32 %v3220_v5, %v3158_v48  ;;  %v3162_v43 = vmul.f32 %v5235_v60, %v5235_v60 }
 0x327   : > { %v3018_v31 = vpop.f32.mrf.mxu1 }
 0x328   : > { %v3222_v58 = vadd.f32 %v3221_v52, %v3159_v35  ;;  %v3090_v38 = vadd.f32 %v3089_v50, %v3018_v31  ;;  %v3160_v21 = vmul.f32 %v3018_v31, %v3018_v31 }
 0x32a   : > { %v3091_v45 = vadd.f32 %v7978_v3, %v3090_v38  ;;  %v3223_v34 = vadd.f32 %v3222_v58, %v3160_v21 }
 0x32c   : > { %v3092_v32 = vadd.f32 %v5235_v60, %v3091_v45  ;;  %v3224_v23 = vadd.f32 %v3223_v34, %v3161_v30 }
 0x32e   : > { %v3093_v13 = vrot.slane %v3092_v32, 4  ;;  %v3225_v40 = vadd.f32 %v3224_v23, %v3162_v43 }
 0x330   : > { %v3094_v56 = vadd.f32 %v3093_v13, %v3092_v32  ;;  %v3226_v44 = vrot.slane %v3225_v40, 4  ;;  %v5977_v13 = vld [vmem:[%s9374_s5] sm:$0x3f] }
 0x332   : > { %v3095_v24 = vrot.slane %v3094_v56, 2  ;;  %v3227_v53 = vadd.f32 %v3226_v44, %v3225_v40 }
 0x334   : > { %v3096_v48 = vadd.f32 %v3095_v24, %v3094_v56  ;;  %v3228_v5 = vrot.slane %v3227_v53, 2 }
 0x336   : > { %v3097_v52 = vrot.slane %v3096_v48, 1  ;;  %v3229_v35 = vadd.f32 %v3228_v5, %v3227_v53  ;;  %v9627_v53 = vsub.s32 2, %v9571_v51 }
 0x338   : > { %v3098_v50 = vadd.f32 %v3097_v52, %v3096_v48  ;;  %v3230_v61 = vrot.slane %v3229_v35, 1 }
 0x33a   : > { %v3231_v8 = vadd.f32 %v3230_v61, %v3229_v35  ;;  %v3232_v4 = vmul.f32 0.001953125, %v3098_v50  ;;  %v3315_v61 = vsub.s32 3, %v9571_v51 }
 0x33c   : > { %v3233_v27 = vmul.f32 0.001953125, %v3231_v8  ;;  %v3234_v38 = vmul.f32 %v3232_v4, %v3232_v4 }
 0x33e   : > { %v3235_v58 = vsub.f32 %v3233_v27, %v3234_v38 }
 0x340   : > { %v3236_v21 = vmax.f32 %v3235_v58, 0.0 }
 0x342   : > { %v3237_v45 = vadd.f32 1e-05, %v3236_v21 }
 0x344   : > { %5973 = vrsqrt.f32 %v3237_v45 }
 0x351   : > { %v5974_v34 = vpop.eup %5973 }
 0x352   : > { %v3239_v44 = vmul.f32 %v5977_v13, %v5974_v34 }
 0x354   : > { %v3240_v24 = vmul.f32 %v3239_v44, %v3232_v4  ;;  %v7999_v30 = vrot.slane %v3239_v44, %v9627_v53 }
 0x356   : > { %v3242_v40 = vrot.slane %v3240_v24, 7  ;;  %v3310_v27 = vmul.f32 %v7999_v30, %v3018_v31  ;;  %v3249_v23 = vmul.f32 %v7999_v30, %v7668_v11  ;;  %v3250_v4 = vmul.f32 %v7999_v30, %v7672_v57 }
 0x357   : > { %v3251_v56 = vmul.f32 %v7666_v36, %v7999_v30  ;;  %v3252_v48 = vmul.f32 %v7670_v22, %v7999_v30  ;;  %v3253_v31 = vmul.f32 %v7999_v30, %v7685_v17  ;;  %v3254_v5 = vmul.f32 %v7999_v30, %v7695_v62 }
 0x358   : > { %v3244_v8 = vsub.f32 %v5977_v13, %v3242_v40  ;;  %v8022_v52 = vmul.f32 %v7680_v46, %v7999_v30  ;;  %v8026_v11 = vmul.f32 %v7690_v42, %v7999_v30  ;;  %v8029_v57 = vmul.f32 %v5235_v60, %v7999_v30 }
 0x359   : > { %v3283_v36 = vmul.f32 %v7820_v1, %v7999_v30  ;;  %v3284_v22 = vmul.f32 %v7830_v28, %v7999_v30  ;;  %v3285_v17 = vmul.f32 %v7999_v30, %v7845_v6  ;;  %v3286_v46 = vmul.f32 %v7999_v30, %v7855_v25 }
 0x35a   : > { %v8003_v43 = vrot.slane %v3244_v8, %v3315_v61  ;;  %v3287_v62 = vmul.f32 %v7840_v49, %v7999_v30  ;;  %v3288_v42 = vmul.f32 %v7850_v20, %v7999_v30  ;;  %v3289_v60 = vmul.f32 %v7999_v30, %v7871_v16 }
 0x35b   : > { %v3290_v1 = vmul.f32 %v7999_v30, %v7884_v19  ;;  %v3291_v28 = vmul.f32 %v7860_v55, %v7999_v30  ;;  %v3292_v6 = vmul.f32 %v7876_v63, %v7999_v30  ;;  %v3293_v25 = vmul.f32 %v7999_v30, %v7897_v2 }
 0x35c   : > { %v8006_v32 = vadd.f32 %v8003_v43, %v3310_v27  ;;  %v3294_v49 = vmul.f32 %v7999_v30, %v7910_v33  ;;  %v3295_v20 = vmul.f32 %v7889_v39, %v7999_v30  ;;  %v3296_v16 = vmul.f32 %v7902_v29, %v7999_v30 }
 0x35d   : > { %v3297_v19 = vmul.f32 %v7999_v30, %v7923_v54  ;;  %v3298_v55 = vmul.f32 %v7999_v30, %v7933_v47  ;;  %v3299_v63 = vmul.f32 %v7915_v37, %v7999_v30  ;;  %v3300_v2 = vmul.f32 %v7928_v0, %v7999_v30 }
 0x35e   : > { %v3301_v33 = vmul.f32 %v7999_v30, %v7943_v41  ;;  %v3302_v39 = vmul.f32 %v7999_v30, %v7953_v26  ;;  %v3303_v29 = vmul.f32 %v7938_v15, %v7999_v30  ;;  %v3304_v54 = vmul.f32 %v7948_v18, %v7999_v30 }
 0x35f   : > { %v3305_v47 = vmul.f32 %v7999_v30, %v7963_v14  ;;  %v3306_v37 = vmul.f32 %v7999_v30, %v7973_v12  ;;  %v3307_v0 = vmul.f32 %v7958_v59, %v7999_v30  ;;  %v3308_v41 = vmul.f32 %v7968_v9, %v7999_v30 }
 0x360   : > { %v3309_v26 = vmul.f32 %v7999_v30, %v7983_v7  ;;  %v3311_v15 = vmul.f32 %v7978_v3, %v7999_v30  ;;  %v3317_v18 = vadd.f32 %v8003_v43, %v3249_v23  ;;  %v3318_v35 = vadd.f32 %v8003_v43, %v3250_v4 }
 0x361   : > { %v3319_v14 = vadd.f32 %v8003_v43, %v3251_v56  ;;  %v3320_v12 = vadd.f32 %v8003_v43, %v3252_v48  ;;  %v3321_v50 = vadd.f32 %v8003_v43, %v3253_v31  ;;  %v3322_v59 = vadd.f32 %v8003_v43, %v3254_v5 }
 0x362   : > { %v8094_v9 = vadd.f32 %v8003_v43, %v3283_v36  ;;  %v8097_v7 = vadd.f32 %v8003_v43, %v3284_v22  ;;  %v8100_v3 = vadd.f32 %v8003_v43, %v3285_v17  ;;  %v8103_v38 = vadd.f32 %v8003_v43, %v3286_v46 }
 0x363   : > { %v8106_v58 = vadd.f32 %v8003_v43, %v3287_v62  ;;  %v8109_v21 = vadd.f32 %v8003_v43, %v3288_v42  ;;  %v8112_v45 = vadd.f32 %v8003_v43, %v3289_v60  ;;  %v8115_v34 = vadd.f32 %v8003_v43, %v3290_v1 }
 0x364   : > { %v8118_v13 = vadd.f32 %v8003_v43, %v3291_v28  ;;  %v8121_v44 = vadd.f32 %v8003_v43, %v3292_v6  ;;  %v8124_v24 = vadd.f32 %v8003_v43, %v3293_v25  ;;  %v8127_v40 = vadd.f32 %v8003_v43, %v3294_v49 }
 0x365   : > { %v8130_v53 = vadd.f32 %v8003_v43, %v3295_v20  ;;  %v8133_v61 = vadd.f32 %v8003_v43, %v3296_v16  ;;  %v8136_v8 = vadd.f32 %v8003_v43, %v3297_v19  ;;  %v8139_v27 = vadd.f32 %v8003_v43, %v3298_v55  ;;  %v9628_v16 = vld [vmem:[#allocation26_spill] sm:$0xff]  ;;  %v9629_v55 = vld [vmem:[#allocation8_spill] sm:$0xff] }
 0x366   : > { %v8142_v23 = vadd.f32 %v8003_v43, %v3299_v63  ;;  %v8145_v4 = vadd.f32 %v8003_v43, %v3300_v2  ;;  %v8148_v56 = vadd.f32 %v8003_v43, %v3301_v33  ;;  %v8151_v48 = vadd.f32 %v8003_v43, %v3302_v39  ;;  %v9630_v33 = vld [vmem:[#allocation24_spill] sm:$0xff] }
 0x367   : > { %v8154_v31 = vadd.f32 %v8003_v43, %v3303_v29  ;;  %v8157_v5 = vadd.f32 %v8003_v43, %v3304_v54  ;;  %v8160_v36 = vadd.f32 %v8003_v43, %v3305_v47  ;;  %v8163_v22 = vadd.f32 %v8003_v43, %v3306_v37  ;;  %v9632_v37 = vld [vmem:[#allocation13_spill] sm:$0xff] }
 0x368   : > { %v8166_v17 = vadd.f32 %v8003_v43, %v3307_v0  ;;  %v8169_v46 = vadd.f32 %v8003_v43, %v3308_v41  ;;  %v8172_v62 = vadd.f32 %v8003_v43, %v3309_v26  ;;  %v8175_v42 = vadd.f32 %v8003_v43, %v3311_v15 }
 0x369   : > { %v8179_v60 = vadd.f32 %v8003_v43, %v8029_v57  ;;  %v3383_v1 = vmax.f32 %v3319_v14, 0.0  ;;  %v3384_v28 = vmax.f32 %v3320_v12, 0.0  ;;  %v3381_v6 = vmax.f32 %v3317_v18, 0.0  ;;  %v9631_v57 = vld [vmem:[#allocation20_spill] sm:$0xff] }
 0x36a   : > { %v3382_v25 = vmax.f32 %v3318_v35, 0.0  ;;  %v3385_v49 = vmax.f32 %v3321_v50, 0.0  ;;  %v3257_v20 = vmul.f32 %v7999_v30, %v7705_v10  ;;  %v3258_v19 = vmul.f32 %v7999_v30, %v9628_v16 }
 0x36b   : > { %v3259_v63 = vmul.f32 %v9629_v55, %v7999_v30  ;;  %v3386_v2 = vmax.f32 %v3322_v59, 0.0  ;;  %v3260_v39 = vmul.f32 %v9630_v33, %v7999_v30  ;;  %v3261_v29 = vmul.f32 %v7999_v30, %v9631_v57  ;;  %v9635_v55 = vld [vmem:[#allocation3_spill] sm:$0xff] }
 0x36c   : > { %v3446_v54 = vpack.c.bf16 %v3384_v28, %v3383_v1  ;;  %v3445_v47 = vpack.c.bf16 %v3382_v25, %v3381_v6  ;;  %v3262_v0 = vmul.f32 %v7999_v30, %v9632_v37  ;;  %v3323_v10 = vadd.f32 %v8003_v43, %v8022_v52  ;;  %v9633_v52 = vld [vmem:[#allocation2_spill] sm:$0xff] }
 0x36d   : > { %v3324_v41 = vadd.f32 %v8003_v43, %v8026_v11  ;;  %v3325_v26 = vadd.f32 %v8003_v43, %v3257_v20  ;;  %v3326_v15 = vadd.f32 %v8003_v43, %v3258_v19  ;;  %v3327_v18 = vadd.f32 %v8003_v43, %v3259_v63  ;;  %v9634_v11 = vld [vmem:[#allocation18_spill] sm:$0xff] }
 0x36e   : > { %v3328_v35 = vadd.f32 %v8003_v43, %v3260_v39  ;;  %5252 = vmatprep.mubr.bf16.mxu0 %v3445_v47  ;;  %v3447_v14 = vpack.c.bf16 %v3386_v2, %v3385_v49  ;;  %v3329_v12 = vadd.f32 %v8003_v43, %v3261_v29  ;;  %v3330_v50 = vadd.f32 %v8003_v43, %v3262_v0  ;;  %v9636_v63 = vld [vmem:[#allocation22_spill] sm:$0xff] }
 0x36f   : > { %5253 = vmatmul.mubr.bf16.vlgmr.msra.gmra.mxu0 %v3446_v54  ;;  %v3263_v59 = vmul.f32 %v9633_v52, %v7999_v30  ;;  %v3264_v1 = vmul.f32 %v9634_v11, %v7999_v30  ;;  %v3387_v28 = vmax.f32 %v3323_v10, 0.0  ;;  %v3388_v6 = vmax.f32 %v3324_v41, 0.0 }
 0x370   : > { %5256 = vmatprep.mubr.bf16.mxu0 %v3447_v14  ;;  %v3389_v25 = vmax.f32 %v3325_v26, 0.0  ;;  %v3390_v20 = vmax.f32 %v3326_v15, 0.0  ;;  %v3391_v16 = vmax.f32 %v3327_v18, 0.0  ;;  %v3392_v19 = vmax.f32 %v3328_v35, 0.0 }
 0x371   : > { %v3265_v49 = vmul.f32 %v7999_v30, %v9635_v55  ;;  %v3266_v2 = vmul.f32 %v7999_v30, %v9636_v63  ;;  %v3393_v33 = vmax.f32 %v3329_v12, 0.0  ;;  %v3394_v39 = vmax.f32 %v3330_v50, 0.0 }
 0x372   : > { %v8212_v57 = vadd.f32 %v8003_v43, %v3263_v59  ;;  %v8215_v29 = vadd.f32 %v8003_v43, %v3264_v1  ;;  %v3448_v37 = vpack.c.bf16 %v3388_v6, %v3387_v28  ;;  %v3415_v0 = vmax.f32 %v8094_v9, 0.0 }
 0x373   : > { %v8218_v54 = vadd.f32 %v8003_v43, %v3265_v49  ;;  %v8221_v47 = vadd.f32 %v8003_v43, %v3266_v2  ;;  %v3449_v10 = vpack.c.bf16 %v3390_v20, %v3389_v25  ;;  %v3450_v41 = vpack.c.bf16 %v3392_v19, %v3391_v16 }
 0x374   : > { %v3416_v26 = vmax.f32 %v8097_v7, 0.0  ;;  %v3417_v15 = vmax.f32 %v8100_v3, 0.0  ;;  %v3451_v18 = vpack.c.bf16 %v3394_v39, %v3393_v33  ;;  %v3418_v35 = vmax.f32 %v8103_v38, 0.0 }
 0x375   : > { %v3419_v14 = vmax.f32 %v8106_v58, 0.0  ;;  %v3420_v12 = vmax.f32 %v8109_v21, 0.0  ;;  %v3421_v52 = vmax.f32 %v8112_v45, 0.0  ;;  %v3422_v9 = vmax.f32 %v8115_v34, 0.0 }
 0x376   : > { %v8229_v50 = vpack.c.bf16 %v3416_v26, %v3415_v0  ;;  %v3423_v59 = vmax.f32 %v8118_v13, 0.0  ;;  %v8234_v7 = vpack.c.bf16 %v3418_v35, %v3417_v15  ;;  %v3424_v11 = vmax.f32 %v8121_v44, 0.0 }
 0x377   : > { %5257 = vmatmul.mubr.bf16.gmra.mxu0 %v3448_v37  ;;  %v8236_v3 = vpack.c.bf16 %v3420_v12, %v3419_v14  ;;  %v3425_v38 = vmax.f32 %v8124_v24, 0.0  ;;  %v8240_v58 = vpack.c.bf16 %v3422_v9, %v3421_v52  ;;  %v3426_v21 = vmax.f32 %v8127_v40, 0.0  ;;  %v9639_v37 = vld [vmem:[#allocation25_spill] sm:$0xff] }
 0x378   : > { %5260 = vmatprep.mubr.bf16.mxu0 %v3449_v10  ;;  %v3427_v1 = vmax.f32 %v8130_v53, 0.0  ;;  %v3428_v45 = vmax.f32 %v8133_v61, 0.0  ;;  %v8245_v28 = vpack.c.bf16 %v3424_v11, %v3423_v59  ;;  %v3429_v34 = vmax.f32 %v8136_v8, 0.0  ;;  %v9641_v52 = vld [vmem:[#allocation9_spill] sm:$0xff]  ;;  %v9642_v59 = vld [vmem:[#allocation4_spill] sm:$0xff] }
 0x379   : > { %v3430_v13 = vmax.f32 %v8139_v27, 0.0  ;;  %v3431_v6 = vmax.f32 %v8142_v23, 0.0  ;;  %v8250_v25 = vpack.c.bf16 %v3426_v21, %v3425_v38  ;;  %v3432_v24 = vmax.f32 %v8145_v4, 0.0  ;;  %v9643_v38 = vld [vmem:[#allocation7_spill] sm:$0xff] }
 0x37a   : > { %v8252_v44 = vpack.c.bf16 %v3428_v45, %v3427_v1  ;;  %v3433_v40 = vmax.f32 %v8148_v56, 0.0  ;;  %v3434_v53 = vmax.f32 %v8151_v48, 0.0  ;;  %v3435_v61 = vmax.f32 %v8154_v31, 0.0  ;;  %v9644_v1 = vld [vmem:[#allocation6_spill] sm:$0xff] }
 0x37b   : > { %v8256_v20 = vpack.c.bf16 %v3430_v13, %v3429_v34  ;;  %v3436_v8 = vmax.f32 %v8157_v5, 0.0  ;;  %v8261_v16 = vpack.c.bf16 %v3432_v24, %v3431_v6  ;;  %v3437_v27 = vmax.f32 %v8160_v36, 0.0 }
 0x37c   : > { %v3438_v23 = vmax.f32 %v8163_v22, 0.0  ;;  %v3439_v19 = vmax.f32 %v8166_v17, 0.0  ;;  %v8266_v4 = vpack.c.bf16 %v3434_v53, %v3433_v40  ;;  %v3440_v55 = vmax.f32 %v8169_v46, 0.0 }
 0x37d   : > { %v8268_v56 = vpack.c.bf16 %v3436_v8, %v3435_v61  ;;  %v3441_v48 = vmax.f32 %v8172_v62, 0.0  ;;  %v3442_v5 = vmax.f32 %v8006_v32, 0.0  ;;  %v3443_v36 = vmax.f32 %v8175_v42, 0.0  ;;  %v9637_v32 = vld [vmem:[#allocation19_spill] sm:$0xff] }
 0x37e   : > { %v8272_v31 = vpack.c.bf16 %v3438_v23, %v3437_v27  ;;  %v3444_v22 = vmax.f32 %v8179_v60, 0.0  ;;  %v3395_v17 = vmax.f32 %v8212_v57, 0.0  ;;  %v3396_v49 = vmax.f32 %v8215_v29, 0.0  ;;  %v9638_v42 = vld [vmem:[#allocation23_spill] sm:$0xff] }
 0x37f   : > { %5261 = vmatmul.mubr.bf16.gmra.mxu0 %v3450_v41  ;;  %v8279_v63 = vpack.c.bf16 %v3440_v55, %v3439_v19  ;;  %v3397_v2 = vmax.f32 %v8218_v54, 0.0  ;;  %v3398_v46 = vmax.f32 %v8221_v47, 0.0  ;;  %v8283_v62 = vpack.c.bf16 %v3442_v5, %v3441_v48  ;;  %v9640_v29 = vld [vmem:[#allocation11_spill] sm:$0xff]  ;;  %v9645_v19 = vld [vmem:[#allocation16_spill] sm:$0xff]  ;;  %v9646_v48 = vld [vmem:[#allocation10_spill] sm:$0xff] }
 0x380   : > { %5264 = vmatprep.mubr.bf16.mxu0 %v3451_v18  ;;  %v8285_v33 = vpack.c.bf16 %v3444_v22, %v3443_v36  ;;  %v3267_v39 = vmul.f32 %v9637_v32, %v7999_v30  ;;  %v3268_v60 = vmul.f32 %v9638_v42, %v7999_v30  ;;  %v3269_v57 = vmul.f32 %v7999_v30, %v9639_v37  ;;  %v9647_v36 = vld [vmem:[#allocation12_spill] sm:$0xff] }
 0x381   : > { %v3270_v0 = vmul.f32 %v7999_v30, %v9640_v29  ;;  %v3452_v10 = vpack.c.bf16 %v3396_v49, %v3395_v17  ;;  %v3453_v15 = vpack.c.bf16 %v3398_v46, %v3397_v2  ;;  %v3271_v9 = vmul.f32 %v9641_v52, %v7999_v30  ;;  %v9648_v17 = vld [vmem:[#allocation28_spill] sm:$0xff] }
 0x382   : > { %v3335_v54 = vadd.f32 %v8003_v43, %v3267_v39  ;;  %v3336_v47 = vadd.f32 %v8003_v43, %v3268_v60  ;;  %v3337_v41 = vadd.f32 %v8003_v43, %v3269_v57  ;;  %v3272_v11 = vmul.f32 %v9642_v59, %v7999_v30 }
 0x383   : > { %v3338_v26 = vadd.f32 %v8003_v43, %v3270_v0  ;;  %v3273_v21 = vmul.f32 %v7999_v30, %v9643_v38  ;;  %v3274_v45 = vmul.f32 %v7999_v30, %v9644_v1  ;;  %v3339_v34 = vadd.f32 %v8003_v43, %v3271_v9 }
 0x384   : > { %v3399_v18 = vmax.f32 %v3335_v54, 0.0  ;;  %v3400_v35 = vmax.f32 %v3336_v47, 0.0  ;;  %v3401_v14 = vmax.f32 %v3337_v41, 0.0  ;;  %v3340_v13 = vadd.f32 %v8003_v43, %v3272_v11  ;;  %v9649_v54 = vld [vmem:[#allocation5_spill] sm:$0xff] }
 0x385   : > { %v3402_v12 = vmax.f32 %v3338_v26, 0.0  ;;  %v3341_v24 = vadd.f32 %v8003_v43, %v3273_v21  ;;  %v3342_v40 = vadd.f32 %v8003_v43, %v3274_v45  ;;  %v3403_v61 = vmax.f32 %v3339_v34, 0.0  ;;  %v9651_v26 = vld [vmem:[#allocation29_spill] sm:$0xff] }
 0x386   : > { %v3454_v6 = vpack.c.bf16 %v3400_v35, %v3399_v18  ;;  %v3404_v8 = vmax.f32 %v3340_v13, 0.0  ;;  %v3275_v55 = vmul.f32 %v9645_v19, %v7999_v30  ;;  %v3276_v5 = vmul.f32 %v9646_v48, %v7999_v30  ;;  %v9652_v18 = vld [vmem:[#allocation30_spill] sm:$0xff] }
 0x387   : > { %5265 = vmatmul.mubr.bf16.gmra.mxu0 %v3452_v10  ;;  %v3455_v53 = vpack.c.bf16 %v3402_v12, %v3401_v14  ;;  %v3405_v27 = vmax.f32 %v3341_v24, 0.0  ;;  %v3406_v23 = vmax.f32 %v3342_v40, 0.0  ;;  %v3277_v22 = vmul.f32 %v7999_v30, %v9647_v36  ;;  %v9650_v10 = vld [vmem:[#allocation17_spill] sm:$0xff] }
 0x388   : > { %5268 = vmatprep.mubr.bf16.mxu0 %v3453_v15  ;;  %v3278_v49 = vmul.f32 %v7999_v30, %v9648_v17  ;;  %v3343_v2 = vadd.f32 %v8003_v43, %v3275_v55  ;;  %v3344_v46 = vadd.f32 %v8003_v43, %v3276_v5  ;;  %v3456_v32 = vpack.c.bf16 %v3404_v8, %v3403_v61 }
 0x389   : > { %v3345_v39 = vadd.f32 %v8003_v43, %v3277_v22  ;;  %v3457_v60 = vpack.c.bf16 %v3406_v23, %v3405_v27  ;;  %v3279_v47 = vmul.f32 %v9649_v54, %v7999_v30  ;;  %v3280_v41 = vmul.f32 %v9650_v10, %v7999_v30 }
 0x38a   : > { %v3346_v42 = vadd.f32 %v8003_v43, %v3278_v49  ;;  %v3407_v37 = vmax.f32 %v3343_v2, 0.0  ;;  %v3408_v57 = vmax.f32 %v3344_v46, 0.0  ;;  %v3281_v15 = vmul.f32 %v7999_v30, %v9651_v26 }
 0x38b   : > { %v3409_v29 = vmax.f32 %v3345_v39, 0.0  ;;  %v3282_v35 = vmul.f32 %v7999_v30, %v9652_v18  ;;  %v3347_v14 = vadd.f32 %v8003_v43, %v3279_v47  ;;  %v3348_v12 = vadd.f32 %v8003_v43, %v3280_v41  ;;  %v5963_v30 = vld [vmem:[%s9375_s6 + $0x38] sm:$0xff]  }
 0x38c   : > { %v3410_v0 = vmax.f32 %v3346_v42, 0.0  ;;  %v3458_v52 = vpack.c.bf16 %v3408_v57, %v3407_v37  ;;  %v3349_v9 = vadd.f32 %v8003_v43, %v3281_v15 }
 0x38d   : > { %v3350_v59 = vadd.f32 %v8003_v43, %v3282_v35  ;;  %v3411_v38 = vmax.f32 %v3347_v14, 0.0  ;;  %v3412_v21 = vmax.f32 %v3348_v12, 0.0  ;;  %v9459_v43 = vmov 0.0  }
 0x38e   : > { %v3459_v11 = vpack.c.bf16 %v3410_v0, %v3409_v29  ;;  %v3413_v1 = vmax.f32 %v3349_v9, 0.0  ;;  %5316 = vmatprep.subr.bf16.mxu1 %v9459_v43 }
 0x38f   : > { %5269 = vmatmul.mubr.bf16.gmra.mxu0 %v3454_v6  ;;  %v3414_v45 = vmax.f32 %v3350_v59, 0.0  ;;  %v3460_v34 = vpack.c.bf16 %v3412_v21, %v3411_v38  ;;  %5317 = vmatpush3.bf16.msra.mxu1 %v5963_v30 }
 0x390   : > { %5272 = vmatprep.mubr.bf16.mxu0 %v3455_v53  ;;  %5318 = vmatprep.subr.bf16.mxu1 %v9459_v43 }
 0x391   : > { %v3461_v13 = vpack.c.bf16 %v3414_v45, %v3413_v1 }
 0x397   : > { %5273 = vmatmul.mubr.bf16.gmra.mxu0 %v3456_v32 }
 0x398   : > { %5276 = vmatprep.mubr.bf16.mxu0 %v3457_v60 }
 0x39f   : > { %5277 = vmatmul.mubr.bf16.gmra.mxu0 %v3458_v52 }
 0x3a0   : > { %5280 = vmatprep.mubr.bf16.mxu0 %v3459_v11 }
 0x3a7   : > { %5281 = vmatmul.mubr.bf16.gmra.mxu0 %v3460_v34 }
 0x3a8   : > { %5284 = vmatprep.mubr.bf16.mxu0 %v3461_v13 }
 0x3af   : > { %5285 = vmatmul.mubr.bf16.gmra.mxu0 %v8229_v50  ;;  %v5964_v50 = vld [vmem:[%s9375_s6 + $0x30] sm:$0xff]  }
 0x3b0   : > { %5288 = vmatprep.mubr.bf16.mxu0 %v8234_v7  ;;  %5319 = vmatpush3.bf16.msra.mxu1 %v5964_v50  ;;  %v5965_v7 = vld [vmem:[%s9375_s6 + $0x28] sm:$0xff]  }
 0x3b1   : > { %5320 = vmatprep.subr.bf16.mxu1 %v9459_v43 }
 0x3b4   : > { %5321 = vmatpush3.bf16.msra.mxu1 %v5965_v7 }
 0x3b5   : > { %5322 = vmatprep.subr.bf16.mxu1 %v9459_v43 }
 0x3b7   : > { %5289 = vmatmul.mubr.bf16.gmra.mxu0 %v8236_v3 }
 0x3b8   : > { %5292 = vmatprep.mubr.bf16.mxu0 %v8240_v58 }
 0x3bf   : > { %5293 = vmatmul.mubr.bf16.gmra.mxu0 %v8245_v28 }
 0x3c0   : > { %5296 = vmatprep.mubr.bf16.mxu0 %v8250_v25 }
 0x3c7   : > { %5297 = vmatmul.mubr.bf16.gmra.mxu0 %v8252_v44 }
 0x3c8   : > { %5300 = vmatprep.mubr.bf16.mxu0 %v8256_v20 }
 0x3cf   : > { %5301 = vmatmul.mubr.bf16.gmra.mxu0 %v8261_v16 }
 0x3d0   : > { %5304 = vmatprep.mubr.bf16.mxu0 %v8266_v4 }
 0x3d7   : > { %5305 = vmatmul.mubr.bf16.gmra.mxu0 %v8268_v56 }
 0x3d8   : > { %5308 = vmatprep.mubr.bf16.mxu0 %v8272_v31 }
 0x3df   : > { %5309 = vmatmul.mubr.bf16.gmra.mxu0 %v8279_v63 }
 0x3e0   : > { %5312 = vmatprep.mubr.bf16.mxu0 %v8283_v62 }
 0x3e7   : > { %5313 = vmatmul.mubr.bf16.gmra.mxu0 %v8285_v33 }
 0x42f   : > { %v8363_v3 = vpop.f32.mrf.mxu0 }
 0x430   : > { %v3902_v56 = vmul.f32 %v8363_v3, %v8363_v3 }
 0x431   : > { %v8365_v58 = vpop.f32.mrf.mxu0 }
 0x432   : > { %v3900_v44 = vmul.f32 %v8365_v58, %v8365_v58 }
 0x433   : > { %v8367_v28 = vpop.f32.mrf.mxu0 }
 0x434   : > { %v3903_v33 = vmul.f32 %v8367_v28, %v8367_v28 }
 0x435   : > { %v8369_v25 = vpop.f32.mrf.mxu0 }
 0x436   : > { %v3831_v20 = vadd.f32 %v8369_v25, %v8365_v58  ;;  %v3901_v16 = vmul.f32 %v8369_v25, %v8369_v25 }
 0x437   : > { %v8377_v4 = vpop.f32.mrf.mxu0 }
 0x438   : > { %v3832_v31 = vadd.f32 %v8363_v3, %v3831_v20  ;;  %v3964_v63 = vadd.f32 %v3901_v16, %v3900_v44  ;;  %v3906_v5 = vmul.f32 %v8377_v4, %v8377_v4 }
 0x439   : > { %v8382_v62 = vpop.f32.mrf.mxu0 }
 0x43a   : > { %v3965_v6 = vadd.f32 %v3964_v63, %v3902_v56  ;;  %v3833_v24 = vadd.f32 %v8367_v28, %v3832_v31  ;;  %v3904_v61 = vmul.f32 %v8382_v62, %v8382_v62 }
 0x43b   : > { %v8387_v40 = vpop.f32.mrf.mxu0 }
 0x43c   : > { %v3834_v53 = vadd.f32 %v3833_v24, %v8382_v62  ;;  %v3966_v8 = vadd.f32 %v3965_v6, %v3903_v33  ;;  %v3907_v49 = vmul.f32 %v8387_v40, %v8387_v40 }
 0x43d   : > { %v8392_v27 = vpop.f32.mrf.mxu0 }
 0x43e   : > { %v3967_v23 = vadd.f32 %v3966_v8, %v3904_v61  ;;  %v3835_v19 = vadd.f32 %v3834_v53, %v8392_v27  ;;  %v3905_v55 = vmul.f32 %v8392_v27, %v8392_v27 }
 0x43f   : > { %v8397_v48 = vpop.f32.mrf.mxu0 }
 0x440   : > { %v3836_v36 = vadd.f32 %v8377_v4, %v3835_v19  ;;  %v3968_v22 = vadd.f32 %v3967_v23, %v3905_v55  ;;  %v3910_v47 = vmul.f32 %v8397_v48, %v8397_v48 }
 0x441   : > { %v8402_v17 = vpop.f32.mrf.mxu0 }
 0x442   : > { %v3969_v2 = vadd.f32 %v3968_v22, %v3906_v5  ;;  %v3837_v46 = vadd.f32 %v8387_v40, %v3836_v36  ;;  %v3908_v42 = vmul.f32 %v8402_v17, %v8402_v17 }
 0x443   : > { %v8407_v32 = vpop.f32.mrf.mxu0 }
 0x444   : > { %v3838_v39 = vadd.f32 %v3837_v46, %v8402_v17  ;;  %v3970_v60 = vadd.f32 %v3969_v2, %v3907_v49  ;;  %v3911_v15 = vmul.f32 %v8407_v32, %v8407_v32 }
 0x445   : > { %v8412_v37 = vpop.f32.mrf.mxu0 }
 0x446   : > { %v3971_v57 = vadd.f32 %v3970_v60, %v3908_v42  ;;  %v3839_v29 = vadd.f32 %v3838_v39, %v8412_v37  ;;  %v3909_v0 = vmul.f32 %v8412_v37, %v8412_v37 }
 0x447   : > { %v8417_v54 = vpop.f32.mrf.mxu0 }
 0x448   : > { %v3840_v10 = vadd.f32 %v8397_v48, %v3839_v29  ;;  %v3972_v41 = vadd.f32 %v3971_v57, %v3909_v0  ;;  %v3914_v45 = vmul.f32 %v8417_v54, %v8417_v54 }
 0x449   : > { %v8422_v26 = vpop.f32.mrf.mxu0 }
 0x44a   : > { %v3973_v18 = vadd.f32 %v3972_v41, %v3910_v47  ;;  %v3841_v35 = vadd.f32 %v8407_v32, %v3840_v10  ;;  %v3912_v52 = vmul.f32 %v8422_v26, %v8422_v26 }
 0x44b   : > { %v8427_v14 = vpop.f32.mrf.mxu0 }
 0x44c   : > { %v3842_v12 = vadd.f32 %v3841_v35, %v8422_v26  ;;  %v3974_v9 = vadd.f32 %v3973_v18, %v3911_v15  ;;  %v3915_v50 = vmul.f32 %v8427_v14, %v8427_v14 }
 0x44d   : > { %v8432_v59 = vpop.f32.mrf.mxu0 }
 0x44e   : > { %v3975_v11 = vadd.f32 %v3974_v9, %v3912_v52  ;;  %v3843_v38 = vadd.f32 %v3842_v12, %v8432_v59  ;;  %v3913_v21 = vmul.f32 %v8432_v59, %v8432_v59 }
 0x44f   : > { %v8437_v1 = vpop.f32.mrf.mxu0 }
 0x450   : > { %v3844_v34 = vadd.f32 %v8417_v54, %v3843_v38  ;;  %v3976_v13 = vadd.f32 %v3975_v11, %v3913_v21  ;;  %v3918_v61 = vmul.f32 %v8437_v1, %v8437_v1 }
 0x451   : > { %v8442_v30 = vpop.f32.mrf.mxu0 }
 0x452   : > { %v3977_v7 = vadd.f32 %v3976_v13, %v3914_v45  ;;  %v3845_v44 = vadd.f32 %v8427_v14, %v3844_v34  ;;  %v3916_v56 = vmul.f32 %v8442_v30, %v8442_v30 }
 0x453   : > { %v8447_v20 = vpop.f32.mrf.mxu0 }
 0x454   : > { %v3846_v16 = vadd.f32 %v3845_v44, %v8442_v30  ;;  %v3978_v31 = vadd.f32 %v3977_v7, %v3915_v50  ;;  %v3919_v55 = vmul.f32 %v8447_v20, %v8447_v20 }
 0x455   : > { %v8452_v63 = vpop.f32.mrf.mxu0 }
 0x456   : > { %v3979_v33 = vadd.f32 %v3978_v31, %v3916_v56  ;;  %v3847_v6 = vadd.f32 %v3846_v16, %v8452_v63  ;;  %v3917_v24 = vmul.f32 %v8452_v63, %v8452_v63 }
 0x457   : > { %v8457_v53 = vpop.f32.mrf.mxu0 }
 0x458   : > { %v3848_v8 = vadd.f32 %v8437_v1, %v3847_v6  ;;  %v3980_v23 = vadd.f32 %v3979_v33, %v3917_v24  ;;  %v3922_v0 = vmul.f32 %v8457_v53, %v8457_v53 }
 0x459   : > { %v8462_v19 = vpop.f32.mrf.mxu0 }
 0x45a   : > { %v3981_v5 = vadd.f32 %v3980_v23, %v3918_v61  ;;  %v3849_v36 = vadd.f32 %v8447_v20, %v3848_v8  ;;  %v3920_v2 = vmul.f32 %v8462_v19, %v8462_v19 }
 0x45b   : > { %v8467_v22 = vpop.f32.mrf.mxu0 }
 0x45c   : > { %v3850_v49 = vadd.f32 %v3849_v36, %v8462_v19  ;;  %v3982_v46 = vadd.f32 %v3981_v5, %v3919_v55  ;;  %v3923_v15 = vmul.f32 %v8467_v22, %v8467_v22 }
 0x45d   : > { %v8472_v39 = vpop.f32.mrf.mxu0 }
 0x45e   : > { %v3983_v42 = vadd.f32 %v3982_v46, %v3920_v2  ;;  %v3851_v60 = vadd.f32 %v3850_v49, %v8472_v39  ;;  %v3921_v57 = vmul.f32 %v8472_v39, %v8472_v39 }
 0x45f   : > { %v8477_v29 = vpop.f32.mrf.mxu0 }
 0x460   : > { %v3852_v47 = vadd.f32 %v8457_v53, %v3851_v60  ;;  %v3984_v10 = vadd.f32 %v3983_v42, %v3921_v57  ;;  %v3926_v50 = vmul.f32 %v8477_v29, %v8477_v29 }
 0x461   : > { %v8482_v41 = vpop.f32.mrf.mxu0 }
 0x462   : > { %v3985_v18 = vadd.f32 %v3984_v10, %v3922_v0  ;;  %v3853_v35 = vadd.f32 %v8467_v22, %v3852_v47  ;;  %v3924_v9 = vmul.f32 %v8482_v41, %v8482_v41 }
 0x463   : > { %v8487_v12 = vpop.f32.mrf.mxu0 }
 0x464   : > { %v3854_v52 = vadd.f32 %v3853_v35, %v8482_v41  ;;  %v3986_v11 = vadd.f32 %v3985_v18, %v3923_v15  ;;  %v3927_v56 = vmul.f32 %v8487_v12, %v8487_v12 }
 0x465   : > { %v8492_v38 = vpop.f32.mrf.mxu0 }
 0x466   : > { %v3987_v21 = vadd.f32 %v3986_v11, %v3924_v9  ;;  %v3855_v45 = vadd.f32 %v3854_v52, %v8492_v38  ;;  %v3925_v34 = vmul.f32 %v8492_v38, %v8492_v38 }
 0x467   : > { %v8497_v13 = vpop.f32.mrf.mxu0 }
 0x468   : > { %v3856_v7 = vadd.f32 %v8477_v29, %v3855_v45  ;;  %v3988_v44 = vadd.f32 %v3987_v21, %v3925_v34  ;;  %v3930_v2 = vmul.f32 %v8497_v13, %v8497_v13 }
 0x469   : > { %v8502_v16 = vpop.f32.mrf.mxu0 }
 0x46a   : > { %v3989_v31 = vadd.f32 %v3988_v44, %v3926_v50  ;;  %v3857_v33 = vadd.f32 %v8487_v12, %v3856_v7  ;;  %v3928_v61 = vmul.f32 %v8502_v16, %v8502_v16 }
 0x46b   : > { %v8507_v6 = vpop.f32.mrf.mxu0 }
 0x46c   : > { %v3858_v24 = vadd.f32 %v3857_v33, %v8502_v16  ;;  %v3990_v8 = vadd.f32 %v3989_v31, %v3927_v56  ;;  %v3931_v57 = vmul.f32 %v8507_v6, %v8507_v6 }
 0x46d   : > { %v8512_v23 = vpop.f32.mrf.mxu0 }
 0x46e   : > { %v3991_v55 = vadd.f32 %v3990_v8, %v3928_v61  ;;  %v3859_v5 = vadd.f32 %v3858_v24, %v8512_v23  ;;  %v3929_v36 = vmul.f32 %v8512_v23, %v8512_v23 }
 0x46f   : > { %v8517_v49 = vpop.f32.mrf.mxu0 }
 0x470   : > { %v3860_v46 = vadd.f32 %v8497_v13, %v3859_v5  ;;  %v3992_v42 = vadd.f32 %v3991_v55, %v3929_v36  ;;  %v3934_v34 = vmul.f32 %v8517_v49, %v8517_v49 }
 0x471   : > { %v8522_v60 = vpop.f32.mrf.mxu0 }
 0x472   : > { %v3993_v0 = vadd.f32 %v3992_v42, %v3930_v2  ;;  %v3861_v47 = vadd.f32 %v8507_v6, %v3860_v46  ;;  %v3932_v18 = vmul.f32 %v8522_v60, %v8522_v60 }
 0x473   : > { %v8527_v10 = vpop.f32.mrf.mxu0 }
 0x474   : > { %v3862_v15 = vadd.f32 %v3861_v47, %v8522_v60  ;;  %v3994_v35 = vadd.f32 %v3993_v0, %v3931_v57  ;;  %v3935_v56 = vmul.f32 %v8527_v10, %v8527_v10 }
 0x475   : > { %v8532_v52 = vpop.f32.mrf.mxu0 }
 0x476   : > { %v3995_v9 = vadd.f32 %v3994_v35, %v3932_v18  ;;  %v3863_v11 = vadd.f32 %v3862_v15, %v8532_v52  ;;  %v3933_v21 = vmul.f32 %v8532_v52, %v8532_v52 }
 0x477   : > { %v8537_v45 = vpop.f32.mrf.mxu0 }
 0x478   : > { %9653 = vst [vmem:[#allocation14_spill] sm:$0xff] %v8537_v45  ;;  %v3864_v50 = vadd.f32 %v8517_v49, %v3863_v11  ;;  %v3996_v7 = vadd.f32 %v3995_v9, %v3933_v21  ;;  %v3938_v57 = vmul.f32 %v8537_v45, %v8537_v45 }
 0x479   : > { %v8542_v44 = vpop.f32.mrf.mxu0 }
 0x47a   : > { %v3997_v31 = vadd.f32 %v3996_v7, %v3934_v34  ;;  %v3865_v33 = vadd.f32 %v8527_v10, %v3864_v50  ;;  %v3936_v8 = vmul.f32 %v8542_v44, %v8542_v44 }
 0x47b   : > { %v8547_v24 = vpop.f32.mrf.mxu0 }
 0x47c   : > { %9654 = vst [vmem:[#allocation21_spill] sm:$0xff] %v8547_v24  ;;  %v3866_v61 = vadd.f32 %v3865_v33, %v8542_v44  ;;  %v3998_v55 = vadd.f32 %v3997_v31, %v3935_v56  ;;  %v3939_v18 = vmul.f32 %v8547_v24, %v8547_v24 }
 0x47d   : > { %v8552_v5 = vpop.f32.mrf.mxu0 }
 0x47e   : > { %v3999_v36 = vadd.f32 %v3998_v55, %v3936_v8  ;;  %v3867_v2 = vadd.f32 %v3866_v61, %v8552_v5  ;;  %v3937_v46 = vmul.f32 %v8552_v5, %v8552_v5 }
 0x47f   : > { %v8557_v42 = vpop.f32.mrf.mxu0 }
 0x480   : > { %9655 = vst [vmem:[#allocation27_spill] sm:$0xff] %v8557_v42  ;;  %v3868_v0 = vadd.f32 %v8537_v45, %v3867_v2  ;;  %v4000_v47 = vadd.f32 %v3999_v36, %v3937_v46  ;;  %v3942_v8 = vmul.f32 %v8557_v42, %v8557_v42 }
 0x481   : > { %v8562_v15 = vpop.f32.mrf.mxu0 }
 0x482   : > { %9656 = vst [vmem:[#allocation15_spill] sm:$0xff] %v8562_v15  ;;  %v4001_v35 = vadd.f32 %v4000_v47, %v3938_v57  ;;  %v3869_v9 = vadd.f32 %v8547_v24, %v3868_v0  ;;  %v3940_v34 = vmul.f32 %v8562_v15, %v8562_v15 }
 0x483   : > { %v8567_v11 = vpop.f32.mrf.mxu0 }
 0x484   : > { %9657 = vst [vmem:[#allocation26_spill] sm:$0xff] %v8567_v11  ;;  %v3870_v21 = vadd.f32 %v3869_v9, %v8562_v15  ;;  %v4002_v50 = vadd.f32 %v4001_v35, %v3939_v18  ;;  %v3943_v46 = vmul.f32 %v8567_v11, %v8567_v11 }
 0x485   : > { %v8572_v7 = vpop.f32.mrf.mxu0 }
 0x486   : > { %9658 = vst [vmem:[#allocation8_spill] sm:$0xff] %v8572_v7  ;;  %v4003_v56 = vadd.f32 %v4002_v50, %v3940_v34  ;;  %v3871_v31 = vadd.f32 %v3870_v21, %v8572_v7  ;;  %v3941_v33 = vmul.f32 %v8572_v7, %v8572_v7 }
 0x487   : > { %v8577_v61 = vpop.f32.mrf.mxu0 }
 0x488   : > { %9659 = vst [vmem:[#allocation24_spill] sm:$0xff] %v8577_v61  ;;  %v3872_v55 = vadd.f32 %v8557_v42, %v3871_v31  ;;  %v4004_v36 = vadd.f32 %v4003_v56, %v3941_v33  ;;  %v3946_v33 = vmul.f32 %v8577_v61, %v8577_v61 }
 0x489   : > { %v8582_v2 = vpop.f32.mrf.mxu0 }
 0x48a   : > { %9660 = vst [vmem:[#allocation20_spill] sm:$0xff] %v8582_v2  ;;  %v4005_v57 = vadd.f32 %v4004_v36, %v3942_v8  ;;  %v3873_v0 = vadd.f32 %v8567_v11, %v3872_v55  ;;  %v3944_v35 = vmul.f32 %v8582_v2, %v8582_v2 }
 0x48b   : > { %v8587_v47 = vpop.f32.mrf.mxu0 }
 0x48c   : > { %9661 = vst [vmem:[#allocation13_spill] sm:$0xff] %v8587_v47  ;;  %v3874_v18 = vadd.f32 %v3873_v0, %v8582_v2  ;;  %v4006_v9 = vadd.f32 %v4005_v57, %v3943_v46  ;;  %v3947_v46 = vmul.f32 %v8587_v47, %v8587_v47 }
 0x48d   : > { %v8592_v21 = vpop.f32.mrf.mxu0 }
 0x48e   : > { %9662 = vst [vmem:[#allocation2_spill] sm:$0xff] %v8592_v21  ;;  %v4007_v34 = vadd.f32 %v4006_v9, %v3944_v35  ;;  %v3875_v50 = vadd.f32 %v3874_v18, %v8592_v21  ;;  %v3945_v56 = vmul.f32 %v8592_v21, %v8592_v21 }
 0x48f   : > { %v8597_v31 = vpop.f32.mrf.mxu0 }
 0x490   : > { %9663 = vst [vmem:[#allocation18_spill] sm:$0xff] %v8597_v31  ;;  %v3876_v8 = vadd.f32 %v8577_v61, %v3875_v50  ;;  %v4008_v55 = vadd.f32 %v4007_v34, %v3945_v56 }
 0x491   : > { %v8602_v36 = vpop.f32.mrf.mxu0 }
 0x492   : > { %9664 = vst [vmem:[#allocation3_spill] sm:$0xff] %v8602_v36  ;;  %v4009_v57 = vadd.f32 %v4008_v55, %v3946_v33  ;;  %v3877_v0 = vadd.f32 %v8587_v47, %v3876_v8  ;;  %v3948_v9 = vmul.f32 %v8602_v36, %v8602_v36  ;;  %v3950_v33 = vmul.f32 %v8597_v31, %v8597_v31 }
 0x493   : > { %v8607_v18 = vpop.f32.mrf.mxu0 }
 0x494   : > { %9665 = vst [vmem:[#allocation22_spill] sm:$0xff] %v8607_v18  ;;  %v3878_v35 = vadd.f32 %v3877_v0, %v8602_v36  ;;  %v4010_v43 = vadd.f32 %v4009_v57, %v3947_v46  ;;  %v3951_v46 = vmul.f32 %v8607_v18, %v8607_v18 }
 0x495   : > { %v8612_v21 = vpop.f32.mrf.mxu0 }
 0x496   : > { %9666 = vst [vmem:[#allocation19_spill] sm:$0xff] %v8612_v21  ;;  %v4011_v50 = vadd.f32 %v4010_v43, %v3948_v9  ;;  %v3879_v34 = vadd.f32 %v3878_v35, %v8612_v21  ;;  %v3949_v56 = vmul.f32 %v8612_v21, %v8612_v21 }
 0x497   : > { %v8617_v61 = vpop.f32.mrf.mxu0 }
 0x498   : > { %9667 = vst [vmem:[#allocation23_spill] sm:$0xff] %v8617_v61  ;;  %v3880_v8 = vadd.f32 %v8597_v31, %v3879_v34  ;;  %v4012_v55 = vadd.f32 %v4011_v50, %v3949_v56 }
 0x499   : > { %v8622_v0 = vpop.f32.mrf.mxu0 }
 0x49a   : > { %9668 = vst [vmem:[#allocation25_spill] sm:$0xff] %v8622_v0  ;;  %v4013_v57 = vadd.f32 %v4012_v55, %v3950_v33  ;;  %v3881_v43 = vadd.f32 %v8607_v18, %v3880_v8  ;;  %v3952_v21 = vmul.f32 %v8622_v0, %v8622_v0  ;;  %v3954_v33 = vmul.f32 %v8617_v61, %v8617_v61 }
 0x49b   : > { %v8627_v35 = vpop.f32.mrf.mxu0 }
 0x49c   : > { %9669 = vst [vmem:[#allocation11_spill] sm:$0xff] %v8627_v35  ;;  %v3882_v9 = vadd.f32 %v3881_v43, %v8622_v0  ;;  %v4014_v36 = vadd.f32 %v4013_v57, %v3951_v46  ;;  %v3955_v46 = vmul.f32 %v8627_v35, %v8627_v35 }
 0x49d   : > { %v8632_v47 = vpop.f32.mrf.mxu0 }
 0x49e   : > { %9670 = vst [vmem:[#allocation9_spill] sm:$0xff] %v8632_v47  ;;  %v4015_v34 = vadd.f32 %v4014_v36, %v3952_v21  ;;  %v3883_v50 = vadd.f32 %v3882_v9, %v8632_v47  ;;  %v3953_v56 = vmul.f32 %v8632_v47, %v8632_v47 }
 0x49f   : > { %v8637_v31 = vpop.f32.mrf.mxu0 }
 0x4a0   : > { %9671 = vst [vmem:[#allocation4_spill] sm:$0xff] %v8637_v31  ;;  %v3884_v8 = vadd.f32 %v8617_v61, %v3883_v50  ;;  %v4016_v55 = vadd.f32 %v4015_v34, %v3953_v56 }
 0x4a1   : > { %v8642_v43 = vpop.f32.mrf.mxu0 }
 0x4a2   : > { %9672 = vst [vmem:[#allocation7_spill] sm:$0xff] %v8642_v43  ;;  %v4017_v57 = vadd.f32 %v4016_v55, %v3954_v33  ;;  %v3885_v21 = vadd.f32 %v8627_v35, %v3884_v8  ;;  %v3956_v47 = vmul.f32 %v8642_v43, %v8642_v43  ;;  %v3958_v33 = vmul.f32 %v8637_v31, %v8637_v31 }
 0x4a3   : > { %v8647_v36 = vpop.f32.mrf.mxu0 }
 0x4a4   : > { %9673 = vst [vmem:[#allocation6_spill] sm:$0xff] %v8647_v36  ;;  %v3886_v9 = vadd.f32 %v3885_v21, %v8642_v43  ;;  %v4018_v0 = vadd.f32 %v4017_v57, %v3955_v46  ;;  %v3959_v46 = vmul.f32 %v8647_v36, %v8647_v36 }
 0x4a5   : > { %v8652_v18 = vpop.f32.mrf.mxu0 }
 0x4a6   : > { %9674 = vst [vmem:[#allocation16_spill] sm:$0xff] %v8652_v18  ;;  %v4019_v50 = vadd.f32 %v4018_v0, %v3956_v47  ;;  %v3887_v34 = vadd.f32 %v3886_v9, %v8652_v18  ;;  %v3957_v56 = vmul.f32 %v8652_v18, %v8652_v18 }
 0x4a7   : > { %v8657_v61 = vpop.f32.mrf.mxu0 }
 0x4a8   : > { %v3888_v8 = vadd.f32 %v8637_v31, %v3887_v34  ;;  %v4020_v55 = vadd.f32 %v4019_v50, %v3957_v56  ;;  %v3962_v7 = vmul.f32 %v8657_v61, %v8657_v61 }
 0x4a9   : > { %v3816_v21 = vpop.f32.mrf.mxu0 }
 0x4aa   : > { %v4021_v57 = vadd.f32 %v4020_v55, %v3958_v33  ;;  %v3889_v47 = vadd.f32 %v8647_v36, %v3888_v8  ;;  %v3960_v43 = vmul.f32 %v3816_v21, %v3816_v21 }
 0x4ab   : > { %v5315_v0 = vpop.f32.mrf.mxu0 }
 0x4ac   : > { %v3890_v9 = vadd.f32 %v3889_v47, %v3816_v21  ;;  %v4022_v35 = vadd.f32 %v4021_v57, %v3959_v46  ;;  %v3963_v56 = vmul.f32 %v5315_v0, %v5315_v0 }
 0x4ad   : > { %v3819_v18 = vpop.f32.mrf.mxu0 }
 0x4ae   : > { %v4023_v2 = vadd.f32 %v4022_v35, %v3960_v43  ;;  %v3891_v11 = vadd.f32 %v3890_v9, %v3819_v18  ;;  %v3961_v42 = vmul.f32 %v3819_v18, %v3819_v18  ;;  %v5966_v9 = vld [vmem:[%s9375_s6 + $0x20] sm:$0xff]  }
 0x4af   : > { %5323 = vmatpush3.bf16.msra.mxu1 %v5966_v9  ;;  %v4116_v9 = vsub.s32 5, %v9571_v51 }
 0x4b0   : > { %v3892_v50 = vadd.f32 %v8657_v61, %v3891_v11  ;;  %v4024_v34 = vadd.f32 %v4023_v2, %v3961_v42  ;;  %v9675_v42 = vmov 0.0  }
 0x4b1   : > { %5324 = vmatprep.subr.bf16.mxu1 %v9675_v42  ;;  %5332 = vmatprep.mubr.msk.bf16.mxu1 %vm5991_vm0, %v9675_v42 }
 0x4b2   : > { %v3893_v31 = vadd.f32 %v5315_v0, %v3892_v50  ;;  %v4025_v15 = vadd.f32 %v4024_v34, %v3962_v7  ;;  %v5968_v50 = vld [vmem:[%s9375_s6 + $0x10] sm:$0xff]  }
 0x4b4   : > { %v3894_v33 = vrot.slane %v3893_v31, 4  ;;  %v4026_v55 = vadd.f32 %v4025_v15, %v3963_v56  ;;  %v5967_v15 = vld [vmem:[%s9375_s6 + $0x18] sm:$0xff]  }
 0x4b5   : > { %5325 = vmatpush3.bf16.msra.mxu1 %v5967_v15 }
 0x4b6   : > { %v3895_v8 = vadd.f32 %v3894_v33, %v3893_v31  ;;  %v4027_v36 = vrot.slane %v4026_v55, 4  ;;  %5326 = vmatprep.subr.bf16.mxu1 %v9675_v42  ;;  %v5970_v33 = vld [vmem:[%s9375_s6] sm:$0xff]  }
 0x4b8   : > { %v3896_v47 = vrot.slane %v3895_v8, 2  ;;  %v4028_v24 = vadd.f32 %v4027_v36, %v4026_v55  ;;  %v4048_v55 = vsub.s32 4, %v9571_v51 }
 0x4b9   : > { %5327 = vmatpush3.bf16.msra.mxu1 %v5968_v50 }
 0x4ba   : > { %v3897_v46 = vadd.f32 %v3896_v47, %v3895_v8  ;;  %v4029_v57 = vrot.slane %v4028_v24, 2  ;;  %5328 = vmatprep.subr.bf16.mxu1 %v9675_v42  ;;  %v5978_v47 = vld [vmem:[%s9374_s5] sm:$0x3f] }
 0x4bc   : > { %v3898_v35 = vrot.slane %v3897_v46, 1  ;;  %v4030_v43 = vadd.f32 %v4029_v57, %v4028_v24 }
 0x4be   : > { %v3899_v45 = vadd.f32 %v3898_v35, %v3897_v46  ;;  %v4031_v11 = vrot.slane %v4030_v43, 1 }
 0x4c0   : > { %v4032_v7 = vadd.f32 %v4031_v11, %v4030_v43  ;;  %v4033_v2 = vmul.f32 0.001953125, %v3899_v45  ;;  %v5969_v45 = vld [vmem:[%s9375_s6 + $0x8] sm:$0xff]  }
 0x4c1   : > { %5329 = vmatpush3.bf16.msra.mxu1 %v5969_v45 }
 0x4c2   : > { %v4034_v31 = vmul.f32 0.001953125, %v4032_v7  ;;  %v4035_v36 = vmul.f32 %v4033_v2, %v4033_v2  ;;  %5330 = vmatprep.subr.bf16.mxu1 %v9675_v42 }
 0x4c4   : > { %v4036_v24 = vsub.f32 %v4034_v31, %v4035_v36 }
 0x4c5   : > { %5331 = vmatpush3.bf16.msra.mxu1 %v5970_v33 }
 0x4c6   : > { %v4037_v34 = vmax.f32 %v4036_v24, 0.0 }
 0x4c8   : > { %v4038_v56 = vadd.f32 1e-05, %v4037_v34 }
 0x4ca   : > { %5975 = vrsqrt.f32 %v4038_v56 }
 0x4d7   : > { %v5976_v8 = vpop.eup %5975 }
 0x4d8   : > { %v4040_v46 = vmul.f32 %v5978_v47, %v5976_v8 }
 0x4da   : > { %v4041_v57 = vmul.f32 %v4040_v46, %v4033_v2  ;;  %v8692_v35 = vrot.slane %v4040_v46, %v4048_v55 }
 0x4dc   : > { %v4043_v43 = vrot.slane %v4041_v57, 7  ;;  %v4110_v11 = vmul.f32 %v8692_v35, %v3816_v21  ;;  %v4111_v7 = vmul.f32 %v8692_v35, %v3819_v18  ;;  %v4112_v42 = vmul.f32 %v8657_v61, %v8692_v35 }
 0x4dd   : > { %v4113_v15 = vmul.f32 %v5315_v0, %v8692_v35  ;;  %v8702_v36 = vmul.f32 %v8692_v35, %v8365_v58  ;;  %v8706_v2 = vmul.f32 %v8692_v35, %v8369_v25  ;;  %v8710_v51 = vmul.f32 %v8363_v3, %v8692_v35 }
 0x4de   : > { %v4045_v31 = vsub.f32 %v5978_v47, %v4043_v43  ;;  %v8714_v18 = vmul.f32 %v8367_v28, %v8692_v35  ;;  %v8718_v61 = vmul.f32 %v8692_v35, %v8382_v62  ;;  %v8722_v58 = vmul.f32 %v8692_v35, %v8392_v27 }
 0x4df   : > { %v8726_v25 = vmul.f32 %v8377_v4, %v8692_v35  ;;  %v8732_v3 = vmul.f32 %v8387_v40, %v8692_v35  ;;  %v8736_v28 = vmul.f32 %v8692_v35, %v8402_v17  ;;  %v8740_v62 = vmul.f32 %v8692_v35, %v8412_v37 }
 0x4e0   : > { %v8728_v21 = vrot.slane %v4045_v31, %v4116_v9  ;;  %v8744_v27 = vmul.f32 %v8397_v48, %v8692_v35  ;;  %v8748_v4 = vmul.f32 %v8407_v32, %v8692_v35  ;;  %v8752_v40 = vmul.f32 %v8692_v35, %v8422_v26 }
 0x4e1   : > { %v8756_v17 = vmul.f32 %v8692_v35, %v8432_v59  ;;  %v8764_v32 = vmul.f32 %v8417_v54, %v8692_v35  ;;  %v8768_v26 = vmul.f32 %v8427_v14, %v8692_v35  ;;  %v8772_v59 = vmul.f32 %v8692_v35, %v8442_v30 }
 0x4e2   : > { %v4178_v0 = vadd.f32 %v8728_v21, %v4110_v11  ;;  %v4179_v37 = vadd.f32 %v8728_v21, %v4111_v7  ;;  %v4180_v24 = vadd.f32 %v8728_v21, %v4112_v42  ;;  %v4181_v48 = vadd.f32 %v8728_v21, %v4113_v15  ;;  %v9678_v7 = vld [vmem:[#allocation15_spill] sm:$0xff]  ;;  %v9679_v15 = vld [vmem:[#allocation8_spill] sm:$0xff] }
 0x4e3   : > { %v8776_v50 = vmul.f32 %v8692_v35, %v8452_v63  ;;  %v8780_v54 = vmul.f32 %v8437_v1, %v8692_v35  ;;  %v8784_v14 = vmul.f32 %v8447_v20, %v8692_v35  ;;  %v8788_v30 = vmul.f32 %v8692_v35, %v8462_v19 }
 0x4e4   : > { %v4242_v34 = vmax.f32 %v4178_v0, 0.0  ;;  %v4243_v45 = vmax.f32 %v4179_v37, 0.0  ;;  %v4244_v56 = vmax.f32 %v4180_v24, 0.0  ;;  %v4245_v33 = vmax.f32 %v4181_v48, 0.0  ;;  %v9681_v0 = vld [vmem:[#allocation26_spill] sm:$0xff]  ;;  %v9682_v24 = vld [vmem:[#allocation20_spill] sm:$0xff] }
 0x4e5   : > { %v8792_v63 = vmul.f32 %v8692_v35, %v8472_v39  ;;  %v8796_v47 = vmul.f32 %v8457_v53, %v8692_v35  ;;  %v8800_v1 = vmul.f32 %v8467_v22, %v8692_v35  ;;  %v8804_v20 = vmul.f32 %v8692_v35, %v8482_v41 }
 0x4e6   : > { %v4276_v55 = vpack.c.bf16 %v4243_v45, %v4242_v34  ;;  %v4277_v8 = vpack.c.bf16 %v4245_v33, %v4244_v56  ;;  %v8808_v19 = vmul.f32 %v8692_v35, %v8492_v38  ;;  %v8812_v39 = vmul.f32 %v8477_v29, %v8692_v35  ;;  %v9683_v34 = vld [vmem:[#allocation2_spill] sm:$0xff]  ;;  %v9684_v56 = vld [vmem:[#allocation24_spill] sm:$0xff] }
 0x4e7   : > { %v8816_v53 = vmul.f32 %v8487_v12, %v8692_v35  ;;  %v8820_v22 = vmul.f32 %v8692_v35, %v8502_v16  ;;  %v8824_v41 = vmul.f32 %v8692_v35, %v8512_v23  ;;  %v8828_v38 = vmul.f32 %v8497_v13, %v8692_v35 }
 0x4e8   : > { %v4443_v46 = vmax.bf16 %v4277_v8, %v4276_v55  ;;  %v8832_v29 = vmul.f32 %v8507_v6, %v8692_v35  ;;  %v8836_v12 = vmul.f32 %v8692_v35, %v8522_v60  ;;  %v8840_v16 = vmul.f32 %v8692_v35, %v8532_v52  ;;  %v9676_v52 = vld [vmem:[#allocation14_spill] sm:$0xff]  ;;  %v9685_v55 = vld [vmem:[#allocation13_spill] sm:$0xff] }
 0x4e9   : > { %v8844_v23 = vmul.f32 %v8517_v49, %v8692_v35  ;;  %v8848_v13 = vmul.f32 %v8527_v10, %v8692_v35  ;;  %v8852_v6 = vmul.f32 %v8692_v35, %v8542_v44  ;;  %v8856_v60 = vmul.f32 %v8692_v35, %v8552_v5  ;;  %v9677_v49 = vld [vmem:[#allocation21_spill] sm:$0xff]  ;;  %v9680_v5 = vld [vmem:[#allocation27_spill] sm:$0xff] }
 0x4ea   : > { %v4444_v57 = vunpack.i.l.bf16 %v4443_v46  ;;  %v4445_v43 = vunpack.i.h.bf16 %v4443_v46  ;;  %v8860_v9 = vmul.f32 %v9676_v52, %v8692_v35  ;;  %v8864_v11 = vmul.f32 %v9677_v49, %v8692_v35  ;;  %v9688_v52 = vld [vmem:[#allocation19_spill] sm:$0xff] }
 0x4eb   : > { %v8868_v10 = vmul.f32 %v8692_v35, %v9678_v7  ;;  %v8872_v44 = vmul.f32 %v8692_v35, %v9679_v15  ;;  %v8876_v31 = vmul.f32 %v9680_v5, %v8692_v35  ;;  %v8880_v37 = vmul.f32 %v9681_v0, %v8692_v35  ;;  %v9690_v7 = vld [vmem:[#allocation18_spill] sm:$0xff] }
 0x4ec   : > { %v4446_v42 = vmax.f32 %v4444_v57, %v4445_v43  ;;  %v8884_v48 = vmul.f32 %v8692_v35, %v9682_v24  ;;  %v8888_v45 = vmul.f32 %v8692_v35, %v9683_v34  ;;  %v8892_v33 = vmul.f32 %v9684_v56, %v8692_v35  ;;  %v9686_v57 = vld [vmem:[#allocation3_spill] sm:$0xff]  ;;  %v9692_v5 = vld [vmem:[#allocation22_spill] sm:$0xff]  ;;  %v9694_v24 = vld [vmem:[#allocation25_spill] sm:$0xff] }
 0x4ed   : > { %v8896_v8 = vmul.f32 %v9685_v55, %v8692_v35  ;;  %v8900_v43 = vmul.f32 %v8692_v35, %v9686_v57  ;;  %v8904_v49 = vmul.f32 %v8692_v35, %v9688_v52  ;;  %v8908_v15 = vmul.f32 %v9690_v7, %v8692_v35  ;;  %v9695_v56 = vld [vmem:[#allocation9_spill] sm:$0xff]  ;;  %v9697_v57 = vld [vmem:[#allocation23_spill] sm:$0xff] }
 0x4ee   : > { %v4447_v46 = vrot.slane %v4446_v42, 4  ;;  %v8912_v0 = vmul.f32 %v9692_v5, %v8692_v35  ;;  %v8916_v34 = vmul.f32 %v8692_v35, %v9694_v24  ;;  %v8920_v55 = vmul.f32 %v8692_v35, %v9695_v56  ;;  %v9699_v7 = vld [vmem:[#allocation11_spill] sm:$0xff]  ;;  %v9702_v56 = vld [vmem:[#allocation4_spill] sm:$0xff] }
 0x4ef   : > { %9687 = vst [vmem:[#allocation10_spill] sm:$0xff] %v8900_v43  ;;  %9689 = vst [vmem:[#allocation12_spill] sm:$0xff] %v8904_v49  ;;  %v8924_v52 = vmul.f32 %v9697_v57, %v8692_v35  ;;  %v9700_v43 = vld [vmem:[#allocation7_spill] sm:$0xff]  ;;  %v9703_v57 = vld [vmem:[#allocation6_spill] sm:$0xff] }
 0x4f0   : > { %9691 = vst [vmem:[#allocation28_spill] sm:$0xff] %v8908_v15  ;;  %9693 = vst [vmem:[#allocation5_spill] sm:$0xff] %v8912_v0  ;;  %v4448_v49 = vmax.f32 %v4446_v42, %v4447_v46  ;;  %v8928_v15 = vmul.f32 %v9699_v7, %v8692_v35  ;;  %v8932_v5 = vmul.f32 %v8692_v35, %v9700_v43  ;;  %v9701_v0 = vld [vmem:[#allocation16_spill] sm:$0xff] }
 0x4f1   : > { %9696 = vst [vmem:[#allocation17_spill] sm:$0xff] %v8920_v55  ;;  %9698 = vst [vmem:[#allocation29_spill] sm:$0xff] %v8924_v52  ;;  %v8936_v24 = vmul.f32 %v8692_v35, %v9701_v0  ;;  %v8940_v55 = vmul.f32 %v9702_v56, %v8692_v35  ;;  %v8944_v52 = vmul.f32 %v9703_v57, %v8692_v35 }
 0x4f2   : > { %v8948_v42 = vadd.f32 %v8728_v21, %v8702_v36  ;;  %v8952_v46 = vadd.f32 %v8728_v21, %v8706_v2  ;;  %v4449_v43 = vrot.slane %v4448_v49, 2  ;;  %v8956_v0 = vadd.f32 %v8728_v21, %v8710_v51 }
 0x4f3   : > { %v8960_v7 = vadd.f32 %v8728_v21, %v8714_v18  ;;  %v8964_v35 = vadd.f32 %v8728_v21, %v8718_v61  ;;  %v8968_v36 = vadd.f32 %v8728_v21, %v8722_v58  ;;  %v8972_v2 = vadd.f32 %v8728_v21, %v8726_v25 }
 0x4f4   : > { %v8976_v51 = vadd.f32 %v8728_v21, %v8732_v3  ;;  %v8980_v18 = vadd.f32 %v8728_v21, %v8736_v28  ;;  %v4450_v56 = vmax.f32 %v4448_v49, %v4449_v43  ;;  %v8984_v61 = vadd.f32 %v8728_v21, %v8740_v62 }
 0x4f5   : > { %v8988_v58 = vadd.f32 %v8728_v21, %v8744_v27  ;;  %v8992_v25 = vadd.f32 %v8728_v21, %v8748_v4  ;;  %v8996_v3 = vadd.f32 %v8728_v21, %v8752_v40  ;;  %v9000_v28 = vadd.f32 %v8728_v21, %v8756_v17 }
 0x4f6   : > { %v9004_v62 = vadd.f32 %v8728_v21, %v8764_v32  ;;  %v9008_v27 = vadd.f32 %v8728_v21, %v8768_v26  ;;  %v4451_v49 = vrot.slane %v4450_v56, 1  ;;  %v9012_v4 = vadd.f32 %v8728_v21, %v8772_v59  ;;  %v9706_v43 = vld [vmem:[#allocation10_spill] sm:$0xff] }
 0x4f7   : > { %v9016_v40 = vadd.f32 %v8728_v21, %v8776_v50  ;;  %v9020_v17 = vadd.f32 %v8728_v21, %v8780_v54  ;;  %v9024_v32 = vadd.f32 %v8728_v21, %v8784_v14  ;;  %v9028_v26 = vadd.f32 %v8728_v21, %v8788_v30 }
 0x4f8   : > { %v9032_v59 = vadd.f32 %v8728_v21, %v8792_v63  ;;  %v9036_v50 = vadd.f32 %v8728_v21, %v8796_v47  ;;  %v9038_v57 = vmax.f32 %v4450_v56, %v4451_v49  ;;  %v9042_v54 = vadd.f32 %v8728_v21, %v8800_v1  ;;  %v9708_v56 = vld [vmem:[#allocation12_spill] sm:$0xff] }
 0x4f9   : > { %v9046_v14 = vadd.f32 %v8728_v21, %v8804_v20  ;;  %v9050_v30 = vadd.f32 %v8728_v21, %v8808_v19  ;;  %v9054_v63 = vadd.f32 %v8728_v21, %v8812_v39  ;;  %v9058_v47 = vadd.f32 %v8728_v21, %v8816_v53  ;;  %v9709_v49 = vld [vmem:[#allocation28_spill] sm:$0xff] }
 0x4fa   : > { %9704 = vst [vmem:[#allocation30_spill] sm:$0xff] %v9038_v57  ;;  %v9062_v1 = vadd.f32 %v8728_v21, %v8820_v22  ;;  %v9066_v20 = vadd.f32 %v8728_v21, %v8824_v41  ;;  %v9070_v19 = vadd.f32 %v8728_v21, %v8828_v38  ;;  %v9074_v39 = vadd.f32 %v8728_v21, %v8832_v29  ;;  %v9710_v57 = vld [vmem:[#allocation5_spill] sm:$0xff] }
 0x4fb   : > { %v9078_v53 = vadd.f32 %v8728_v21, %v8836_v12  ;;  %v9082_v22 = vadd.f32 %v8728_v21, %v8840_v16  ;;  %v9086_v41 = vadd.f32 %v8728_v21, %v8844_v23  ;;  %v9090_v38 = vadd.f32 %v8728_v21, %v8848_v13 }
 0x4fc   : > { %v9094_v29 = vadd.f32 %v8728_v21, %v8852_v6  ;;  %v9098_v12 = vadd.f32 %v8728_v21, %v8856_v60  ;;  %v9102_v16 = vadd.f32 %v8728_v21, %v8860_v9  ;;  %v9106_v23 = vadd.f32 %v8728_v21, %v8864_v11 }
 0x4fd   : > { %v9110_v13 = vadd.f32 %v8728_v21, %v8868_v10  ;;  %v9114_v6 = vadd.f32 %v8728_v21, %v8872_v44  ;;  %v9118_v60 = vadd.f32 %v8728_v21, %v8876_v31  ;;  %v9122_v9 = vadd.f32 %v8728_v21, %v8880_v37 }
 0x4fe   : > { %v9126_v11 = vadd.f32 %v8728_v21, %v8884_v48  ;;  %v9130_v10 = vadd.f32 %v8728_v21, %v8888_v45  ;;  %v9134_v44 = vadd.f32 %v8728_v21, %v8892_v33  ;;  %v9138_v31 = vadd.f32 %v8728_v21, %v8896_v8 }
 0x4ff   : > { %v9142_v37 = vadd.f32 %v8728_v21, %v9706_v43  ;;  %v9146_v48 = vadd.f32 %v8728_v21, %v9708_v56  ;;  %v9150_v45 = vadd.f32 %v8728_v21, %v9709_v49  ;;  %v9154_v33 = vadd.f32 %v8728_v21, %v9710_v57 }
 0x500   : > { %9705 = vst [vmem:[#allocation14_spill] sm:$0xff] %v9138_v31  ;;  %v9158_v8 = vadd.f32 %v8728_v21, %v8916_v34  ;;  %v9711_v31 = vld [vmem:[#allocation17_spill] sm:$0xff]  ;;  %v9170_v49 = vadd.f32 %v8728_v21, %v8928_v15  ;;  %v9174_v57 = vadd.f32 %v8728_v21, %v8932_v5  ;;  %v9178_v34 = vadd.f32 %v8728_v21, %v8936_v24 }
 0x501   : > { %9707 = vst [vmem:[#allocation21_spill] sm:$0xff] %v9142_v37  ;;  %v9162_v43 = vadd.f32 %v8728_v21, %v9711_v31  ;;  %v9712_v37 = vld [vmem:[#allocation29_spill] sm:$0xff]  ;;  %v9182_v31 = vadd.f32 %v8728_v21, %v8940_v55  ;;  %v4183_v15 = vmax.f32 %v8952_v46, 0.0  ;;  %v4185_v5 = vmax.f32 %v8960_v7, 0.0 }
 0x502   : > { %v9166_v56 = vadd.f32 %v8728_v21, %v9712_v37  ;;  %9714 = vst [vmem:[#allocation8_spill] sm:$0xff] %v9170_v49  ;;  %9715 = vst [vmem:[#allocation27_spill] sm:$0xff] %v9174_v57  ;;  %v9186_v37 = vadd.f32 %v8728_v21, %v8944_v52  ;;  %v4184_v49 = vmax.f32 %v8956_v0, 0.0  ;;  %v4186_v57 = vmax.f32 %v8964_v35, 0.0 }
 0x503   : > { %9716 = vst [vmem:[#allocation26_spill] sm:$0xff] %v9178_v34  ;;  %9717 = vst [vmem:[#allocation20_spill] sm:$0xff] %v9182_v31  ;;  %v4187_v24 = vmax.f32 %v8968_v36, 0.0  ;;  %v4188_v34 = vmax.f32 %v8972_v2, 0.0  ;;  %v4189_v55 = vmax.f32 %v8976_v51, 0.0  ;;  %v4190_v31 = vmax.f32 %v8980_v18, 0.0 }
 0x504   : > { %9713 = vst [vmem:[#allocation15_spill] sm:$0xff] %v9166_v56  ;;  %9718 = vst [vmem:[#allocation2_spill] sm:$0xff] %v9186_v37  ;;  %v4182_v56 = vmax.f32 %v8948_v42, 0.0  ;;  %v4191_v21 = vmax.f32 %v8984_v61, 0.0  ;;  %v4192_v52 = vmax.f32 %v8988_v58, 0.0  ;;  %v4193_v42 = vmax.f32 %v8992_v25, 0.0 }
 0x505   : > { %v4194_v46 = vmax.f32 %v8996_v3, 0.0  ;;  %v4195_v0 = vmax.f32 %v9000_v28, 0.0  ;;  %v4196_v7 = vmax.f32 %v9004_v62, 0.0  ;;  %v4197_v35 = vmax.f32 %v9008_v27, 0.0 }
 0x506   : > { %v4198_v36 = vmax.f32 %v9012_v4, 0.0  ;;  %v4199_v2 = vmax.f32 %v9016_v40, 0.0  ;;  %v4200_v51 = vmax.f32 %v9020_v17, 0.0  ;;  %v4201_v18 = vmax.f32 %v9024_v32, 0.0 }
 0x507   : > { %v4202_v61 = vmax.f32 %v9028_v26, 0.0  ;;  %v4203_v58 = vmax.f32 %v9032_v59, 0.0  ;;  %v4204_v25 = vmax.f32 %v9036_v50, 0.0  ;;  %v4205_v3 = vmax.f32 %v9042_v54, 0.0 }
 0x508   : > { %v4206_v28 = vmax.f32 %v9046_v14, 0.0  ;;  %v4207_v62 = vmax.f32 %v9050_v30, 0.0  ;;  %v4208_v27 = vmax.f32 %v9054_v63, 0.0  ;;  %v4209_v4 = vmax.f32 %v9058_v47, 0.0  ;;  %v9720_v37 = vld [vmem:[#allocation21_spill] sm:$0xff] }
 0x509   : > { %v4210_v40 = vmax.f32 %v9062_v1, 0.0  ;;  %v4211_v17 = vmax.f32 %v9066_v20, 0.0  ;;  %v4212_v32 = vmax.f32 %v9070_v19, 0.0  ;;  %v4213_v26 = vmax.f32 %v9074_v39, 0.0 }
 0x50a   : > { %v4214_v59 = vmax.f32 %v9078_v53, 0.0  ;;  %v4215_v50 = vmax.f32 %v9082_v22, 0.0  ;;  %v4216_v54 = vmax.f32 %v9086_v41, 0.0  ;;  %v4217_v14 = vmax.f32 %v9090_v38, 0.0 }
 0x50b   : > { %v4218_v30 = vmax.f32 %v9094_v29, 0.0  ;;  %v4219_v63 = vmax.f32 %v9098_v12, 0.0  ;;  %v4220_v47 = vmax.f32 %v9102_v16, 0.0  ;;  %v4221_v1 = vmax.f32 %v9106_v23, 0.0  ;;  %v9719_v29 = vld [vmem:[#allocation14_spill] sm:$0xff] }
 0x50c   : > { %v4222_v20 = vmax.f32 %v9110_v13, 0.0  ;;  %v4223_v19 = vmax.f32 %v9114_v6, 0.0  ;;  %v4224_v39 = vmax.f32 %v9118_v60, 0.0  ;;  %v4225_v53 = vmax.f32 %v9122_v9, 0.0 }
 0x50d   : > { %v4226_v22 = vmax.f32 %v9126_v11, 0.0  ;;  %v4227_v41 = vmax.f32 %v9130_v10, 0.0  ;;  %v4228_v38 = vmax.f32 %v9134_v44, 0.0  ;;  %v4229_v12 = vmax.f32 %v9719_v29, 0.0 }
 0x50e   : > { %v4230_v16 = vmax.f32 %v9720_v37, 0.0  ;;  %v4231_v23 = vmax.f32 %v9146_v48, 0.0  ;;  %v4232_v13 = vmax.f32 %v9150_v45, 0.0  ;;  %v4233_v6 = vmax.f32 %v9154_v33, 0.0 }
 0x50f   : > { %v4234_v60 = vmax.f32 %v9158_v8, 0.0  ;;  %v4235_v9 = vmax.f32 %v9162_v43, 0.0  ;;  %v4246_v29 = vpack.c.bf16 %v4183_v15, %v4182_v56  ;;  %v4247_v44 = vpack.c.bf16 %v4185_v5, %v4184_v49 }
 0x510   : > { %v4248_v37 = vpack.c.bf16 %v4187_v24, %v4186_v57  ;;  %v4249_v48 = vpack.c.bf16 %v4189_v55, %v4188_v34  ;;  %v4250_v33 = vpack.c.bf16 %v4191_v21, %v4190_v31  ;;  %v4251_v45 = vpack.c.bf16 %v4193_v42, %v4192_v52 }
 0x511   : > { %v4252_v8 = vpack.c.bf16 %v4195_v0, %v4194_v46  ;;  %v4253_v43 = vpack.c.bf16 %v4197_v35, %v4196_v7  ;;  %v4254_v10 = vpack.c.bf16 %v4199_v2, %v4198_v36  ;;  %v4255_v11 = vpack.c.bf16 %v4201_v18, %v4200_v51 }
 0x512   : > { %v4256_v15 = vpack.c.bf16 %v4203_v58, %v4202_v61  ;;  %v4257_v56 = vpack.c.bf16 %v4205_v3, %v4204_v25  ;;  %v4258_v5 = vpack.c.bf16 %v4207_v62, %v4206_v28  ;;  %v4259_v49 = vpack.c.bf16 %v4209_v4, %v4208_v27 }
 0x513   : > { %v4260_v24 = vpack.c.bf16 %v4211_v17, %v4210_v40  ;;  %v4261_v57 = vpack.c.bf16 %v4213_v26, %v4212_v32  ;;  %v9248_v34 = vpack.c.bf16 %v4215_v50, %v4214_v59  ;;  %v9250_v55 = vpack.c.bf16 %v4217_v14, %v4216_v54 }
 0x514   : > { %v9252_v21 = vpack.c.bf16 %v4219_v63, %v4218_v30  ;;  %v9254_v31 = vpack.c.bf16 %v4221_v1, %v4220_v47  ;;  %v9256_v42 = vpack.c.bf16 %v4223_v19, %v4222_v20  ;;  %v9258_v52 = vpack.c.bf16 %v4225_v53, %v4224_v39 }
 0x515   : > { %v9260_v46 = vpack.c.bf16 %v4227_v41, %v4226_v22  ;;  %v9262_v0 = vpack.c.bf16 %v4229_v12, %v4228_v38  ;;  %v9264_v7 = vpack.c.bf16 %v4231_v23, %v4230_v16  ;;  %v9266_v35 = vpack.c.bf16 %v4233_v6, %v4232_v13 }
 0x516   : > { %v9268_v36 = vpack.c.bf16 %v4235_v9, %v4234_v60  ;;  %v4278_v2 = vmax.bf16 %v4247_v44, %v4246_v29  ;;  %v4289_v51 = vmax.bf16 %v4249_v48, %v4248_v37  ;;  %v4300_v18 = vmax.bf16 %v4251_v45, %v4250_v33 }
 0x517   : > { %v4311_v61 = vmax.bf16 %v4253_v43, %v4252_v8  ;;  %v4322_v58 = vmax.bf16 %v4255_v11, %v4254_v10  ;;  %v4333_v25 = vmax.bf16 %v4257_v56, %v4256_v15  ;;  %v4344_v3 = vmax.bf16 %v4259_v49, %v4258_v5 }
 0x518   : > { %v4279_v28 = vunpack.i.l.bf16 %v4278_v2  ;;  %v4280_v62 = vunpack.i.h.bf16 %v4278_v2  ;;  %v4290_v27 = vunpack.i.l.bf16 %v4289_v51  ;;  %v4291_v4 = vunpack.i.h.bf16 %v4289_v51 }
 0x519   : > { %v4301_v40 = vunpack.i.l.bf16 %v4300_v18  ;;  %v4302_v17 = vunpack.i.h.bf16 %v4300_v18  ;;  %v4312_v32 = vunpack.i.l.bf16 %v4311_v61  ;;  %v4313_v26 = vunpack.i.h.bf16 %v4311_v61 }
 0x51a   : > { %v4281_v59 = vmax.f32 %v4279_v28, %v4280_v62  ;;  %v4292_v50 = vmax.f32 %v4290_v27, %v4291_v4  ;;  %v4323_v54 = vunpack.i.l.bf16 %v4322_v58  ;;  %v4324_v14 = vunpack.i.h.bf16 %v4322_v58 }
 0x51b   : > { %v4303_v30 = vmax.f32 %v4301_v40, %v4302_v17  ;;  %v4314_v63 = vmax.f32 %v4312_v32, %v4313_v26  ;;  %v4334_v47 = vunpack.i.l.bf16 %v4333_v25  ;;  %v4335_v1 = vunpack.i.h.bf16 %v4333_v25 }
 0x51c   : > { %v4282_v20 = vrot.slane %v4281_v59, 4  ;;  %v4293_v19 = vrot.slane %v4292_v50, 4  ;;  %v4325_v39 = vmax.f32 %v4323_v54, %v4324_v14  ;;  %v4345_v53 = vunpack.i.l.bf16 %v4344_v3  ;;  %v9727_v14 = vld [vmem:[#allocation15_spill] sm:$0xff] }
 0x51d   : > { %v4304_v22 = vrot.slane %v4303_v30, 4  ;;  %v4315_v41 = vrot.slane %v4314_v63, 4  ;;  %v4336_v38 = vmax.f32 %v4334_v47, %v4335_v1  ;;  %v4346_v12 = vunpack.i.h.bf16 %v4344_v3 }
 0x51e   : > { %v4283_v16 = vmax.f32 %v4281_v59, %v4282_v20  ;;  %v4294_v23 = vmax.f32 %v4292_v50, %v4293_v19  ;;  %v4326_v13 = vrot.slane %v4325_v39, 4  ;;  %v4355_v6 = vmax.bf16 %v4261_v57, %v4260_v24  ;;  %v9731_v20 = vld [vmem:[#allocation27_spill] sm:$0xff] }
 0x51f   : > { %v4305_v60 = vmax.f32 %v4303_v30, %v4304_v22  ;;  %v4316_v9 = vmax.f32 %v4314_v63, %v4315_v41  ;;  %v4337_v11 = vrot.slane %v4336_v38, 4  ;;  %v4347_v10 = vmax.f32 %v4345_v53, %v4346_v12  ;;  %v9729_v63 = vld [vmem:[#allocation8_spill] sm:$0xff] }
 0x520   : > { %v4284_v44 = vrot.slane %v4283_v16, 2  ;;  %v4295_v29 = vrot.slane %v4294_v23, 2  ;;  %v4327_v37 = vmax.f32 %v4325_v39, %v4326_v13  ;;  %v4356_v48 = vunpack.i.l.bf16 %v4355_v6  ;;  %v9733_v39 = vld [vmem:[#allocation26_spill] sm:$0xff]  ;;  %v9735_v12 = vld [vmem:[#allocation20_spill] sm:$0xff] }
 0x521   : > { %v4306_v45 = vrot.slane %v4305_v60, 2  ;;  %v4317_v33 = vrot.slane %v4316_v9, 2  ;;  %v4338_v8 = vmax.f32 %v4336_v38, %v4337_v11  ;;  %v4348_v43 = vrot.slane %v4347_v10, 4 }
 0x522   : > { %v4285_v15 = vmax.f32 %v4283_v16, %v4284_v44  ;;  %v4296_v56 = vmax.f32 %v4294_v23, %v4295_v29  ;;  %v4328_v5 = vrot.slane %v4327_v37, 2  ;;  %v4357_v49 = vunpack.i.h.bf16 %v4355_v6  ;;  %v9737_v23 = vld [vmem:[#allocation2_spill] sm:$0xff] }
 0x523   : > { %v4307_v2 = vmax.f32 %v4305_v60, %v4306_v45  ;;  %v4318_v51 = vmax.f32 %v4316_v9, %v4317_v33  ;;  %v4339_v18 = vrot.slane %v4338_v8, 2  ;;  %v4349_v24 = vmax.f32 %v4347_v10, %v4348_v43 }
 0x524   : > { %v4286_v57 = vrot.slane %v4285_v15, 1  ;;  %v4297_v61 = vrot.slane %v4296_v56, 1  ;;  %v4329_v58 = vmax.f32 %v4327_v37, %v4328_v5  ;;  %v4358_v25 = vmax.f32 %v4356_v48, %v4357_v49 }
 0x525   : > { %v4308_v3 = vrot.slane %v4307_v2, 1  ;;  %v4319_v28 = vrot.slane %v4318_v51, 1  ;;  %v4340_v62 = vmax.f32 %v4338_v8, %v4339_v18  ;;  %v4350_v27 = vrot.slane %v4349_v24, 2 }
 0x526   : > { %v9270_v4 = vmax.f32 %v4285_v15, %v4286_v57  ;;  %v9272_v40 = vmax.f32 %v4296_v56, %v4297_v61  ;;  %v4330_v17 = vrot.slane %v4329_v58, 1  ;;  %v4359_v32 = vrot.slane %v4358_v25, 4 }
 0x527   : > { %v9274_v26 = vmax.f32 %v4307_v2, %v4308_v3  ;;  %v9276_v59 = vmax.f32 %v4318_v51, %v4319_v28  ;;  %v4341_v50 = vrot.slane %v4340_v62, 1  ;;  %v4351_v54 = vmax.f32 %v4349_v24, %v4350_v27 }
 0x528   : > { %v9728_v30 = vmax.f32 %v9727_v14, 0.0  ;;  %v9730_v47 = vmax.f32 %v9729_v63, 0.0  ;;  %v9732_v19 = vmax.f32 %v9731_v20, 0.0  ;;  %v9734_v53 = vmax.f32 %v9733_v39, 0.0 }
 0x529   : > { %v9286_v41 = vmax.f32 %v4329_v58, %v4330_v17  ;;  %v4360_v38 = vmax.f32 %v4358_v25, %v4359_v32  ;;  %v9736_v16 = vmax.f32 %v9735_v12, 0.0  ;;  %v9738_v13 = vmax.f32 %v9737_v23, 0.0 }
 0x52a   : > { %v4273_v1 = vpack.c.bf16 %v9730_v47, %v9728_v30  ;;  %v4274_v22 = vpack.c.bf16 %v9734_v53, %v9732_v19  ;;  %v4288_v60 = vpack.i.bf16 %v9270_v4, %v9270_v4  ;;  %v4299_v9 = vpack.i.bf16 %v9272_v40, %v9272_v40 }
 0x52b   : > { %v4275_v6 = vpack.c.bf16 %v9738_v13, %v9736_v16  ;;  %v4310_v11 = vpack.i.bf16 %v9274_v26, %v9274_v26  ;;  %v4321_v10 = vpack.i.bf16 %v9276_v59, %v9276_v59  ;;  %v9300_v44 = vmax.f32 %v4340_v62, %v4341_v50 }
 0x52c   : > { %v4366_v29 = vmax.bf16 %v9250_v55, %v9248_v34  ;;  %v4377_v37 = vmax.bf16 %v9254_v31, %v9252_v21  ;;  %v4332_v48 = vpack.i.bf16 %v9286_v41, %v9286_v41  ;;  %v4352_v45 = vrot.slane %v4351_v54, 1 }
 0x52d   : > { %v4388_v33 = vmax.bf16 %v9258_v52, %v9256_v42  ;;  %v4399_v8 = vmax.bf16 %v9262_v0, %v9260_v46  ;;  %v4361_v43 = vrot.slane %v4360_v38, 2  ;;  %v4343_v21 = vpack.i.bf16 %v9300_v44, %v9300_v44 }
 0x52e   : > { %v4367_v15 = vunpack.i.l.bf16 %v4366_v29  ;;  %v4368_v56 = vunpack.i.h.bf16 %v4366_v29  ;;  %v4378_v5 = vunpack.i.l.bf16 %v4377_v37  ;;  %v4379_v49 = vunpack.i.h.bf16 %v4377_v37 }
 0x52f   : > { %v4389_v2 = vunpack.i.l.bf16 %v4388_v33  ;;  %v4390_v34 = vunpack.i.h.bf16 %v4388_v33  ;;  %v4400_v55 = vunpack.i.l.bf16 %v4399_v8  ;;  %v4401_v51 = vunpack.i.h.bf16 %v4399_v8 }
 0x530   : > { %v4369_v31 = vmax.f32 %v4367_v15, %v4368_v56  ;;  %v4410_v18 = vmax.bf16 %v9266_v35, %v9264_v7  ;;  %v4380_v42 = vmax.f32 %v4378_v5, %v4379_v49  ;;  %v4421_v46 = vmax.bf16 %v4273_v1, %v9268_v36 }
 0x531   : > { %v4391_v52 = vmax.f32 %v4389_v2, %v4390_v34  ;;  %v4432_v0 = vmax.bf16 %v4275_v6, %v4274_v22  ;;  %v4402_v57 = vmax.f32 %v4400_v55, %v4401_v51  ;;  %v9317_v63 = vmax.f32 %v4360_v38, %v4361_v43 }
 0x532   : > { %v4370_v24 = vrot.slane %v4369_v31, 4  ;;  %v4411_v61 = vunpack.i.l.bf16 %v4410_v18  ;;  %v4412_v58 = vunpack.i.h.bf16 %v4410_v18  ;;  %v4381_v25 = vrot.slane %v4380_v42, 4 }
 0x533   : > { %v4392_v3 = vrot.slane %v4391_v52, 4  ;;  %v4422_v28 = vunpack.i.l.bf16 %v4421_v46  ;;  %v4423_v62 = vunpack.i.h.bf16 %v4421_v46  ;;  %v4403_v17 = vrot.slane %v4402_v57, 4 }
 0x534   : > { %v4371_v27 = vmax.f32 %v4369_v31, %v4370_v24  ;;  %v4413_v32 = vmax.f32 %v4411_v61, %v4412_v58  ;;  %v4433_v50 = vunpack.i.l.bf16 %v4432_v0  ;;  %v4382_v14 = vmax.f32 %v4380_v42, %v4381_v25 }
 0x535   : > { %v4393_v30 = vmax.f32 %v4391_v52, %v4392_v3  ;;  %v4424_v7 = vmax.f32 %v4422_v28, %v4423_v62  ;;  %v4434_v35 = vunpack.i.h.bf16 %v4432_v0  ;;  %v4404_v47 = vmax.f32 %v4402_v57, %v4403_v17 }
 0x536   : > { %v4372_v36 = vrot.slane %v4371_v27, 2  ;;  %v4414_v1 = vrot.slane %v4413_v32, 4  ;;  %v4383_v20 = vrot.slane %v4382_v14, 2  ;;  %v9319_v22 = vmax.f32 %v4351_v54, %v4352_v45 }
 0x537   : > { %v4394_v19 = vrot.slane %v4393_v30, 2  ;;  %v4425_v39 = vrot.slane %v4424_v7, 4  ;;  %v4435_v53 = vmax.f32 %v4433_v50, %v4434_v35  ;;  %v4405_v16 = vrot.slane %v4404_v47, 2 }
 0x538   : > { %v4373_v12 = vmax.f32 %v4371_v27, %v4372_v36  ;;  %v4415_v23 = vmax.f32 %v4413_v32, %v4414_v1  ;;  %v4384_v13 = vmax.f32 %v4382_v14, %v4383_v20  ;;  %v4363_v38 = vrot.slane %v9317_v63, 1  ;;  %v9739_v1 = vld [vmem:[#allocation30_spill] sm:$0xff] }
 0x539   : > { %v4395_v6 = vmax.f32 %v4393_v30, %v4394_v19  ;;  %v4426_v29 = vmax.f32 %v4424_v7, %v4425_v39  ;;  %v4436_v37 = vrot.slane %v4435_v53, 4  ;;  %v4406_v8 = vmax.f32 %v4404_v47, %v4405_v16 }
 0x53a   : > { %v4374_v33 = vrot.slane %v4373_v12, 1  ;;  %v4416_v43 = vrot.slane %v4415_v23, 2  ;;  %v4385_v15 = vrot.slane %v4384_v13, 1  ;;  %v4493_v34 = vunpack.c.l.b16 %v4288_v60 }
 0x53b   : > { %v4396_v56 = vrot.slane %v4395_v6, 1  ;;  %v4427_v5 = vrot.slane %v4426_v29, 2  ;;  %v4437_v49 = vmax.f32 %v4435_v53, %v4436_v37  ;;  %v4407_v45 = vrot.slane %v4406_v8, 1 }
 0x53c   : > { %v4375_v54 = vmax.f32 %v4373_v12, %v4374_v33  ;;  %v4417_v2 = vmax.f32 %v4415_v23, %v4416_v43  ;;  %v4386_v55 = vmax.f32 %v4384_v13, %v4385_v15  ;;  %v4494_v0 = vunpack.c.l.b16 %v4299_v9 }
 0x53d   : > { %v4397_v31 = vmax.f32 %v4395_v6, %v4396_v56  ;;  %v4428_v51 = vmax.f32 %v4426_v29, %v4427_v5  ;;  %v4438_v18 = vrot.slane %v4437_v49, 2  ;;  %v4408_v52 = vmax.f32 %v4406_v8, %v4407_v45  ;;  %v4774_v8 = vld [vmem:[%s9376_s7] ss:$0 sm:$0xff] }
 0x53e   : > { %v4376_v42 = vpack.i.bf16 %v4375_v54, %v4375_v54  ;;  %v4418_v46 = vrot.slane %v4417_v2, 1  ;;  %v4387_v24 = vpack.i.bf16 %v4386_v55, %v4386_v55  ;;  %v4495_v25 = vunpack.c.l.b16 %v4310_v11 }
 0x53f   : > { %v4398_v57 = vpack.i.bf16 %v4397_v31, %v4397_v31  ;;  %v4429_v61 = vrot.slane %v4428_v51, 1  ;;  %v4439_v58 = vmax.f32 %v4437_v49, %v4438_v18  ;;  %v4409_v4 = vpack.i.bf16 %v4408_v52, %v4408_v52 }
 0x540   : > { %v4419_v60 = vmax.f32 %v4417_v2, %v4418_v46  ;;  %v4501_v3 = vunpack.c.l.b16 %v4376_v42  ;;  %v4496_v27 = vunpack.c.l.b16 %v4321_v10  ;;  %v4502_v40 = vunpack.c.l.b16 %v4387_v24 }
 0x541   : > { %v4430_v28 = vmax.f32 %v4428_v51, %v4429_v61  ;;  %v4440_v62 = vrot.slane %v4439_v58, 1  ;;  %v4503_v17 = vunpack.c.l.b16 %v4398_v57  ;;  %v4510_v32 = vsel %vm4509_vm1, %v4494_v0, %v4493_v34 }
 0x542   : > { %v4420_v9 = vpack.i.bf16 %v4419_v60, %v4419_v60  ;;  %v4354_v50 = vpack.i.bf16 %v9319_v22, %v9319_v22  ;;  %v4523_v26 = vsel %vm4509_vm1, %v4502_v40, %v4501_v3  ;;  %v4364_v11 = vmax.f32 %v9317_v63, %v4363_v38 }
 0x543   : > { %v4431_v14 = vpack.i.bf16 %v4430_v28, %v4430_v28  ;;  %v4441_v30 = vmax.f32 %v4439_v58, %v4440_v62  ;;  %v4497_v7 = vunpack.c.l.b16 %v4332_v48  ;;  %v4498_v59 = vunpack.c.l.b16 %v4343_v21 }
 0x544   : > { %v4504_v10 = vunpack.c.l.b16 %v4409_v4  ;;  %v4512_v35 = vsel %vm4511_vm2, %v4495_v25, %v4510_v32  ;;  %v4365_v36 = vpack.i.bf16 %v4364_v11, %v4364_v11  ;;  %v4453_v20 = vpack.i.bf16 %v9739_v1, %v9739_v1 }
 0x545   : > { %v4442_v47 = vpack.i.bf16 %v4441_v30, %v4441_v30  ;;  %v4514_v19 = vsel %vm4513_vm3, %v4496_v27, %v4512_v35  ;;  %v4505_v39 = vunpack.c.l.b16 %v4420_v9  ;;  %v4499_v63 = vunpack.c.l.b16 %v4354_v50 }
 0x546   : > { %v4516_v53 = vsel %vm4515_vm4, %v4497_v7, %v4514_v19  ;;  %v4524_v41 = vsel %vm4511_vm2, %v4503_v17, %v4523_v26  ;;  %v4506_v48 = vunpack.c.l.b16 %v4431_v14  ;;  %v4500_v44 = vunpack.c.l.b16 %v4365_v36 }
 0x547   : > { %v4518_v21 = vsel %vm4517_vm5, %v4498_v59, %v4516_v53  ;;  %v4525_v22 = vsel %vm4513_vm3, %v4504_v10, %v4524_v41  ;;  %v4507_v12 = vunpack.c.l.b16 %v4442_v47  ;;  %v4508_v13 = vunpack.c.l.b16 %v4453_v20 }
 0x548   : > { %v4520_v16 = vsel %vm4519_vm6, %v4499_v63, %v4518_v21  ;;  %v4526_v23 = vsel %vm4515_vm4, %v4505_v39, %v4525_v22 }
 0x549   : > { %v4522_v6 = vsel %vm4521_vm7, %v4500_v44, %v4520_v16  ;;  %v4527_v29 = vsel %vm4517_vm5, %v4506_v48, %v4526_v23 }
 0x54a   : > { %v4528_v37 = vsel %vm4519_vm6, %v4507_v12, %v4527_v29 }
 0x54b   : > { %v4529_v38 = vsel %vm4521_vm7, %v4508_v13, %v4528_v37 }
 0x54c   : > { %v4530_v33 = vpack.c.b16 %v4529_v38, %v4522_v6 }
 0x54e   : > { %5333 = vmatmul.mubr.bf16.vlgmr.msra.gmra.mxu1 %v4530_v33 }
 0x60e   : > { %v4614_v43 = vpop.f32.mrf.mxu1 }
 0x60f   : > { %v4615_v15 = vadd.f32 %v4774_v8, %v4614_v43 }
 0x610   : > { %v5334_v56 = vpop.f32.mrf.mxu1 }
 0x611   : > { %4622 = vst.msk [vmem:[%s325_s11] sm:$0xff] %vm4621_vm8, %v4615_v15 }
 0x612   : > { %v4617_v5 = vpop.f32.mrf.mxu1 }
 0x613   : > { %v4618_v49 = vadd.f32 %v4774_v8, %v4617_v5 }
 0x614   : > { %v5335_v54 = vpop.f32.mrf.mxu1 }
 0x615   : > { %4623 = vst.msk [vmem:[%s325_s11 + $0x8] sm:$0xff] %vm4621_vm8, %v4618_v49 }
 0x616 PF: > { %s18_s27 = sadd.s32 1, %s5985_s27  }
 0x617   : > { %p15_p4 = scmp.ge.s32.totalorder %s18_s27, 4  }
 0x619   :  { %17 = sbr.rel (!%p15_p4) target bundleno = 1 (0x1), region = 86 }

</bundles_post_ra>
